<compile_context>
chip_gen: v5e
topology: v5e:2x2
jax: 0.10.0
libtpu: 0.0.40
codegen_flags: <defaults>
</compile_context>

<pallas_src>
import functools

import jax
import jax.numpy as jnp
from jax.experimental import pallas as pl
from jax.experimental.pallas import tpu as pltpu


def _round_up(x: int, m: int) -> int:
    return ((x + m - 1) // m) * m


def _activation(x, name):
    # Matches the module: gelu-family acts use tanh approx for gelu_fast /
    # gelu_pytorch_tanh, exact gelu otherwise; Cohere (Command-R) configs use "silu".
    if "gelu" in name:
        return jax.nn.gelu(x, approximate=name in ("gelu_fast", "gelu_pytorch_tanh"))
    if name == "silu":
        return jax.nn.silu(x)
    raise ValueError(f"unsupported hidden_act: {name}")


def _vmem_capacity_bytes() -> int:
    try:
        return int(pltpu.get_tpu_info().vmem_capacity_bytes)
    except Exception:
        return 64 << 20  # conservative (v7x-class)


def _num_tensorcores() -> int:
    try:
        return int(getattr(jax.devices()[0], "num_cores", 1) or 1)
    except Exception:
        return 1


def default_mlp_tiles() -> tuple:
    """Per-generation (tm, ti) defaults from the VMEM / roofline analysis above."""
    if _vmem_capacity_bytes() <= (64 << 20):
        # v7x-class: 64 MiB VMEM, 2 TCs -> ~49 MiB footprint at H=8192.
        return 384, 256
    # v5e/v6e-class: 128 MiB VMEM; tm>=~640 reaches the v6e MXU roofline, and is far
    # above the ~240 flops/byte v5e needs.  ~90 MiB footprint at H=8192.
    return 640, 512


def prepare_cohere_mlp_weights(w_gate_up, w_down, *, ti, dtype=jnp.bfloat16):
    """One-time (load-time) conversion of PyTorch-layout weights to the kernel layout.

    w_gate_up: (2I, H) = cat([gate_proj.weight, up_proj.weight], dim=0)
    w_down:    (H,  I) = down_proj.weight
    Returns:
      wgu: (H, 2I) with per-ti-tile interleaving [gate_j | up_j], so one contiguous
           column block of width 2*ti feeds both matmuls of intermediate tile j.
      wd:  (I, H)
    """
    two_i, h = w_gate_up.shape
    i_size = two_i // 2
    assert w_down.shape == (h, i_size)
    assert i_size % ti == 0
    gate_t = jnp.transpose(w_gate_up[:i_size]).astype(dtype)  # (H, I)
    up_t = jnp.transpose(w_gate_up[i_size:]).astype(dtype)    # (H, I)
    n_j = i_size // ti
    wgu = jnp.concatenate(
        [gate_t.reshape(h, n_j, ti), up_t.reshape(h, n_j, ti)], axis=-1
    ).reshape(h, 2 * i_size)
    wd = jnp.transpose(w_down).astype(dtype)                   # (I, H)
    return wgu, wd


def cohere_mlp_kernel(x_ref, wgu_ref, wd_ref, o_ref, acc_ref, *, act, ti):
    """Grid step (i, j): token row-tile i, intermediate slice j (reduction axis, last)."""
    j = pl.program_id(1)

    @pl.when(j == 0)
    def _():
        acc_ref[...] = jnp.zeros_like(acc_ref)

    x = x_ref[...]                                                       # (tm, H)    bf16
    gu = jnp.dot(x, wgu_ref[...], preferred_element_type=jnp.float32)   # (tm, 2*ti) f32
    gate, up = gu[:, :ti], gu[:, ti:]
    # elementwise math in f32 (v5e has no bf16 VPU/EUP), cast back for the bf16 MXU pass
    h = (_activation(gate, act) * up).astype(x_ref.dtype)               # (tm, ti)
    acc_ref[...] += jnp.dot(h, wd_ref[...], preferred_element_type=jnp.float32)  # (tm, H)

    @pl.when(j == pl.num_programs(1) - 1)
    def _():
        o_ref[...] = acc_ref[...].astype(o_ref.dtype)


def cohere_mlp(x, wgu, wd, *, ti, tm=None, act="silu"):
    """x: (T, H); wgu: (H, 2I) in prepare_cohere_mlp_weights layout for this ti; wd: (I, H)."""
    t, h = x.shape
    i_size = wd.shape[0]
    assert wgu.shape == (h, 2 * i_size)
    assert wd.shape == (i_size, h)
    assert h % 128 == 0, "hidden size must be a multiple of 128"
    assert ti % 128 == 0 and i_size % ti == 0

    if tm is None:
        tm, _ = default_mlp_tiles()
    tm = min(tm, _round_up(t, 8))
    if _num_tensorcores() >= 2:
        # keep the 2nd TensorCore busy on the "parallel" token axis even for small T
        tm = min(tm, max(8, _round_up(pl.cdiv(t, 2), 8)))
    assert tm % 8 == 0

    grid = (pl.cdiv(t, tm), i_size // ti)

    bpe = jnp.dtype(x.dtype).itemsize
    wbpe = jnp.dtype(wgu.dtype).itemsize
    # VMEM budget: single-buffered x/out blocks, double-buffered weight blocks, f32 acc.
    vmem_needed = (
        tm * h * bpe                     # x block   (Buffered(1))
        + tm * h * bpe                   # out block (Buffered(1))
        + 2 * (h * 2 * ti) * wbpe        # fused gate|up weight block, double-buffered
        + 2 * (ti * h) * wbpe            # down weight block, double-buffered
        + tm * h * 4                     # f32 accumulator scratch
    )
    vmem_limit = max(
        32 << 20,
        min(int(vmem_needed * 1.5) + (8 << 20), _vmem_capacity_bytes() - (8 << 20)),
    )

    flops = 6 * t * h * i_size           # 2*T*H*(2I) gate+up  +  2*T*I*H down
    bytes_accessed = int(
        2 * t * h * bpe                                  # read x, write out
        + grid[0] * 3 * i_size * h * wbpe                # weights re-streamed per row tile
    )
    cost = pl.CostEstimate(flops=flops, transcendentals=t * i_size,
                           bytes_accessed=bytes_accessed)

    kernel = functools.partial(cohere_mlp_kernel, act=act, ti=ti)
    common = dict(
        out_shape=jax.ShapeDtypeStruct((t, h), x.dtype),
        grid=grid,
        scratch_shapes=[pltpu.VMEM((tm, h), jnp.float32)],
        compiler_params=pltpu.CompilerParams(
            dimension_semantics=("parallel", "arbitrary"),
            vmem_limit_bytes=vmem_limit,
        ),
        cost_estimate=cost,
    )

    def call(single_buffer_io):
        io_mode = {"pipeline_mode": pl.Buffered(1)} if single_buffer_io else {}
        return pl.pallas_call(
            kernel,
            in_specs=[
                # x row-tile: index_map ignores j -> fetched once per row tile
                pl.BlockSpec((tm, h), lambda i, j: (i, 0), **io_mode),
                # fused [gate_j | up_j] weight slice: one DMA stream, double-buffered
                pl.BlockSpec((h, 2 * ti), lambda i, j: (0, j)),
                # down_proj row slice
                pl.BlockSpec((ti, h), lambda i, j: (j, 0)),
            ],
            out_specs=pl.BlockSpec((tm, h), lambda i, j: (i, 0), **io_mode),
            **common,
        )(x, wgu, wd)

    try:
        return call(True)
    except Exception:
        # pipeline_mode=pl.Buffered(1) not supported by this jax build: fall back to the
        # default double-buffered pipeline (correct, just uses a bit more VMEM).
        return call(False)


if __name__ == "__main__":
    # Small but lane-dense shapes (H, I multiples of 128); T deliberately NOT a multiple
    # of the row tile so the masked partial-block path is exercised.
    T, H, I = 200, 256, 512
    ACT = "silu"
    TI = 256   # intermediate tile (multiple of 128, divides I)
    TM = 128   # small row tile for the demo; production defaults via default_mlp_tiles()

    key = jax.random.PRNGKey(0)
    kx, kgu, kd = jax.random.split(key, 3)

    dtype = jnp.bfloat16
    x = (0.5 * jax.random.normal(kx, (T, H), jnp.float32)).astype(dtype)

    # PyTorch-layout weights: gate_up_proj.weight = cat([gate, up], dim=0) -> (2I, H);
    # down_proj.weight -> (H, I)
    w_gate_up_pt = 0.05 * jax.random.normal(kgu, (2 * I, H), jnp.float32)
    w_down_pt = 0.05 * jax.random.normal(kd, (H, I), jnp.float32)

    wgu, wd = prepare_cohere_mlp_weights(w_gate_up_pt, w_down_pt, ti=TI, dtype=dtype)

    out = cohere_mlp(x, wgu, wd, ti=TI, tm=TM, act=ACT)
    out = jax.block_until_ready(out)
    assert out.shape == (T, H) and out.dtype == dtype

    # pure-JAX f32 reference on the same bf16-cast weights/activations
    xf = x.astype(jnp.float32)
    wg = w_gate_up_pt[:I].T.astype(dtype).astype(jnp.float32)
    wu = w_gate_up_pt[I:].T.astype(dtype).astype(jnp.float32)
    wdf = w_down_pt.T.astype(dtype).astype(jnp.float32)
    ref = (jax.nn.silu(xf @ wg) * (xf @ wu)) @ wdf

    out_f32 = out.astype(jnp.float32)
    max_err = float(jnp.max(jnp.abs(out_f32 - ref)))
    # tolerance covers the intentional bf16 cast of act(gate)*up before the down matmul
    assert jnp.allclose(out_f32, ref, atol=3e-2, rtol=3e-2), f"mismatch: max abs err {max_err}"
    print("KERNEL_OK")
</pallas_src>

<mosaic_0001>
module attributes {stable_mosaic.version = 11 : i64} {
  func.func @cohere_mlp_kernel(%arg0: i32, %arg1: i32, %arg2: memref<128x256xbf16, #tpu.memory_space<vmem>>, %arg3: memref<256x512xbf16, #tpu.memory_space<vmem>>, %arg4: memref<256x256xbf16, #tpu.memory_space<vmem>>, %arg5: memref<128x256xbf16, #tpu.memory_space<vmem>>, %arg6: memref<128x256xf32, #tpu.memory_space<vmem>>) attributes {dimension_semantics = [#tpu.dimension_semantics<parallel>, #tpu.dimension_semantics<arbitrary>], iteration_bounds = array<i64: 2, 2>, scalar_prefetch = 0 : i64, scratch_operands = 1 : i64, tpu.core_type = #tpu.core_type<tc>, window_params = [{pipeline_mode = #tpu.pipeline_mode<synchronous>, transform_indices = @transform_0, window_bounds = array<i64: 128, 256>}, {transform_indices = @transform_1, window_bounds = array<i64: 256, 512>}, {transform_indices = @transform_2, window_bounds = array<i64: 256, 256>}, {pipeline_mode = #tpu.pipeline_mode<synchronous>, transform_indices = @transform_3, window_bounds = array<i64: 128, 256>}]} {
    %c0_i32 = arith.constant 0 : i32
    %0 = arith.cmpi eq, %arg1, %c0_i32 : i32
    %1 = arith.extui %0 : i1 to i32
    %c0_i32_0 = arith.constant 0 : i32
    %2 = arith.cmpi ne, %1, %c0_i32_0 : i32
    scf.if %2 {
      %cst_13 = arith.constant 0.000000e+00 : f32
      %24 = vector.broadcast %cst_13 : f32 to vector<128x256xf32>
      %c0_14 = arith.constant 0 : index
      %c0_15 = arith.constant 0 : index
      %25 = vector.load %arg6[%c0_14, %c0_15] : memref<128x256xf32, #tpu.memory_space<vmem>>, vector<128x256xf32>
      tpu.vector_store %arg6[%c0_14, %c0_15], %24 {strides = array<i32>} : memref<128x256xf32, #tpu.memory_space<vmem>>, vector<128x256xf32>,
    } else {
    }
    %c0 = arith.constant 0 : index
    %c0_1 = arith.constant 0 : index
    %3 = vector.load %arg2[%c0, %c0_1] : memref<128x256xbf16, #tpu.memory_space<vmem>>, vector<128x256xbf16>
    %c0_2 = arith.constant 0 : index
    %c0_3 = arith.constant 0 : index
    %4 = vector.load %arg3[%c0_2, %c0_3] : memref<256x512xbf16, #tpu.memory_space<vmem>>, vector<256x512xbf16>
    %cst = arith.constant dense<0.000000e+00> : vector<128x512xf32>
    %5 = tpu.matmul %3, %4, %cst {dimension_numbers = #tpu.dot_dimension_numbers<[1], [0], [0], [1], [0, 0, 1, 1], [], []>} : vector<128x256xbf16>, vector<256x512xbf16>, vector<128x512xf32> -> vector<128x512xf32>
    %6 = vector.extract_strided_slice %5 {offsets = [0, 0], sizes = [128, 256], strides = [1, 1]} : vector<128x512xf32> to vector<128x256xf32>
    %7 = vector.extract_strided_slice %5 {offsets = [0, 256], sizes = [128, 256], strides = [1, 1]} : vector<128x512xf32> to vector<128x256xf32>
    %8 = arith.negf %6 : vector<128x256xf32>
    %9 = math.exp %8 : vector<128x256xf32>
    %cst_4 = arith.constant 1.000000e+00 : f32
    %10 = vector.broadcast %cst_4 : f32 to vector<128x256xf32>
    %11 = arith.addf %10, %9 : vector<128x256xf32>
    %12 = arith.divf %10, %11 : vector<128x256xf32>
    %13 = arith.mulf %6, %12 : vector<128x256xf32>
    %14 = arith.mulf %13, %7 : vector<128x256xf32>
    %15 = arith.truncf %14 : vector<128x256xf32> to vector<128x256xbf16>
    %c0_5 = arith.constant 0 : index
    %c0_6 = arith.constant 0 : index
    %16 = vector.load %arg6[%c0_5, %c0_6] : memref<128x256xf32, #tpu.memory_space<vmem>>, vector<128x256xf32>
    %c0_7 = arith.constant 0 : index
    %c0_8 = arith.constant 0 : index
    %17 = vector.load %arg4[%c0_7, %c0_8] : memref<256x256xbf16, #tpu.memory_space<vmem>>, vector<256x256xbf16>
    %cst_9 = arith.constant dense<0.000000e+00> : vector<128x256xf32>
    %18 = tpu.matmul %15, %17, %cst_9 {dimension_numbers = #tpu.dot_dimension_numbers<[1], [0], [0], [1], [0, 0, 1, 1], [], []>} : vector<128x256xbf16>, vector<256x256xbf16>, vector<128x256xf32> -> vector<128x256xf32>
    %19 = arith.addf %16, %18 : vector<128x256xf32>
    %c0_10 = arith.constant 0 : index
    %c0_11 = arith.constant 0 : index
    %20 = vector.load %arg6[%c0_10, %c0_11] : memref<128x256xf32, #tpu.memory_space<vmem>>, vector<128x256xf32>
    tpu.vector_store %arg6[%c0_10, %c0_11], %19 {strides = array<i32>} : memref<128x256xf32, #tpu.memory_space<vmem>>, vector<128x256xf32>,
    %c1_i32 = arith.constant 1 : i32
    %21 = arith.cmpi eq, %arg1, %c1_i32 : i32
    %22 = arith.extui %21 : i1 to i32
    %c0_i32_12 = arith.constant 0 : i32
    %23 = arith.cmpi ne, %22, %c0_i32_12 : i32
    scf.if %23 {
      %c0_13 = arith.constant 0 : index
      %c0_14 = arith.constant 0 : index
      %24 = vector.load %arg6[%c0_13, %c0_14] : memref<128x256xf32, #tpu.memory_space<vmem>>, vector<128x256xf32>
      %25 = arith.truncf %24 : vector<128x256xf32> to vector<128x256xbf16>
      %c0_15 = arith.constant 0 : index
      %c0_16 = arith.constant 0 : index
      %26 = vector.load %arg5[%c0_15, %c0_16] : memref<128x256xbf16, #tpu.memory_space<vmem>>, vector<128x256xbf16>
      tpu.vector_store %arg5[%c0_15, %c0_16], %25 {strides = array<i32>} : memref<128x256xbf16, #tpu.memory_space<vmem>>, vector<128x256xbf16>,
    } else {
    }
    return
  }
  func.func @transform_0(%arg0: i32, %arg1: i32) -> (i32, i32) {
    %c0_i32 = arith.constant 0 : i32
    %c0_i32_0 = arith.constant 0 : i32
    return %arg0, %c0_i32 : i32, i32
  }
  func.func @transform_1(%arg0: i32, %arg1: i32) -> (i32, i32) {
    %c0_i32 = arith.constant 0 : i32
    %c0_i32_0 = arith.constant 0 : i32
    return %c0_i32, %arg1 : i32, i32
  }
  func.func @transform_2(%arg0: i32, %arg1: i32) -> (i32, i32) {
    %c0_i32 = arith.constant 0 : i32
    %c0_i32_0 = arith.constant 0 : i32
    return %arg1, %c0_i32 : i32, i32
  }
  func.func @transform_3(%arg0: i32, %arg1: i32) -> (i32, i32) {
    %c0_i32 = arith.constant 0 : i32
    %c0_i32_0 = arith.constant 0 : i32
    return %arg0, %c0_i32 : i32, i32
  }
}

module attributes {stable_mosaic.version = 11 : i64} {
  func.func @cohere_mlp_kernel(%arg0: i32, %arg1: i32, %arg2: memref<128x256xbf16, #tpu.memory_space<vmem>>, %arg3: memref<256x512xbf16, #tpu.memory_space<vmem>>, %arg4: memref<256x256xbf16, #tpu.memory_space<vmem>>, %arg5: memref<128x256xbf16, #tpu.memory_space<vmem>>, %arg6: memref<128x256xf32, #tpu.memory_space<vmem>>) attributes {dimension_semantics = [#tpu.dimension_semantics<parallel>, #tpu.dimension_semantics<arbitrary>], iteration_bounds = array<i64: 2, 2>, scalar_prefetch = 0 : i64, scratch_operands = 1 : i64, tpu.core_type = #tpu.core_type<tc>, window_params = [{transform_indices = @transform_0, window_bounds = array<i64: 128, 256>}, {transform_indices = @transform_1, window_bounds = array<i64: 256, 512>}, {transform_indices = @transform_2, window_bounds = array<i64: 256, 256>}, {transform_indices = @transform_3, window_bounds = array<i64: 128, 256>}]} {
    %c0_i32 = arith.constant 0 : i32
    %0 = arith.cmpi eq, %arg1, %c0_i32 : i32
    %1 = arith.extui %0 : i1 to i32
    %c0_i32_0 = arith.constant 0 : i32
    %2 = arith.cmpi ne, %1, %c0_i32_0 : i32
    scf.if %2 {
      %cst_13 = arith.constant 0.000000e+00 : f32
      %24 = vector.broadcast %cst_13 : f32 to vector<128x256xf32>
      %c0_14 = arith.constant 0 : index
      %c0_15 = arith.constant 0 : index
      %25 = vector.load %arg6[%c0_14, %c0_15] : memref<128x256xf32, #tpu.memory_space<vmem>>, vector<128x256xf32>
      tpu.vector_store %arg6[%c0_14, %c0_15], %24 {strides = array<i32>} : memref<128x256xf32, #tpu.memory_space<vmem>>, vector<128x256xf32>,
    } else {
    }
    %c0 = arith.constant 0 : index
    %c0_1 = arith.constant 0 : index
    %3 = vector.load %arg2[%c0, %c0_1] : memref<128x256xbf16, #tpu.memory_space<vmem>>, vector<128x256xbf16>
    %c0_2 = arith.constant 0 : index
    %c0_3 = arith.constant 0 : index
    %4 = vector.load %arg3[%c0_2, %c0_3] : memref<256x512xbf16, #tpu.memory_space<vmem>>, vector<256x512xbf16>
    %cst = arith.constant dense<0.000000e+00> : vector<128x512xf32>
    %5 = tpu.matmul %3, %4, %cst {dimension_numbers = #tpu.dot_dimension_numbers<[1], [0], [0], [1], [0, 0, 1, 1], [], []>} : vector<128x256xbf16>, vector<256x512xbf16>, vector<128x512xf32> -> vector<128x512xf32>
    %6 = vector.extract_strided_slice %5 {offsets = [0, 0], sizes = [128, 256], strides = [1, 1]} : vector<128x512xf32> to vector<128x256xf32>
    %7 = vector.extract_strided_slice %5 {offsets = [0, 256], sizes = [128, 256], strides = [1, 1]} : vector<128x512xf32> to vector<128x256xf32>
    %8 = arith.negf %6 : vector<128x256xf32>
    %9 = math.exp %8 : vector<128x256xf32>
    %cst_4 = arith.constant 1.000000e+00 : f32
    %10 = vector.broadcast %cst_4 : f32 to vector<128x256xf32>
    %11 = arith.addf %10, %9 : vector<128x256xf32>
    %12 = arith.divf %10, %11 : vector<128x256xf32>
    %13 = arith.mulf %6, %12 : vector<128x256xf32>
    %14 = arith.mulf %13, %7 : vector<128x256xf32>
    %15 = arith.truncf %14 : vector<128x256xf32> to vector<128x256xbf16>
    %c0_5 = arith.constant 0 : index
    %c0_6 = arith.constant 0 : index
    %16 = vector.load %arg6[%c0_5, %c0_6] : memref<128x256xf32, #tpu.memory_space<vmem>>, vector<128x256xf32>
    %c0_7 = arith.constant 0 : index
    %c0_8 = arith.constant 0 : index
    %17 = vector.load %arg4[%c0_7, %c0_8] : memref<256x256xbf16, #tpu.memory_space<vmem>>, vector<256x256xbf16>
    %cst_9 = arith.constant dense<0.000000e+00> : vector<128x256xf32>
    %18 = tpu.matmul %15, %17, %cst_9 {dimension_numbers = #tpu.dot_dimension_numbers<[1], [0], [0], [1], [0, 0, 1, 1], [], []>} : vector<128x256xbf16>, vector<256x256xbf16>, vector<128x256xf32> -> vector<128x256xf32>
    %19 = arith.addf %16, %18 : vector<128x256xf32>
    %c0_10 = arith.constant 0 : index
    %c0_11 = arith.constant 0 : index
    %20 = vector.load %arg6[%c0_10, %c0_11] : memref<128x256xf32, #tpu.memory_space<vmem>>, vector<128x256xf32>
    tpu.vector_store %arg6[%c0_10, %c0_11], %19 {strides = array<i32>} : memref<128x256xf32, #tpu.memory_space<vmem>>, vector<128x256xf32>,
    %c1_i32 = arith.constant 1 : i32
    %21 = arith.cmpi eq, %arg1, %c1_i32 : i32
    %22 = arith.extui %21 : i1 to i32
    %c0_i32_12 = arith.constant 0 : i32
    %23 = arith.cmpi ne, %22, %c0_i32_12 : i32
    scf.if %23 {
      %c0_13 = arith.constant 0 : index
      %c0_14 = arith.constant 0 : index
      %24 = vector.load %arg6[%c0_13, %c0_14] : memref<128x256xf32, #tpu.memory_space<vmem>>, vector<128x256xf32>
      %25 = arith.truncf %24 : vector<128x256xf32> to vector<128x256xbf16>
      %c0_15 = arith.constant 0 : index
      %c0_16 = arith.constant 0 : index
      %26 = vector.load %arg5[%c0_15, %c0_16] : memref<128x256xbf16, #tpu.memory_space<vmem>>, vector<128x256xbf16>
      tpu.vector_store %arg5[%c0_15, %c0_16], %25 {strides = array<i32>} : memref<128x256xbf16, #tpu.memory_space<vmem>>, vector<128x256xbf16>,
    } else {
    }
    return
  }
  func.func @transform_0(%arg0: i32, %arg1: i32) -> (i32, i32) {
    %c0_i32 = arith.constant 0 : i32
    %c0_i32_0 = arith.constant 0 : i32
    return %arg0, %c0_i32 : i32, i32
  }
  func.func @transform_1(%arg0: i32, %arg1: i32) -> (i32, i32) {
    %c0_i32 = arith.constant 0 : i32
    %c0_i32_0 = arith.constant 0 : i32
    return %c0_i32, %arg1 : i32, i32
  }
  func.func @transform_2(%arg0: i32, %arg1: i32) -> (i32, i32) {
    %c0_i32 = arith.constant 0 : i32
    %c0_i32_0 = arith.constant 0 : i32
    return %arg1, %c0_i32 : i32, i32
  }
  func.func @transform_3(%arg0: i32, %arg1: i32) -> (i32, i32) {
    %c0_i32 = arith.constant 0 : i32
    %c0_i32_0 = arith.constant 0 : i32
    return %arg0, %c0_i32 : i32, i32
  }
}

</mosaic_0001>

<bundles_post_ra>
// kernel: tpu_custom_call.1
= control target key start
LH: loop header
LB: loop body
LE: loop exit
PB: predicated region body
PF: predicated region fallthrough
CT: control target
= control target key end

     0   :  { %s5460_s0 = inlined_call_operand.hbm [shape: bf16[200,256], index: 0, kind: input, shape index: {}]   ;;  %s5461_s1 = inlined_call_operand.hbm [shape: bf16[256,1024], index: 1, kind: input, shape index: {}]   ;;  %s5462_s2 = inlined_call_operand.hbm [shape: bf16[512,256], index: 2, kind: input, shape index: {}]   ;;  %s5463_s3 = inlined_call_operand.hbm [shape: bf16[200,256], index: 3, kind: output, shape index: {}]  }
   0x1   :  { %5486 = sst [smem:[#allocation49_spill]] %s5460_s0 }
   0x2   :  { %5487 = sst [smem:[#allocation50_spill]] %s5461_s1 }
   0x3   :  { %8 = vsyncpa [#allocation4], 0 }
   0x4   :  { %9 = vsyncpa [#allocation7], 0 }
   0x5   :  { %11 = vsyncpa [#allocation7 + $0x1], 0 }
   0x6   :  { %12 = vsyncpa [#allocation5], 0  ;;  %s3699_s12 = smov 0   ;;  %s3701_s13 = smov 0  }
   0x7   :  { %s3703_s14 = smov 0   ;;  %s3705_s15 = smov 0  }
   0x8   :  { %s3707_s16 = smov 0   ;;  %s3709_s17 = smov 0  }
   0x9   :  { %s3711_s18 = smov 0   ;;  %s3713_s19 = smov 0  }
   0xa   :  { %s3715_s20 = smov 0   ;;  %s3717_s21 = smov 0  }
   0xb   :  { %s3719_s22 = smov 0  }
   0xc LB: > { %5488 = sst [smem:[#allocation13_spill]] %s3633_s14  ;;  %s3753_s23 = sadd.s32 4294967295, %s3665_s22   ;;  %s3665_s22 = sphi %s3719_s22, %s18_s22   ;;  %s3661_s21 = sphi %s3717_s21, %s5668_s21   ;;  %s3657_s20 = sphi %s3715_s20, %s5672_s20   ;;  %s3653_s19 = sphi %s3713_s19, %s5666_s19   ;;  %s3649_s18 = sphi %s3711_s18, %s5671_s18   ;;  %s3645_s17 = sphi %s3709_s17, %s5665_s17   ;;  %s3641_s16 = sphi %s3707_s16, %s5664_s16   ;;  %s3637_s15 = sphi %s3705_s15, %s5663_s15   ;;  %s3633_s14 = sphi %s3703_s14, %s5662_s14   ;;  %s3629_s13 = sphi %s3701_s13, %s5670_s13   ;;  %s3625_s12 = sphi %s3699_s12, %s5669_s12  }
   0xd   : > { %5489 = sst [smem:[#allocation14_spill]] %s3641_s16  ;;  %s27_s24 = sadd.s32 1, %s3657_s20 }
   0xe   : > { %5490 = sst [smem:[#allocation15_spill]] %s3645_s17  ;;  %p28_p0 = scmp.ge.s32.totalorder %s27_s24, 2 }
   0xf   : > { %5491 = sst [smem:[#allocation16_spill]] %s3661_s21  ;;  %s30_s25 = sadd.s32 1, %s3661_s21 }
  0x10   : > { %s37_s26 = sadd.s32 1, %s3645_s17  ;;  %p50_p1 = scmp.ne.s32.totalorder %s3641_s16, %s3637_s15 }
  0x11   : > { %s5674_s24 = smov (%p28_p0, %s27_s24), 0  ;;  %s5676_s25 = smov (!%p28_p0, %s30_s25), %s3661_s21 }
  0x12   : > { %5492 = sst [smem:[#allocation17_spill]] %s5674_s24  ;;  %p51_p2 = scmp.eq.s32.totalorder %s3753_s23, 0 }
  0x13   : > { %s60_s27 = ssub.s32 %s3657_s20, %s5674_s24  ;;  %p32_p3 = scmp.ge.s32.totalorder %s5676_s25, 2 }
  0x14   : > { %p61_p4 = scmp.eq.s32.totalorder %s60_s27, 0  ;;  %p3767_p5 = por %p51_p2, %p50_p1 }
  0x15   : > { %s63_s29 = sadd.s32 1, %s3633_s14  ;;  %s5678_s25 = smov (%p32_p3, %s5676_s25), 0 }
  0x16   : > { %5494 = sst [smem:[#allocation18_spill]] %s5678_s25  ;;  %s34_s4 = ssub.s32 %s3661_s21, %s5678_s25 }
  0x17   : > { %s3775_s30 = scalar_select %p61_p4, %s3633_s14, %s63_s29  }
  0x18   : > { %p70_p6 = scmp.ne.s32.totalorder %s3633_s14, %s3629_s13  ;;  %p35_p7 = scmp.eq.s32.totalorder %s34_s4, 0 }
  0x19   : > { %5495 = sst [smem:[#allocation19_spill]] %s3775_s30  ;;  %p71_p8 = scmp.eq.s32.totalorder %s3665_s22, 0 }
  0x1a   : > { %p76_p9 = scmp.ne.s32.totalorder %s3629_s13, %s3625_s12  ;;  %p125_p10 = scmp.ne.s32.totalorder %s3645_s17, %s3641_s16 }
  0x1b   : > { %s3787_s5 = scalar_select %p35_p7, %s3645_s17, %s37_s26  }
  0x1c   : > { %p3789_p11 = por %p71_p8, %p70_p6  ;;  %p3795_p12 = por %p76_p9, %p51_p2 }
  0x1d   : > { %5496 = sst [smem:[#allocation20_spill]] %s3787_s5  ;;  %p126_p13 = scmp.eq.s32.totalorder %s3753_s23, 3 }
  0x1e   : > { %s5498_s7 = scalar_select %p3795_p12, 1, 0 }
  0x1f   : > { %p2554_p0 = scmp.ge.s32.totalorder %s3665_s22, 1  ;;  %p139_p1 = scmp.lt.s32.totalorder %s3665_s22, 5 }
  0x20   : > { %p3802_p3 = por %p126_p13, %p125_p10 }
  0x21   : > { %p3806_p4 = pnand %p2554_p0, %p139_p1 }
  0x22   : > { %s5499_s8 = scalar_select %p3802_p3, 1, 0 }
  0x23   : > { %143 = sbr.rel (%p3806_p4) target bundleno = 83 (0x53), region = 12 }
  0x28   : > { %147 = sbr.rel (!%p3767_p5) target bundleno = 83 (0x53), region = 16  ;;  %s2555_s10 = sshll.u32 (%p3767_p5), %s3653_s19, 4 }
  0x29   : > { %s149_s11 = ssub.s32 (%p3767_p5), 25, %s2555_s10 }
  0x2a   : > { %p150_p2 = scmp.lt.s32.totalorder (%p3767_p5), %s149_s11, 16 }
  0x2d   : > { %s5680_s11 = smov (!%p150_p2, %s149_s11), 16 }
  0x2e   : > { %s3066_s12 = sshll.u32 %s5680_s11, 3 }
  0x2f   : > { %s154_s15 = ssub.s32 128, %s3066_s12 }
  0x30   : > { %s155_s26 = sshll.u32 %s154_s15, 4 }
  0x31   : > { %156 = vsyncadd [#allocation4], %s155_s26  ;;  %p3818_p6 = scmp.ne.s32.totalorder %s3066_s12, 0  ;;  %s3068_s29 = sshll.u32 %s3653_s19, 7 }
  0x32   : > { %s5502_s0 = sld [smem:[#allocation49_spill]]  ;;  %s3667_s21 = smov [#allocation3]  }
  0x33   : > { %s3826_s5 = sshll.u32 %s3667_s21, 4  ;;  %s5469_s15 = sshll.u32 %s5680_s11, 7  ;;  %s165_s5 = int_to_ptr.vmem [resolvable:$true] %s3826_s5 }
  0x34   : > { %s3431_s26 = sshrl.u32 %s5469_s15, 4 }
  0x38   : > { %s160_s10 = scalar_lea.hbm %s5502_s0, %s3068_s29  ;;  %s3440_s4 = scalar_lea.hbm %s5502_s0, 200 }
  0x39   : > { %s162_s24 = sshll.u32 %s160_s10, 4  ;;  %s3828_s24 = int_to_ptr.hbm [resolvable:$true] %s162_s24 }
  0x3a   : > { %s3429_s12 = sshra.s32 %s3828_s24, 4  ;;  %s3430_s12 = int_to_ptr.hbm [resolvable:$true] %s3429_s12 }
  0x3b   : > { %s3436_s17 = scalar_lea.hbm %s3430_s12, %s3431_s26  ;;  %p3441_p10 = scmp.lt.s32.totalorder %s3430_s12, %s5502_s0 }
  0x3c   : > { %p3437_p7 = scmp.ne.s32.totalorder %s3430_s12, %s3436_s17  ;;  %p3442_p13 = scmp.lt.s32.totalorder %s3440_s4, %s3436_s17 }
  0x3e   : > { %p3438_p8 = pnand %p3437_p7, %p3818_p6  ;;  %p3443_p0 = por %p3442_p13, %p3441_p10 }
  0x40   : > { %p3439_p9 = pneg %p3438_p8 }
  0x42   : > { %p3444_p1 = pnand %p3443_p0, %p3439_p9 }
  0x44   : > { %3447 = shalt.err (!%p3444_p1)
}
  0x45   : > { %s3448_s15 = sshra.s32 %s165_s5, 4  ;;  %s3459_s25 = scalar_lea.vmem %s3667_s21, 128  ;;  %s3449_s15 = int_to_ptr.vmem [resolvable:$true] %s3448_s15 }
  0x46   : > { %s3455_s30 = scalar_lea.vmem %s3449_s15, %s3431_s26 }
  0x47   : > { %p3456_p2 = scmp.ne.s32.totalorder %s3449_s15, %s3455_s30  ;;  %p3461_p3 = scmp.lt.s32.totalorder %s3459_s25, %s3455_s30 }
  0x49   : > { %p3457_p7 = pnand %p3456_p2, %p3818_p6 }
  0x4b   : > { %p3458_p8 = pneg %p3457_p7 }
  0x4d   : > { %p3463_p12 = pnand %p3461_p3, %p3458_p8 }
  0x4f   : > { %3466 = shalt.err (!%p3463_p12)
}
  0x50   : > { %s3668_s16 = smov 128   ;;  %s3669_s17 = smov 8  }
  0x51   : > { %s5503_s12 = sshll.u32 %s5680_s11, 7 }
  0x52   : > { %170 = dma.hbm_to_vmem [thread:$0]  (%p3818_p6), %s3828_s24, %s5503_s12, %s165_s5, [#allocation4], %s3668_s16, %s3668_s16, %s3669_s17  }
  0x53 PF: > { %p3200_p9 = scmp.lt.s32.totalorder %s3665_s22, 4  ;;  %s178_s21 = sand.u32 1, %s3665_s22  }
  0x54   : > { %s180_s30 = sand.u32 1, %s3633_s14   ;;  %s3069_s26 = sshll.u32 %s3657_s20, 4 }
  0x55   : > { %s2564_s15 = sshll.u32 %s180_s30, 9  ;;  %s5504_s1 = sld [smem:[#allocation50_spill]] }
  0x56   : > { %s182_s10 = scalar_lea.vmem [#allocation6], %s2564_s15  ;;  %p3863_p12 = pnand %p3200_p9, %p3789_p11 }
  0x57   : > { %s190_s11 = sshll.u32 %s182_s10, 4  ;;  %s179_s25 = scalar_lea.sflag [#allocation7], %s178_s21  ;;  %s191_s11 = int_to_ptr.vmem [resolvable:$true] %s190_s11 }
  0x58   : > { %s3670_s16 = smov 512   ;;  %s3671_s17 = smov 256  }
  0x59   : > { %s3672_s12 = smov 16   ;;  %s2567_s29 = sshll.u32 %s180_s30, 8 }
  0x5a   : > { %s204_s6 = scalar_lea.vmem [#allocation8], %s2567_s29  ;;  %s3674_s14 = smov 8  }
  0x5b   : > { %s187_s27 = scalar_lea.hbm %s5504_s1, %s3069_s26  ;;  %s3071_s26 = sshll.u32 %s3657_s20, 8 }
  0x5c   : > { %s188_s24 = sshll.u32 %s187_s27, 4  ;;  %s210_s27 = scalar_lea.hbm %s5462_s2, %s3071_s26  ;;  %s189_s24 = int_to_ptr.hbm [resolvable:$true] %s188_s24 }
  0x5d   : > { %3196 = dma.hbm_to_vmem [thread:$0]  (!%p3863_p12), %s189_s24, 8192, %s191_s11, %s179_s25, %s3670_s16, %s3671_s17, %s3672_s12  }
  0x5e   : > { %s211_s10 = sshll.u32 %s210_s27, 4  ;;  %s213_s0 = sshll.u32 %s204_s6, 4  ;;  %s212_s10 = int_to_ptr.hbm [resolvable:$true] %s211_s10  ;;  %s214_s0 = int_to_ptr.vmem [resolvable:$true] %s213_s0 }
  0x5f   : > { %s3673_s1 = smov 128   ;;  %225 = sbr.rel (%p3806_p4) target bundleno = 788 (0x314), region = 32 }
  0x60   : > { %3199 = dma.hbm_to_vmem [thread:$0]  (!%p3863_p12), %s212_s10, 4096, %s214_s0, %s179_s25, %s3673_s1, %s3673_s1, %s3674_s14  }
  0x64   : > { %3612 = dma.done.wait (%p3767_p5), [#allocation4], 2048  }
  0x65   : > { %3614 = vsyncadd (%p3767_p5), [#allocation4], 4294965248  ;;  %s232_s21 = sand.u32 1, %s3753_s23   ;;  %s234_s30 = sand.u32 1, %s3629_s13  }
  0x66   : > { %s2572_s11 = sshll.u32 %s234_s30, 9  ;;  %s233_s24 = scalar_lea.sflag [#allocation7], %s232_s21 }
  0x67   : > { %s3883_s16 = scalar_lea.vmem [#allocation6], %s2572_s11  ;;  %p5506_p11 = scmp.ne.s32.totalorder %s5498_s7, 0 }
  0x69   : > { %3616 = dma.done.wait (%p5506_p11), %s233_s24, 12288  }
  0x6a   : > { %3618 = vsyncadd (%p5506_p11), %s233_s24, 4294955008  ;;  %s2573_s0 = sshll.u32 %s234_s30, 8  ;;  %p2574_p3 = scmp.ne.s32.totalorder %s3649_s18, 0 }
  0x6b   : > { %s3889_s1 = scalar_lea.vmem [#allocation8], %s2573_s0 }
  0x6c   : > { %287 = sbr.rel (%p2574_p3) target bundleno = 146 (0x92), region = 48 }
  0x71   : > { %v3675_v0 = vmov 0.0  }
  0x72   : > { %288 = vst [vmem:[#allocation2 + $0xb0] sm:$0xff] %v3675_v0 }
  0x73   : > { %289 = vst [vmem:[#allocation2] sm:$0xff] %v3675_v0 }
  0x74   : > { %290 = vst [vmem:[#allocation2 + $0xd8] sm:$0xff] %v3675_v0 }
  0x75   : > { %291 = vst [vmem:[#allocation2 + $0x18] sm:$0xff] %v3675_v0 }
  0x76   : > { %292 = vst [vmem:[#allocation2 + $0x50] sm:$0xff] %v3675_v0 }
  0x77   : > { %293 = vst [vmem:[#allocation2 + $0x68] sm:$0xff] %v3675_v0 }
  0x78   : > { %294 = vst [vmem:[#allocation2 + $0x30] sm:$0xff] %v3675_v0 }
  0x79   : > { %295 = vst [vmem:[#allocation2 + $0x48] sm:$0xff] %v3675_v0 }
  0x7a   : > { %296 = vst [vmem:[#allocation2 + $0x80] sm:$0xff] %v3675_v0 }
  0x7b   : > { %297 = vst [vmem:[#allocation2 + $0x88] sm:$0xff] %v3675_v0 }
  0x7c   : > { %298 = vst [vmem:[#allocation2 + $0xe8] sm:$0xff] %v3675_v0 }
  0x7d   : > { %299 = vst [vmem:[#allocation2 + $0xb8] sm:$0xff] %v3675_v0 }
  0x7e   : > { %300 = vst [vmem:[#allocation2 + $0x60] sm:$0xff] %v3675_v0 }
  0x7f   : > { %301 = vst [vmem:[#allocation2 + $0xf0] sm:$0xff] %v3675_v0 }
  0x80   : > { %302 = vst [vmem:[#allocation2 + $0x8] sm:$0xff] %v3675_v0 }
  0x81   : > { %303 = vst [vmem:[#allocation2 + $0x78] sm:$0xff] %v3675_v0 }
  0x82   : > { %304 = vst [vmem:[#allocation2 + $0x38] sm:$0xff] %v3675_v0 }
  0x83   : > { %305 = vst [vmem:[#allocation2 + $0x58] sm:$0xff] %v3675_v0 }
  0x84   : > { %306 = vst [vmem:[#allocation2 + $0x40] sm:$0xff] %v3675_v0 }
  0x85   : > { %307 = vst [vmem:[#allocation2 + $0xc8] sm:$0xff] %v3675_v0 }
  0x86   : > { %308 = vst [vmem:[#allocation2 + $0xe0] sm:$0xff] %v3675_v0 }
  0x87   : > { %309 = vst [vmem:[#allocation2 + $0x90] sm:$0xff] %v3675_v0 }
  0x88   : > { %310 = vst [vmem:[#allocation2 + $0x70] sm:$0xff] %v3675_v0 }
  0x89   : > { %311 = vst [vmem:[#allocation2 + $0xc0] sm:$0xff] %v3675_v0 }
  0x8a   : > { %312 = vst [vmem:[#allocation2 + $0xa8] sm:$0xff] %v3675_v0 }
  0x8b   : > { %313 = vst [vmem:[#allocation2 + $0xd0] sm:$0xff] %v3675_v0 }
  0x8c   : > { %314 = vst [vmem:[#allocation2 + $0x10] sm:$0xff] %v3675_v0 }
  0x8d   : > { %315 = vst [vmem:[#allocation2 + $0x28] sm:$0xff] %v3675_v0 }
  0x8e   : > { %316 = vst [vmem:[#allocation2 + $0xa0] sm:$0xff] %v3675_v0 }
  0x8f   : > { %317 = vst [vmem:[#allocation2 + $0xf8] sm:$0xff] %v3675_v0 }
  0x90   : > { %318 = vst [vmem:[#allocation2 + $0x20] sm:$0xff] %v3675_v0 }
  0x91   : > { %319 = vst [vmem:[#allocation2 + $0x98] sm:$0xff] %v3675_v0 }
  0x92 PF: > { %v2753_v1 = vld [vmem:[%s3883_s16 + $0xe0] sm:$0xf]  ;;  %v3118_v2 = vld [vmem:[%s3883_s16 + $0xec] sm:$0xf0]  ;;  %v3116_v6 = vld [vmem:[%s3883_s16 + $0xe4] sm:$0xf] }
  0x93   : > { %v2881_v3 = vld [vmem:[%s3883_s16 + $0x1e0] sm:$0xf]  ;;  %v2754_v4 = vor.u32 %v3118_v2, %v2753_v1  ;;  %v3150_v5 = vld [vmem:[%s3883_s16 + $0x1ec] sm:$0xf0]  ;;  %v2755_v7 = vld [vmem:[%s3883_s16 + $0xf0] sm:$0xf0] }
  0x94   : > { %v2882_v8 = vor.u32 %v3150_v5, %v2881_v3  ;;  %v2758_v9 = vor.u32 %v3116_v6, %v2755_v7  ;;  %v3148_v10 = vld [vmem:[%s3883_s16 + $0x1e4] sm:$0xf]  ;;  %v2883_v11 = vld [vmem:[%s3883_s16 + $0x1f0] sm:$0xf0]  ;;  %v2737_v12 = vld [vmem:[%s3883_s16 + $0xc0] sm:$0xf] }
  0x95   : > { %800 = vmatpush.bf16.msra.mxu0 %v2754_v4  ;;  %v2886_v13 = vor.u32 %v3148_v10, %v2883_v11  ;;  %v3114_v14 = vld [vmem:[%s3883_s16 + $0xcc] sm:$0xf0]  ;;  %v2865_v15 = vld [vmem:[%s3883_s16 + $0x1c0] sm:$0xf]  ;;  %v3112_v19 = vld [vmem:[%s3883_s16 + $0xc4] sm:$0xf] }
  0x96   : > { %v3146_v16 = vld [vmem:[%s3883_s16 + $0x1cc] sm:$0xf0]  ;;  %849 = vmatpush.bf16.msra.mxu1 %v2882_v8  ;;  %898 = vmatpush.bf16.msra.mxu2 %v2758_v9  ;;  %v2738_v17 = vor.u32 %v3114_v14, %v2737_v12  ;;  %v2739_v20 = vld [vmem:[%s3883_s16 + $0xd0] sm:$0xf0]  ;;  %v3144_v21 = vld [vmem:[%s3883_s16 + $0x1c4] sm:$0xf] }
  0x97   : > { %v2866_v18 = vor.u32 %v3146_v16, %v2865_v15  ;;  %947 = vmatpush.bf16.msra.mxu3 %v2886_v13  ;;  %v2742_v22 = vor.u32 %v3112_v19, %v2739_v20  ;;  %v2867_v23 = vld [vmem:[%s3883_s16 + $0x1d0] sm:$0xf0]  ;;  %v2721_v24 = vld [vmem:[%s3883_s16 + $0xa0] sm:$0xf]  ;;  %v3110_v25 = vld [vmem:[%s3883_s16 + $0xac] sm:$0xf0] }
  0x98   : > { %v2870_v26 = vor.u32 %v3144_v21, %v2867_v23  ;;  %v2849_v27 = vld [vmem:[%s3883_s16 + $0x1a0] sm:$0xf]  ;;  %v3142_v28 = vld [vmem:[%s3883_s16 + $0x1ac] sm:$0xf0]  ;;  %v3108_v29 = vld [vmem:[%s3883_s16 + $0xa4] sm:$0xf]  ;;  %v2722_v30 = vor.u32 %v3110_v25, %v2721_v24 }
  0x99   : > { %801 = vmatpush.bf16.msra.mxu0 %v2738_v17  ;;  %v2723_v31 = vld [vmem:[%s3883_s16 + $0xb0] sm:$0xf0]  ;;  %v3140_v32 = vld [vmem:[%s3883_s16 + $0x1a4] sm:$0xf]  ;;  %v2850_v34 = vor.u32 %v3142_v28, %v2849_v27  ;;  %v2705_v36 = vld [vmem:[%s3883_s16 + $0x80] sm:$0xf] }
  0x9a   : > { %v2851_v33 = vld [vmem:[%s3883_s16 + $0x1b0] sm:$0xf0]  ;;  %850 = vmatpush.bf16.msra.mxu1 %v2866_v18  ;;  %899 = vmatpush.bf16.msra.mxu2 %v2742_v22  ;;  %v2726_v35 = vor.u32 %v3108_v29, %v2723_v31  ;;  %v3106_v37 = vld [vmem:[%s3883_s16 + $0x8c] sm:$0xf0]  ;;  %v2833_v38 = vld [vmem:[%s3883_s16 + $0x180] sm:$0xf] }
  0x9b   : > { %948 = vmatpush.bf16.msra.mxu3 %v2870_v26  ;;  %v2854_v39 = vor.u32 %v3140_v32, %v2851_v33  ;;  %v3138_v40 = vld [vmem:[%s3883_s16 + $0x18c] sm:$0xf0]  ;;  %v3104_v41 = vld [vmem:[%s3883_s16 + $0x84] sm:$0xf]  ;;  %v2707_v42 = vld [vmem:[%s3883_s16 + $0x90] sm:$0xf0]  ;;  %v2706_v45 = vor.u32 %v3106_v37, %v2705_v36 }
  0x9c   : > { %v3136_v43 = vld [vmem:[%s3883_s16 + $0x184] sm:$0xf]  ;;  %v2835_v44 = vld [vmem:[%s3883_s16 + $0x190] sm:$0xf0]  ;;  %v2834_v46 = vor.u32 %v3138_v40, %v2833_v38  ;;  %v2710_v47 = vor.u32 %v3104_v41, %v2707_v42  ;;  %v2689_v48 = vld [vmem:[%s3883_s16 + $0x60] sm:$0xf] }
  0x9d   : > { %802 = vmatpush.bf16.msra.mxu0 %v2722_v30  ;;  %v3102_v49 = vld [vmem:[%s3883_s16 + $0x6c] sm:$0xf0]  ;;  %v2817_v50 = vld [vmem:[%s3883_s16 + $0x160] sm:$0xf]  ;;  %v2838_v51 = vor.u32 %v3136_v43, %v2835_v44  ;;  %v3100_v53 = vld [vmem:[%s3883_s16 + $0x64] sm:$0xf] }
  0x9e   : > { %851 = vmatpush.bf16.msra.mxu1 %v2850_v34  ;;  %900 = vmatpush.bf16.msra.mxu2 %v2726_v35  ;;  %v3134_v52 = vld [vmem:[%s3883_s16 + $0x16c] sm:$0xf0]  ;;  %v2691_v54 = vld [vmem:[%s3883_s16 + $0x70] sm:$0xf0]  ;;  %v3132_v55 = vld [vmem:[%s3883_s16 + $0x164] sm:$0xf]  ;;  %v2690_v57 = vor.u32 %v3102_v49, %v2689_v48 }
  0x9f   : > { %949 = vmatpush.bf16.msra.mxu3 %v2854_v39  ;;  %v2819_v56 = vld [vmem:[%s3883_s16 + $0x170] sm:$0xf0]  ;;  %v2818_v58 = vor.u32 %v3134_v52, %v2817_v50  ;;  %v2694_v59 = vor.u32 %v3100_v53, %v2691_v54  ;;  %v2673_v60 = vld [vmem:[%s3883_s16 + $0x40] sm:$0xf]  ;;  %v3098_v61 = vld [vmem:[%s3883_s16 + $0x4c] sm:$0xf0] }
  0xa0   : > { %v2801_v62 = vld [vmem:[%s3883_s16 + $0x140] sm:$0xf]  ;;  %v2822_v63 = vor.u32 %v3132_v55, %v2819_v56  ;;  %v3130_v0 = vld [vmem:[%s3883_s16 + $0x14c] sm:$0xf0]  ;;  %v3096_v1 = vld [vmem:[%s3883_s16 + $0x44] sm:$0xf]  ;;  %v2674_v5 = vor.u32 %v3098_v61, %v2673_v60 }
  0xa1   : > { %803 = vmatpush.bf16.msra.mxu0 %v2706_v45  ;;  %v2675_v2 = vld [vmem:[%s3883_s16 + $0x50] sm:$0xf0]  ;;  %v3128_v3 = vld [vmem:[%s3883_s16 + $0x144] sm:$0xf]  ;;  %v2802_v6 = vor.u32 %v3130_v0, %v2801_v62  ;;  %v2657_v8 = vld [vmem:[%s3883_s16 + $0x20] sm:$0xf] }
  0xa2   : > { %852 = vmatpush.bf16.msra.mxu1 %v2834_v46  ;;  %901 = vmatpush.bf16.msra.mxu2 %v2710_v47  ;;  %v2803_v4 = vld [vmem:[%s3883_s16 + $0x150] sm:$0xf0]  ;;  %v2678_v7 = vor.u32 %v3096_v1, %v2675_v2  ;;  %v3094_v9 = vld [vmem:[%s3883_s16 + $0x2c] sm:$0xf0]  ;;  %v2785_v10 = vld [vmem:[%s3883_s16 + $0x120] sm:$0xf] }
  0xa3   : > { %950 = vmatpush.bf16.msra.mxu3 %v2838_v51  ;;  %v2806_v11 = vor.u32 %v3128_v3, %v2803_v4  ;;  %v3126_v12 = vld [vmem:[%s3883_s16 + $0x12c] sm:$0xf0]  ;;  %v3092_v13 = vld [vmem:[%s3883_s16 + $0x24] sm:$0xf]  ;;  %v2659_v14 = vld [vmem:[%s3883_s16 + $0x30] sm:$0xf0]  ;;  %v2658_v17 = vor.u32 %v3094_v9, %v2657_v8 }
  0xa4   : > { %v3124_v15 = vld [vmem:[%s3883_s16 + $0x124] sm:$0xf]  ;;  %v2787_v16 = vld [vmem:[%s3883_s16 + $0x130] sm:$0xf0]  ;;  %v2641_v18 = vld [vmem:[%s3883_s16] sm:$0xf]  ;;  %v2786_v20 = vor.u32 %v3126_v12, %v2785_v10  ;;  %v2662_v21 = vor.u32 %v3092_v13, %v2659_v14 }
  0xa5   : > { %804 = vmatpush.bf16.msra.mxu0 %v2690_v57  ;;  %v3090_v19 = vld [vmem:[%s3883_s16 + $0xc] sm:$0xf0]  ;;  %v2769_v22 = vld [vmem:[%s3883_s16 + $0x100] sm:$0xf]  ;;  %v3088_v24 = vld [vmem:[%s3883_s16 + $0x4] sm:$0xf]  ;;  %v2790_v25 = vor.u32 %v3124_v15, %v2787_v16 }
  0xa6   : > { %853 = vmatpush.bf16.msra.mxu1 %v2818_v58  ;;  %902 = vmatpush.bf16.msra.mxu2 %v2694_v59  ;;  %v3122_v23 = vld [vmem:[%s3883_s16 + $0x10c] sm:$0xf0]  ;;  %v2643_v26 = vld [vmem:[%s3883_s16 + $0x10] sm:$0xf0]  ;;  %v3120_v27 = vld [vmem:[%s3883_s16 + $0x104] sm:$0xf]  ;;  %v2642_v32 = vor.u32 %v3090_v19, %v2641_v18 }
  0xa7   : > { %951 = vmatpush.bf16.msra.mxu3 %v2822_v63  ;;  %v2771_v28 = vld [vmem:[%s3883_s16 + $0x110] sm:$0xf0]  ;;  %v2577_v29 = vld [vmem:[#allocation3] sm:$0xf]  ;;  %v3117_v30 = vld [vmem:[%s3883_s16 + $0xec] sm:$0xf]  ;;  %v2770_v36 = vor.u32 %v3122_v23, %v2769_v22  ;;  %v2646_v37 = vor.u32 %v3088_v24, %v2643_v26 }
  0xa8   : > { %v2763_v31 = vld [vmem:[%s3883_s16 + $0xf8] sm:$0xf0]  ;;  %v3073_v33 = vld [vmem:[#allocation3 + $0x4] sm:$0xf0]  ;;  %v3149_v34 = vld [vmem:[%s3883_s16 + $0x1ec] sm:$0xf]  ;;  %v2774_v40 = vor.u32 %v3120_v27, %v2771_v28 }
  0xa9   : > { %805 = vmatpush.bf16.msra.mxu0 %v2674_v5  ;;  %v2891_v35 = vld [vmem:[%s3883_s16 + $0x1f8] sm:$0xf0]  ;;  %v3072_v38 = vld [vmem:[#allocation3 + $0x4] sm:$0xf]  ;;  %v2579_v39 = vld [vmem:[#allocation3 + $0x8] sm:$0xf0]  ;;  %v2766_v41 = vor.u32 %v3117_v30, %v2763_v31  ;;  %v3963_v45 = vor.u32 %v3073_v33, %v2577_v29 }
  0xaa   : > { %854 = vmatpush.bf16.msra.mxu1 %v2802_v6  ;;  %903 = vmatpush.bf16.msra.mxu2 %v2678_v7  ;;  %v2761_v42 = vld [vmem:[%s3883_s16 + $0xe8] sm:$0xf]  ;;  %v3119_v43 = vld [vmem:[%s3883_s16 + $0xf4] sm:$0xf0]  ;;  %v2894_v46 = vor.u32 %v3149_v34, %v2891_v35  ;;  %v3113_v48 = vld [vmem:[%s3883_s16 + $0xcc] sm:$0xf]  ;;  %v3968_v50 = vor.u32 %v3072_v38, %v2579_v39 }
  0xab   : > { %952 = vmatpush.bf16.msra.mxu3 %v2806_v11  ;;  %v2889_v44 = vld [vmem:[%s3883_s16 + $0x1e8] sm:$0xf]  ;;  %v3151_v47 = vld [vmem:[%s3883_s16 + $0x1f4] sm:$0xf0]  ;;  %v2747_v49 = vld [vmem:[%s3883_s16 + $0xd8] sm:$0xf0]  ;;  %v2762_v53 = vor.u32 %v3119_v43, %v2761_v42 }
  0xac   : > { %v3145_v51 = vld [vmem:[%s3883_s16 + $0x1cc] sm:$0xf]  ;;  %v2875_v52 = vld [vmem:[%s3883_s16 + $0x1d8] sm:$0xf0]  ;;  %v2890_v54 = vor.u32 %v3151_v47, %v2889_v44  ;;  %v2750_v55 = vor.u32 %v3113_v48, %v2747_v49  ;;  %v2745_v56 = vld [vmem:[%s3883_s16 + $0xc8] sm:$0xf] }
  0xad   : > { %806 = vmatpush.bf16.msra.mxu0 %v2658_v17  ;;  %v3115_v57 = vld [vmem:[%s3883_s16 + $0xd4] sm:$0xf0]  ;;  %v2878_v58 = vor.u32 %v3145_v51, %v2875_v52  ;;  %v2873_v59 = vld [vmem:[%s3883_s16 + $0x1c8] sm:$0xf]  ;;  %v3109_v62 = vld [vmem:[%s3883_s16 + $0xac] sm:$0xf] }
  0xae   : > { %855 = vmatpush.bf16.msra.mxu1 %v2786_v20  ;;  %904 = vmatpush.bf16.msra.mxu2 %v2662_v21  ;;  %v3147_v60 = vld [vmem:[%s3883_s16 + $0x1d4] sm:$0xf0]  ;;  %v2746_v61 = vor.u32 %v3115_v57, %v2745_v56  ;;  %v2731_v63 = vld [vmem:[%s3883_s16 + $0xb8] sm:$0xf0]  ;;  %v3141_v0 = vld [vmem:[%s3883_s16 + $0x1ac] sm:$0xf] }
  0xaf   : > { %953 = vmatpush.bf16.msra.mxu3 %v2790_v25  ;;  %v2874_v1 = vor.u32 %v3147_v60, %v2873_v59  ;;  %v2734_v2 = vor.u32 %v3109_v62, %v2731_v63  ;;  %v2859_v3 = vld [vmem:[%s3883_s16 + $0x1b8] sm:$0xf0]  ;;  %v2729_v4 = vld [vmem:[%s3883_s16 + $0xa8] sm:$0xf]  ;;  %v3111_v5 = vld [vmem:[%s3883_s16 + $0xb4] sm:$0xf0] }
  0xb0   : > { %v2862_v6 = vor.u32 %v3141_v0, %v2859_v3  ;;  %v2857_v7 = vld [vmem:[%s3883_s16 + $0x1a8] sm:$0xf]  ;;  %v3143_v8 = vld [vmem:[%s3883_s16 + $0x1b4] sm:$0xf0]  ;;  %v2730_v9 = vor.u32 %v3111_v5, %v2729_v4  ;;  %v2585_v11 = vld [vmem:[#allocation3 + $0x10] sm:$0xf] }
  0xb1   : > { %807 = vmatpush.bf16.msra.mxu0 %v2642_v32  ;;  %v2858_v10 = vor.u32 %v3143_v8, %v2857_v7  ;;  %v3075_v12 = vld [vmem:[#allocation3 + $0x14] sm:$0xf0]  ;;  %v3074_v13 = vld [vmem:[#allocation3 + $0x14] sm:$0xf]  ;;  %v2587_v14 = vld [vmem:[#allocation3 + $0x18] sm:$0xf0] }
  0xb2   : > { %856 = vmatpush.bf16.msra.mxu1 %v2770_v36  ;;  %905 = vmatpush.bf16.msra.mxu2 %v2646_v37  ;;  %v3988_v15 = vor.u32 %v3075_v12, %v2585_v11  ;;  %v3990_v16 = vor.u32 %v3074_v13, %v2587_v14  ;;  %v3105_v17 = vld [vmem:[%s3883_s16 + $0x8c] sm:$0xf]  ;;  %v2715_v18 = vld [vmem:[%s3883_s16 + $0x98] sm:$0xf0]  ;;  %v2713_v22 = vld [vmem:[%s3883_s16 + $0x88] sm:$0xf] }
  0xb3   : > { %954 = vmatpush.bf16.msra.mxu3 %v2774_v40  ;;  %v3137_v19 = vld [vmem:[%s3883_s16 + $0x18c] sm:$0xf]  ;;  %v2718_v20 = vor.u32 %v3105_v17, %v2715_v18  ;;  %v2843_v21 = vld [vmem:[%s3883_s16 + $0x198] sm:$0xf0]  ;;  %v3107_v23 = vld [vmem:[%s3883_s16 + $0x94] sm:$0xf0] }
  0xb4   : > { %808 = vmatmul.bf16.vlgmr.msra.gmra.mxu0 %v3963_v45  ;;  %v2846_v24 = vor.u32 %v3137_v19, %v2843_v21  ;;  %v2714_v25 = vor.u32 %v3107_v23, %v2713_v22  ;;  %v2841_v26 = vld [vmem:[%s3883_s16 + $0x188] sm:$0xf]  ;;  %v3139_v27 = vld [vmem:[%s3883_s16 + $0x194] sm:$0xf0]  ;;  %v2593_v29 = vld [vmem:[#allocation3 + $0x20] sm:$0xf] }
  0xb5   : > { %857 = vmatmul.bf16.vlgmr.msra.gmra.mxu1 %v3968_v50  ;;  %906 = vmatmul.bf16.vlgmr.msra.gmra.mxu2 %v3963_v45  ;;  %v2842_v28 = vor.u32 %v3139_v27, %v2841_v26  ;;  %v3077_v30 = vld [vmem:[#allocation3 + $0x24] sm:$0xf0]  ;;  %v3076_v31 = vld [vmem:[#allocation3 + $0x24] sm:$0xf]  ;;  %v2595_v32 = vld [vmem:[#allocation3 + $0x28] sm:$0xf0] }
  0xb6   : > { %1094 = vmatpush.bf16.msrb.mxu2 %v2766_v41  ;;  %955 = vmatmul.bf16.vlgmr.msra.gmra.mxu3 %v3968_v50  ;;  %v4004_v33 = vor.u32 %v3077_v30, %v2593_v29  ;;  %v4006_v34 = vor.u32 %v3076_v31, %v2595_v32  ;;  %v3101_v35 = vld [vmem:[%s3883_s16 + $0x6c] sm:$0xf]  ;;  %v2699_v36 = vld [vmem:[%s3883_s16 + $0x78] sm:$0xf0]  ;;  %v2697_v40 = vld [vmem:[%s3883_s16 + $0x68] sm:$0xf] }
  0xb7   : > { %1143 = vmatpush.bf16.msrb.mxu3 %v2894_v46  ;;  %996 = vmatpush.bf16.msrb.mxu0 %v2762_v53  ;;  %v3133_v37 = vld [vmem:[%s3883_s16 + $0x16c] sm:$0xf]  ;;  %v2702_v38 = vor.u32 %v3101_v35, %v2699_v36  ;;  %v2827_v39 = vld [vmem:[%s3883_s16 + $0x178] sm:$0xf0]  ;;  %v3103_v41 = vld [vmem:[%s3883_s16 + $0x74] sm:$0xf0] }
  0xb8   : > { %1045 = vmatpush.bf16.msrb.mxu1 %v2890_v54  ;;  %v2830_v42 = vor.u32 %v3133_v37, %v2827_v39  ;;  %v2698_v43 = vor.u32 %v3103_v41, %v2697_v40  ;;  %v2825_v44 = vld [vmem:[%s3883_s16 + $0x168] sm:$0xf]  ;;  %v3135_v46 = vld [vmem:[%s3883_s16 + $0x174] sm:$0xf0]  ;;  %v2601_v48 = vld [vmem:[#allocation3 + $0x30] sm:$0xf] }
  0xb9   : > { %v2826_v47 = vor.u32 %v3135_v46, %v2825_v44  ;;  %v3079_v49 = vld [vmem:[#allocation3 + $0x34] sm:$0xf0]  ;;  %v3078_v51 = vld [vmem:[#allocation3 + $0x34] sm:$0xf]  ;;  %v2603_v52 = vld [vmem:[#allocation3 + $0x38] sm:$0xf0] }
  0xba   : > { %1095 = vmatpush.bf16.msrb.mxu2 %v2750_v55  ;;  %v4020_v53 = vor.u32 %v3079_v49, %v2601_v48  ;;  %v4022_v54 = vor.u32 %v3078_v51, %v2603_v52  ;;  %v3097_v55 = vld [vmem:[%s3883_s16 + $0x4c] sm:$0xf]  ;;  %v2683_v56 = vld [vmem:[%s3883_s16 + $0x58] sm:$0xf0]  ;;  %v2681_v60 = vld [vmem:[%s3883_s16 + $0x48] sm:$0xf] }
  0xbb   : > { %1144 = vmatpush.bf16.msrb.mxu3 %v2878_v58  ;;  %997 = vmatpush.bf16.msrb.mxu0 %v2746_v61  ;;  %v3129_v57 = vld [vmem:[%s3883_s16 + $0x14c] sm:$0xf]  ;;  %v2686_v58 = vor.u32 %v3097_v55, %v2683_v56  ;;  %v2811_v59 = vld [vmem:[%s3883_s16 + $0x158] sm:$0xf0]  ;;  %v3099_v61 = vld [vmem:[%s3883_s16 + $0x54] sm:$0xf0] }
  0xbc   : > { %1046 = vmatpush.bf16.msrb.mxu1 %v2874_v1  ;;  %v2814_v62 = vor.u32 %v3129_v57, %v2811_v59  ;;  %v2682_v63 = vor.u32 %v3099_v61, %v2681_v60  ;;  %v2809_v0 = vld [vmem:[%s3883_s16 + $0x148] sm:$0xf]  ;;  %v3131_v1 = vld [vmem:[%s3883_s16 + $0x154] sm:$0xf0]  ;;  %v2609_v3 = vld [vmem:[#allocation3 + $0x40] sm:$0xf] }
  0xbd   : > { %v3081_v4 = vld [vmem:[#allocation3 + $0x44] sm:$0xf0]  ;;  %v3080_v5 = vld [vmem:[#allocation3 + $0x44] sm:$0xf]  ;;  %v3125_v11 = vld [vmem:[%s3883_s16 + $0x12c] sm:$0xf] }
  0xbe   : > { %1096 = vmatpush.bf16.msrb.mxu2 %v2734_v2  ;;  %v2810_v2 = vor.u32 %v3131_v1, %v2809_v0  ;;  %v4036_v7 = vor.u32 %v3081_v4, %v2609_v3  ;;  %v2795_v13 = vld [vmem:[%s3883_s16 + $0x138] sm:$0xf0]  ;;  %v2665_v14 = vld [vmem:[%s3883_s16 + $0x28] sm:$0xf]  ;;  %v3095_v17 = vld [vmem:[%s3883_s16 + $0x34] sm:$0xf0] }
  0xbf   : > { %1145 = vmatpush.bf16.msrb.mxu3 %v2862_v6  ;;  %998 = vmatpush.bf16.msrb.mxu0 %v2730_v9  ;;  %v2611_v6 = vld [vmem:[#allocation3 + $0x48] sm:$0xf0]  ;;  %v2798_v18 = vor.u32 %v3125_v11, %v2795_v13  ;;  %v2666_v19 = vor.u32 %v3095_v17, %v2665_v14  ;;  %v3127_v21 = vld [vmem:[%s3883_s16 + $0x134] sm:$0xf0]  ;;  %v2617_v23 = vld [vmem:[#allocation3 + $0x50] sm:$0xf] }
  0xc0   : > { %1047 = vmatpush.bf16.msrb.mxu1 %v2858_v10  ;;  %v4038_v8 = vor.u32 %v3080_v5, %v2611_v6  ;;  %v3093_v9 = vld [vmem:[%s3883_s16 + $0x2c] sm:$0xf]  ;;  %v2667_v10 = vld [vmem:[%s3883_s16 + $0x38] sm:$0xf0]  ;;  %v2649_v36 = vld [vmem:[%s3883_s16 + $0x8] sm:$0xf] }
  0xc1   : > { %v2670_v12 = vor.u32 %v3093_v9, %v2667_v10  ;;  %v2619_v26 = vld [vmem:[#allocation3 + $0x58] sm:$0xf0]  ;;  %v3089_v29 = vld [vmem:[%s3883_s16 + $0xc] sm:$0xf]  ;;  %v3091_v37 = vld [vmem:[%s3883_s16 + $0x14] sm:$0xf0] }
  0xc2   : > { %1097 = vmatpush.bf16.msrb.mxu2 %v2718_v20  ;;  %v2793_v20 = vld [vmem:[%s3883_s16 + $0x128] sm:$0xf]  ;;  %v2651_v30 = vld [vmem:[%s3883_s16 + $0x18] sm:$0xf0]  ;;  %v3121_v31 = vld [vmem:[%s3883_s16 + $0x10c] sm:$0xf]  ;;  %v2650_v39 = vor.u32 %v3091_v37, %v2649_v36 }
  0xc3   : > { %1146 = vmatpush.bf16.msrb.mxu3 %v2846_v24  ;;  %999 = vmatpush.bf16.msrb.mxu0 %v2714_v25  ;;  %v2794_v22 = vor.u32 %v3127_v21, %v2793_v20  ;;  %v3083_v24 = vld [vmem:[#allocation3 + $0x54] sm:$0xf0]  ;;  %v3082_v25 = vld [vmem:[#allocation3 + $0x54] sm:$0xf]  ;;  %v2654_v32 = vor.u32 %v3089_v29, %v2651_v30  ;;  %v2779_v35 = vld [vmem:[%s3883_s16 + $0x118] sm:$0xf0] }
  0xc4   : > { %813 = vmatmul.bf16.gmra.mxu0 %v3988_v15  ;;  %1048 = vmatpush.bf16.msrb.mxu1 %v2842_v28  ;;  %v4052_v27 = vor.u32 %v3083_v24, %v2617_v23  ;;  %v4054_v28 = vor.u32 %v3082_v25, %v2619_v26  ;;  %v2777_v40 = vld [vmem:[%s3883_s16 + $0x108] sm:$0xf]  ;;  %v3123_v41 = vld [vmem:[%s3883_s16 + $0x114] sm:$0xf0]  ;;  %v3084_v46 = vld [vmem:[#allocation3 + $0x64] sm:$0xf] }
  0xc5   : > { %862 = vmatmul.bf16.gmra.mxu1 %v3990_v16  ;;  %911 = vmatmul.bf16.gmra.mxu2 %v3988_v15  ;;  %v3085_v44 = vld [vmem:[#allocation3 + $0x64] sm:$0xf0]  ;;  %v2633_v51 = vld [vmem:[#allocation3 + $0x70] sm:$0xf]  ;;  %v3087_v52 = vld [vmem:[#allocation3 + $0x74] sm:$0xf0] }
  0xc6   : > { %960 = vmatmul.bf16.gmra.mxu3 %v3990_v16  ;;  %1098 = vmatpush.bf16.msrb.mxu2 %v2702_v38  ;;  %v2782_v38 = vor.u32 %v3121_v31, %v2779_v35  ;;  %v3086_v55 = vld [vmem:[#allocation3 + $0x74] sm:$0xf]  ;;  %v2635_v56 = vld [vmem:[#allocation3 + $0x78] sm:$0xf0]  ;;  %v4076_v57 = vor.u32 %v3087_v52, %v2633_v51  ;;  %v2985_v24 = vld [vmem:[%s3889_s1 + $0x70] sm:$0xf] }
  0xc7   : > { %1147 = vmatpush.bf16.msrb.mxu3 %v2830_v42  ;;  %1000 = vmatpush.bf16.msrb.mxu0 %v2698_v43  ;;  %v2778_v42 = vor.u32 %v3123_v41, %v2777_v40  ;;  %v2625_v43 = vld [vmem:[#allocation3 + $0x60] sm:$0xf]  ;;  %v2987_v11 = vld [vmem:[%s3889_s1 + $0x78] sm:$0xf0]  ;;  %v3182_v13 = vld [vmem:[%s3889_s1 + $0xf4] sm:$0xf] }
  0xc8   : > { %1049 = vmatpush.bf16.msrb.mxu1 %v2826_v47  ;;  %v2627_v47 = vld [vmem:[#allocation3 + $0x68] sm:$0xf0]  ;;  %v4068_v48 = vor.u32 %v3085_v44, %v2625_v43  ;;  %v3051_v14 = vld [vmem:[%s3889_s1 + $0xf8] sm:$0xf0]  ;;  %v3183_v26 = vld [vmem:[%s3889_s1 + $0xf4] sm:$0xf0] }
  0xc9   : > { %v4070_v49 = vor.u32 %v3084_v46, %v2627_v47  ;;  %v3054_v20 = vor.u32 %v3182_v13, %v3051_v14  ;;  %v3164_v41 = vld [vmem:[%s3889_s1 + $0x64] sm:$0xf]  ;;  %v3043_v46 = vld [vmem:[%s3889_s1 + $0xe8] sm:$0xf0]  ;;  %v2971_v14 = vld [vmem:[%s3889_s1 + $0x58] sm:$0xf0] }
  0xca   : > { %1099 = vmatpush.bf16.msrb.mxu2 %v2686_v58  ;;  %v4078_v58 = vor.u32 %v3086_v55, %v2635_v56  ;;  %v3180_v44 = vld [vmem:[%s3889_s1 + $0xe4] sm:$0xf]  ;;  %p3055_p5 = scmp.ne.s32.totalorder %s3649_s18, 1 }
  0xcb   : > { %1148 = vmatpush.bf16.msrb.mxu3 %v2814_v62  ;;  %1001 = vmatpush.bf16.msrb.mxu0 %v2682_v63  ;;  %v3046_v51 = vor.u32 %v3180_v44, %v3043_v46 }
  0xcc   : > { %1050 = vmatpush.bf16.msrb.mxu1 %v2810_v2 }
  0xce   : > { %1100 = vmatpush.bf16.msrb.mxu2 %v2670_v12 }
  0xcf   : > { %1149 = vmatpush.bf16.msrb.mxu3 %v2798_v18  ;;  %1002 = vmatpush.bf16.msrb.mxu0 %v2666_v19 }
  0xd0   : > { %1051 = vmatpush.bf16.msrb.mxu1 %v2794_v22 }
  0xd2   : > { %1101 = vmatpush.bf16.msrb.mxu2 %v2654_v32 }
  0xd3   : > { %1150 = vmatpush.bf16.msrb.mxu3 %v2782_v38  ;;  %1003 = vmatpush.bf16.msrb.mxu0 %v2650_v39 }
  0xd4   : > { %818 = vmatmul.bf16.gmra.mxu0 %v4004_v33  ;;  %1052 = vmatpush.bf16.msrb.mxu1 %v2778_v42  ;;  %v2979_v42 = vld [vmem:[%s3889_s1 + $0x68] sm:$0xf0] }
  0xd5   : > { %867 = vmatmul.bf16.gmra.mxu1 %v4006_v34  ;;  %916 = vmatmul.bf16.gmra.mxu2 %v4004_v33  ;;  %v2982_v47 = vor.u32 %v3164_v41, %v2979_v42 }
  0xd6   : > { %965 = vmatmul.bf16.gmra.mxu3 %v4006_v34 }
  0xd7   : > { %2251 = vmatpush.bf16.msra.mxu3 %v3054_v20  ;;  %v3035_v20 = vld [vmem:[%s3889_s1 + $0xd8] sm:$0xf0] }
  0xdb   : > { %2252 = vmatpush.bf16.msra.mxu3 %v3046_v51  ;;  %v2963_v51 = vld [vmem:[%s3889_s1 + $0x48] sm:$0xf0] }
  0xe4   : > { %823 = vmatmul.bf16.gmra.mxu0 %v4020_v53 }
  0xe5   : > { %872 = vmatmul.bf16.gmra.mxu1 %v4022_v54  ;;  %921 = vmatmul.bf16.gmra.mxu2 %v4020_v53 }
  0xe6   : > { %970 = vmatmul.bf16.gmra.mxu3 %v4022_v54 }
  0xf4   : > { %828 = vmatmul.bf16.gmra.mxu0 %v4036_v7 }
  0xf5   : > { %877 = vmatmul.bf16.gmra.mxu1 %v4038_v8  ;;  %926 = vmatmul.bf16.gmra.mxu2 %v4036_v7 }
  0xf6   : > { %975 = vmatmul.bf16.gmra.mxu3 %v4038_v8 }
 0x104   : > { %833 = vmatmul.bf16.gmra.mxu0 %v4052_v27 }
 0x105   : > { %882 = vmatmul.bf16.gmra.mxu1 %v4054_v28  ;;  %931 = vmatmul.bf16.gmra.mxu2 %v4052_v27 }
 0x106   : > { %980 = vmatmul.bf16.gmra.mxu3 %v4054_v28 }
 0x114   : > { %838 = vmatmul.bf16.gmra.mxu0 %v4068_v48 }
 0x115   : > { %887 = vmatmul.bf16.gmra.mxu1 %v4070_v49  ;;  %936 = vmatmul.bf16.gmra.mxu2 %v4068_v48 }
 0x116   : > { %985 = vmatmul.bf16.gmra.mxu3 %v4070_v49 }
 0x124   : > { %843 = vmatmul.bf16.gmra.mxu0 %v4076_v57 }
 0x125   : > { %892 = vmatmul.bf16.gmra.mxu1 %v4078_v58  ;;  %941 = vmatmul.bf16.gmra.mxu2 %v4076_v57 }
 0x126   : > { %990 = vmatmul.bf16.gmra.mxu3 %v4078_v58 }
 0x131   : > { %v809_v59 = vpop.f32.mrf.mxu0 }
 0x132   : > { %v858_v60 = vpop.f32.mrf.mxu1 }
 0x133   : > { %v4084_v61 = vadd.f32 %v858_v60, %v809_v59  ;;  %v2977_v59 = vld [vmem:[%s3889_s1 + $0x60] sm:$0xf]  ;;  %v3165_v60 = vld [vmem:[%s3889_s1 + $0x64] sm:$0xf0] }
 0x134   : > { %1004 = vmatmul.bf16.vlgmr.msrb.gmra.mxu0 %v3963_v45 }
 0x135   : > { %1053 = vmatmul.bf16.vlgmr.msrb.gmra.mxu1 %v3968_v50  ;;  %1102 = vmatmul.bf16.vlgmr.msrb.gmra.mxu2 %v3963_v45 }
 0x136   : > { %1151 = vmatmul.bf16.vlgmr.msrb.gmra.mxu3 %v3968_v50  ;;  %v3166_v50 = vld [vmem:[%s3889_s1 + $0x74] sm:$0xf] }
 0x137   : > { %v2990_v12 = vor.u32 %v3166_v50, %v2987_v11 }
 0x138   : > { %v907_v62 = vpop.f32.mrf.mxu2 }
 0x139   : > { %v956_v63 = vpop.f32.mrf.mxu3  ;;  %v811_v0 = vpop.f32.mrf.mxu0  ;;  %2202 = vmatpush.bf16.msra.mxu2 %v2990_v12  ;;  %v3162_v12 = vld [vmem:[%s3889_s1 + $0x54] sm:$0xf] }
 0x13a   : > { %v4090_v1 = vadd.f32 %v956_v63, %v907_v62  ;;  %v860_v2 = vpop.f32.mrf.mxu1  ;;  %v3041_v62 = vld [vmem:[%s3889_s1 + $0xe0] sm:$0xf] }
 0x13b   : > { %v4092_v3 = vadd.f32 %v860_v2, %v811_v0  ;;  %v2978_v0 = vor.u32 %v3165_v60, %v2977_v59  ;;  %v3181_v2 = vld [vmem:[%s3889_s1 + $0xe4] sm:$0xf0] }
 0x13c   : > { %v2896_v59 = vmul.f32 -1.442695, %v4090_v1 }
 0x13d   : > { %2203 = vmatpush.bf16.msra.mxu2 %v2982_v47  ;;  %v3160_v47 = vld [vmem:[%s3889_s1 + $0x44] sm:$0xf] }
 0x140   : > { %v909_v4 = vpop.f32.mrf.mxu2 }
 0x141   : > { %v958_v5 = vpop.f32.mrf.mxu3  ;;  %v814_v6 = vpop.f32.mrf.mxu0 }
 0x142   : > { %v4094_v9 = vadd.f32 %v958_v5, %v909_v4  ;;  %v863_v10 = vpop.f32.mrf.mxu1  ;;  %v3042_v4 = vor.u32 %v3181_v2, %v3041_v62  ;;  %v2897_v2 = vmul.f32 -1.442695, %v4092_v3 }
 0x143   : > { %v4096_v45 = vadd.f32 %v863_v10, %v814_v6 }
 0x144   : > { %1009 = vmatmul.bf16.gmra.mxu0 %v3988_v15 }
 0x145   : > { %1058 = vmatmul.bf16.gmra.mxu1 %v3990_v16  ;;  %1107 = vmatmul.bf16.gmra.mxu2 %v3988_v15  ;;  %v3167_v15 = vld [vmem:[%s3889_s1 + $0x74] sm:$0xf0] }
 0x146   : > { %1156 = vmatmul.bf16.gmra.mxu3 %v3990_v16  ;;  %v2986_v25 = vor.u32 %v3167_v15, %v2985_v24  ;;  %v3049_v16 = vld [vmem:[%s3889_s1 + $0xf0] sm:$0xf] }
 0x147   : > { %v3050_v32 = vor.u32 %v3183_v26, %v3049_v16 }
 0x148   : > { %v912_v17 = vpop.f32.mrf.mxu2  ;;  %2104 = vmatpush.bf16.msra.mxu0 %v2986_v25 }
 0x149   : > { %v961_v18 = vpop.f32.mrf.mxu3  ;;  %v816_v19 = vpop.f32.mrf.mxu0  ;;  %2153 = vmatpush.bf16.msra.mxu1 %v3050_v32 }
 0x14a   : > { %v4106_v21 = vadd.f32 %v961_v18, %v912_v17  ;;  %v865_v22 = vpop.f32.mrf.mxu1 }
 0x14b   : > { %v4108_v23 = vadd.f32 %v865_v22, %v816_v19  ;;  %v3178_v19 = vld [vmem:[%s3889_s1 + $0xd4] sm:$0xf]  ;;  %v2974_v22 = vor.u32 %v3162_v12, %v2971_v14 }
 0x14c   : > { %2105 = vmatpush.bf16.msra.mxu0 %v2978_v0  ;;  %v3161_v0 = vld [vmem:[%s3889_s1 + $0x44] sm:$0xf0] }
 0x14d   : > { %2154 = vmatpush.bf16.msra.mxu1 %v3042_v4  ;;  %2204 = vmatpush.bf16.msra.mxu2 %v2974_v22  ;;  %v3025_v4 = vld [vmem:[%s3889_s1 + $0xc0] sm:$0xf] }
 0x150   : > { %v914_v29 = vpop.f32.mrf.mxu2 }
 0x151   : > { %v963_v30 = vpop.f32.mrf.mxu3  ;;  %v819_v31 = vpop.f32.mrf.mxu0 }
 0x152   : > { %v868_v35 = vpop.f32.mrf.mxu1  ;;  %v4114_v36 = vadd.f32 %v963_v30, %v914_v29  ;;  %v2969_v29 = vld [vmem:[%s3889_s1 + $0x50] sm:$0xf]  ;;  %v3163_v30 = vld [vmem:[%s3889_s1 + $0x54] sm:$0xf0] }
 0x153   : > { %v4117_v37 = vadd.f32 %v868_v35, %v819_v31 }
 0x154   : > { %1014 = vmatmul.bf16.gmra.mxu0 %v4004_v33 }
 0x155   : > { %1063 = vmatmul.bf16.gmra.mxu1 %v4006_v34  ;;  %1112 = vmatmul.bf16.gmra.mxu2 %v4004_v33 }
 0x156   : > { %1161 = vmatmul.bf16.gmra.mxu3 %v4006_v34 }
 0x158   : > { %v917_v38 = vpop.f32.mrf.mxu2 }
 0x159   : > { %v966_v39 = vpop.f32.mrf.mxu3  ;;  %v821_v40 = vpop.f32.mrf.mxu0 }
 0x15a   : > { %v870_v43 = vpop.f32.mrf.mxu1  ;;  %v4126_v52 = vadd.f32 %v966_v39, %v917_v38  ;;  %v2970_v38 = vor.u32 %v3163_v30, %v2969_v29  ;;  %v3033_v39 = vld [vmem:[%s3889_s1 + $0xd0] sm:$0xf]  ;;  %v3019_v30 = vld [vmem:[%s3889_s1 + $0xb8] sm:$0xf0] }
 0x15b   : > { %v4128_v34 = vadd.f32 %v870_v43, %v821_v40  ;;  %v3179_v40 = vld [vmem:[%s3889_s1 + $0xd4] sm:$0xf0] }
 0x15c   : > { %5507 = vst [vmem:[#allocation21_spill] sm:$0xff] %v4126_v52  ;;  %2106 = vmatpush.bf16.msra.mxu0 %v2970_v38  ;;  %v3034_v41 = vor.u32 %v3179_v40, %v3033_v39  ;;  %v2899_v40 = vmul.f32 -1.442695, %v4096_v45 }
 0x15e   : > { %2155 = vmatpush.bf16.msra.mxu1 %v3034_v41 }
 0x160   : > { %v919_v33 = vpop.f32.mrf.mxu2 }
 0x161   : > { %v968_v55 = vpop.f32.mrf.mxu3  ;;  %v824_v56 = vpop.f32.mrf.mxu0 }
 0x162   : > { %v873_v63 = vpop.f32.mrf.mxu1  ;;  %v4135_v5 = vadd.f32 %v968_v55, %v919_v33  ;;  %v3176_v33 = vld [vmem:[%s3889_s1 + $0xc4] sm:$0xf]  ;;  %v3027_v55 = vld [vmem:[%s3889_s1 + $0xc8] sm:$0xf0] }
 0x163   : > { %v4137_v6 = vadd.f32 %v873_v63, %v824_v56  ;;  %v2966_v56 = vor.u32 %v3160_v47, %v2963_v51  ;;  %v3030_v60 = vor.u32 %v3176_v33, %v3027_v55  ;;  %v2961_v63 = vld [vmem:[%s3889_s1 + $0x40] sm:$0xf]  ;;  %v2901_v51 = vmul.f32 -1.442695, %v4108_v23 }
 0x164   : > { %1019 = vmatmul.bf16.gmra.mxu0 %v4020_v53  ;;  %5508 = vst [vmem:[#allocation22_spill] sm:$0xff] %v4135_v5  ;;  %v2962_v12 = vor.u32 %v3161_v0, %v2961_v63 }
 0x165   : > { %5509 = vst [vmem:[#allocation23_spill] sm:$0xff] %v4137_v6  ;;  %1068 = vmatmul.bf16.gmra.mxu1 %v4022_v54  ;;  %1117 = vmatmul.bf16.gmra.mxu2 %v4020_v53  ;;  %v3038_v53 = vor.u32 %v3178_v19, %v3035_v20 }
 0x166   : > { %1166 = vmatmul.bf16.gmra.mxu3 %v4022_v54  ;;  %2205 = vmatpush.bf16.msra.mxu2 %v2966_v56 }
 0x167   : > { %2253 = vmatpush.bf16.msra.mxu3 %v3038_v53  ;;  %2107 = vmatpush.bf16.msra.mxu0 %v2962_v12  ;;  %v3158_v53 = vld [vmem:[%s3889_s1 + $0x34] sm:$0xf] }
 0x168   : > { %v922_v10 = vpop.f32.mrf.mxu2 }
 0x169   : > { %v971_v50 = vpop.f32.mrf.mxu3  ;;  %v826_v11 = vpop.f32.mrf.mxu0 }
 0x16a   : > { %v875_v13 = vpop.f32.mrf.mxu1  ;;  %v4144_v17 = vadd.f32 %v971_v50, %v922_v10  ;;  %v3177_v10 = vld [vmem:[%s3889_s1 + $0xc4] sm:$0xf0] }
 0x16b   : > { %v4146_v18 = vadd.f32 %v875_v13, %v826_v11  ;;  %2254 = vmatpush.bf16.msra.mxu3 %v3030_v60  ;;  %v3026_v14 = vor.u32 %v3177_v10, %v3025_v4 }
 0x16c   : > { %5510 = vst [vmem:[#allocation24_spill] sm:$0xff] %v4144_v17 }
 0x16d   : > { %5511 = vst [vmem:[#allocation25_spill] sm:$0xff] %v4146_v18  ;;  %2156 = vmatpush.bf16.msra.mxu1 %v3026_v14 }
 0x170   : > { %v924_v24 = vpop.f32.mrf.mxu2 }
 0x171   : > { %v973_v54 = vpop.f32.mrf.mxu3  ;;  %v829_v15 = vpop.f32.mrf.mxu0 }
 0x172   : > { %v878_v25 = vpop.f32.mrf.mxu1  ;;  %v4150_v16 = vadd.f32 %v973_v54, %v924_v24  ;;  %v2955_v24 = vld [vmem:[%s3889_s1 + $0x38] sm:$0xf0]  ;;  %v3174_v54 = vld [vmem:[%s3889_s1 + $0xb4] sm:$0xf] }
 0x173   : > { %v4169_v46 = vadd.f32 %v878_v25, %v829_v15  ;;  %v2958_v29 = vor.u32 %v3158_v53, %v2955_v24  ;;  %v2953_v24 = vld [vmem:[%s3889_s1 + $0x30] sm:$0xf] }
 0x174   : > { %5512 = vst [vmem:[#allocation26_spill] sm:$0xff] %v4150_v16  ;;  %1024 = vmatmul.bf16.gmra.mxu0 %v4036_v7 }
 0x175   : > { %1073 = vmatmul.bf16.gmra.mxu1 %v4038_v8  ;;  %1122 = vmatmul.bf16.gmra.mxu2 %v4036_v7  ;;  %v2895_v7 = vmul.f32 -1.442695, %v4084_v61 }
 0x176   : > { %1171 = vmatmul.bf16.gmra.mxu3 %v4038_v8  ;;  %2206 = vmatpush.bf16.msra.mxu2 %v2958_v29  ;;  %v3017_v29 = vld [vmem:[%s3889_s1 + $0xb0] sm:$0xf] }
 0x177   : > { %3301 = vpow2.f32 %v2895_v7  ;;  %v2900_v7 = vmul.f32 -1.442695, %v4106_v21 }
 0x178   : > { %v927_v26 = vpop.f32.mrf.mxu2  ;;  %3303 = vpow2.f32 %v2896_v59 }
 0x179   : > { %v976_v31 = vpop.f32.mrf.mxu3  ;;  %v4158_v32 = vpop.f32.mrf.mxu0  ;;  %3305 = vpow2.f32 %v2897_v2  ;;  %v2902_v2 = vmul.f32 -1.442695, %v4114_v36 }
 0x17a   : > { %v4160_v35 = vpop.f32.mrf.mxu1  ;;  %v4180_v62 = vadd.f32 %v976_v31, %v927_v26  ;;  %v2898_v26 = vmul.f32 -1.442695, %v4094_v9 }
 0x17c   : > { %5515 = vst [vmem:[#allocation29_spill] sm:$0xff] %v4180_v62  ;;  %v3173_v62 = vld [vmem:[%s3889_s1 + $0xa4] sm:$0xf0] }
 0x180   : > { %v4165_v8 = vpop.f32.mrf.mxu2 }
 0x181   : > { %5513 = vst [vmem:[#allocation27_spill] sm:$0xff] %v4165_v8  ;;  %v4167_v42 = vpop.f32.mrf.mxu3  ;;  %v834_v43 = vpop.f32.mrf.mxu0  ;;  %v3009_v8 = vld [vmem:[%s3889_s1 + $0xa0] sm:$0xf] }
 0x182   : > { %5514 = vst [vmem:[#allocation28_spill] sm:$0xff] %v4167_v42  ;;  %v883_v44 = vpop.f32.mrf.mxu1  ;;  %v2906_v42 = vmul.f32 -1.442695, %v4135_v5 }
 0x183   : > { %v4191_v19 = vadd.f32 %v883_v44, %v834_v43  ;;  %v3022_v43 = vor.u32 %v3174_v54, %v3019_v30  ;;  %v3175_v30 = vld [vmem:[%s3889_s1 + $0xb4] sm:$0xf0] }
 0x184   : > { %1029 = vmatmul.bf16.gmra.mxu0 %v4052_v27 }
 0x185   : > { %1078 = vmatmul.bf16.gmra.mxu1 %v4054_v28  ;;  %1127 = vmatmul.bf16.gmra.mxu2 %v4052_v27  ;;  %5518 = vst [vmem:[#allocation32_spill] sm:$0xff] %v4191_v19  ;;  %v2945_v19 = vld [vmem:[%s3889_s1 + $0x20] sm:$0xf] }
 0x186   : > { %1176 = vmatmul.bf16.gmra.mxu3 %v4054_v28  ;;  %v3302_v28 = vpop.eup %3301 }
 0x187   : > { %v4193_v20 = vadd.f32 1.0, %v3302_v28  ;;  %v3304_v25 = vpop.eup %3303  ;;  %2255 = vmatpush.bf16.msra.mxu3 %v3022_v43 }
 0x188   : > { %v932_v50 = vpop.f32.mrf.mxu2  ;;  %v3306_v39 = vpop.eup %3305  ;;  %v4213_v44 = vadd.f32 1.0, %v3304_v25 }
 0x189   : > { %v981_v27 = vpop.f32.mrf.mxu3  ;;  %v4187_v11 = vpop.f32.mrf.mxu0  ;;  %3307 = vrcp.f32 %v4193_v20  ;;  %v4216_v47 = vadd.f32 1.0, %v3306_v39  ;;  %v1329_v12 = vand.u32 2147483647, %v4193_v20  ;;  %vm1325_vm0 = vweird.f32 %v4193_v20 }
 0x18a   : > { %5516 = vst [vmem:[#allocation30_spill] sm:$0xff] %v4187_v11  ;;  %v4189_v13 = vpop.f32.mrf.mxu1  ;;  %v4195_v22 = vadd.f32 %v981_v27, %v932_v50  ;;  %3309 = vpow2.f32 %v2898_v26  ;;  %v3159_v26 = vld [vmem:[%s3889_s1 + $0x34] sm:$0xf0]  ;;  %vm1340_vm4 = vweird.f32 %v4213_v44 }
 0x18b   : > { %5517 = vst [vmem:[#allocation31_spill] sm:$0xff] %v4189_v13  ;;  %3311 = vpow2.f32 %v2899_v40  ;;  %vm4274_vm2 = vcmp.eq.f32.partialorder %v1329_v12, 8.507059e+37  ;;  %v1344_v12 = vand.u32 2147483647, %v4213_v44  ;;  %vm1355_vm5 = vweird.f32 %v4216_v47 }
 0x18c   : > { %5519 = vst [vmem:[#allocation33_spill] sm:$0xff] %v4195_v22  ;;  %3313 = vpow2.f32 %v2900_v7 }
 0x18d   : > { %3315 = vrcp.f32 %v4213_v44  ;;  %vm4335_vm8 = vcmp.eq.f32.partialorder %v1344_v12, 8.507059e+37 }
 0x18e   : > { %3317 = vrcp.f32 %v4216_v47 }
 0x18f   : > { %v4222_v33 = vpop.eup %3307  ;;  %3319 = vpow2.f32 %v2901_v51  ;;  %v2903_v51 = vmul.f32 -1.442695, %v4117_v37 }
 0x190   : > { %v4200_v15 = vpop.f32.mrf.mxu2  ;;  %v1321_v60 = vmul.f32 %v4222_v33, %v4193_v20  ;;  %3321 = vpow2.f32 %v2902_v2  ;;  %v3018_v2 = vor.u32 %v3175_v30, %v3017_v29  ;;  %vm1326_vm1 = vweird.f32 %v4222_v33 }
 0x191   : > { %5520 = vst [vmem:[#allocation34_spill] sm:$0xff] %v4200_v15  ;;  %v4205_v31 = vpop.f32.mrf.mxu3  ;;  %v4207_v38 = vpop.f32.mrf.mxu0  ;;  %vm4294_vm3 = vmor %vm1325_vm0, %vm1326_vm1 }
 0x192   : > { %5521 = vst [vmem:[#allocation35_spill] sm:$0xff] %v4205_v31  ;;  %v4210_v41 = vpop.f32.mrf.mxu1  ;;  %v1322_v10 = vsub.f32 1.0, %v1321_v60  ;;  %2157 = vmatpush.bf16.msra.mxu1 %v3018_v2 }
 0x194   : > { %1034 = vmatmul.bf16.gmra.mxu0 %v4068_v48  ;;  %v1323_v7 = vmul.f32 %v4222_v33, %v1322_v10 }
 0x195   : > { %1083 = vmatmul.bf16.gmra.mxu1 %v4070_v49  ;;  %1132 = vmatmul.bf16.gmra.mxu2 %v4068_v48 }
 0x196   : > { %1181 = vmatmul.bf16.gmra.mxu3 %v4070_v49  ;;  %v3310_v49 = vpop.eup %3309 }
 0x197   : > { %v3312_v63 = vpop.eup %3311  ;;  %v4239_v50 = vadd.f32 1.0, %v3310_v49 }
 0x198   : > { %v4225_v55 = vpop.f32.mrf.mxu2  ;;  %v3314_v0 = vpop.eup %3313  ;;  %v4244_v14 = vadd.f32 1.0, %v3312_v63  ;;  %v1331_v63 = vand.u32 2147483648, %v4193_v20  ;;  %v2947_v20 = vld [vmem:[%s3889_s1 + $0x28] sm:$0xf0] }
 0x199   : > { %v4228_v56 = vpop.f32.mrf.mxu3  ;;  %v4230_v59 = vpop.f32.mrf.mxu0  ;;  %v4246_v53 = vadd.f32 1.0, %v3314_v0  ;;  %3323 = vrcp.f32 %v4239_v50  ;;  %v2954_v0 = vor.u32 %v3159_v26, %v2953_v24  ;;  %v1359_v26 = vand.u32 2147483647, %v4216_v47 }
 0x19a   : > { %5522 = vst [vmem:[#allocation36_spill] sm:$0xff] %v4230_v59  ;;  %v4234_v48 = vpop.f32.mrf.mxu1  ;;  %v4237_v4 = vpop.eup %3315  ;;  %3325 = vrcp.f32 %v4244_v14  ;;  %v3172_v59 = vld [vmem:[%s3889_s1 + $0xa4] sm:$0xf]  ;;  %vm1370_vm12 = vweird.f32 %v4239_v50  ;;  %vm1385_vm13 = vweird.f32 %v4244_v14 }
 0x19b   : > { %5523 = vst [vmem:[#allocation37_spill] sm:$0xff] %v4234_v48  ;;  %v4241_v27 = vpop.eup %3317  ;;  %v1336_v25 = vmul.f32 %v4237_v4, %v4213_v44  ;;  %3327 = vrcp.f32 %v4246_v53  ;;  %2108 = vmatpush.bf16.msra.mxu0 %v2954_v0  ;;  %v3156_v0 = vld [vmem:[%s3889_s1 + $0x24] sm:$0xf]  ;;  %vm1341_vm6 = vweird.f32 %v4237_v4  ;;  %vm4339_vm9 = vcmp.eq.f32.partialorder %v1359_v26, 8.507059e+37 }
 0x19c   : > { %v3320_v28 = vpop.eup %3319  ;;  %v1351_v43 = vmul.f32 %v4241_v27, %v4216_v47  ;;  %3329 = vpow2.f32 %v2903_v51  ;;  %v2904_v51 = vmul.f32 -1.442695, %v4126_v52  ;;  %vm1356_vm7 = vweird.f32 %v4241_v27  ;;  %vm4373_vm10 = vmor %vm1340_vm4, %vm1341_vm6 }
 0x19d   : > { %v4268_v49 = vadd.f32 1.0, %v3320_v28  ;;  %v1324_v28 = vadd.f32 %v4222_v33, %v1323_v7  ;;  %v3322_v24 = vpop.eup %3321  ;;  %v1332_v7 = vor.u32 1.1754944e-38, %v1331_v63  ;;  %v3011_v63 = vld [vmem:[%s3889_s1 + $0xa8] sm:$0xf0]  ;;  %vm4386_vm11 = vmor %vm1355_vm5, %vm1356_vm7 }
 0x19e   : > { %v1352_v48 = vsub.f32 1.0, %v1351_v43  ;;  %v1361_v43 = vand.u32 2147483648, %v4216_v47 }
 0x19f   : > { %3331 = vrcp.f32 %v4268_v49  ;;  %v4288_v29 = vpop.eup %3323 }
 0x1a0   : > { %v4249_v54 = vpop.f32.mrf.mxu2  ;;  %v4317_v15 = vpop.eup %3325  ;;  %v1353_v11 = vmul.f32 %v4241_v27, %v1352_v48  ;;  %v1366_v30 = vmul.f32 %v4288_v29, %v4239_v50  ;;  %v1362_v10 = vor.u32 1.1754944e-38, %v1361_v43  ;;  %vm1371_vm14 = vweird.f32 %v4288_v29 }
 0x1a1   : > { %5524 = vst [vmem:[#allocation38_spill] sm:$0xff] %v4249_v54  ;;  %v4256_v39 = vpop.f32.mrf.mxu3  ;;  %v4258_v40 = vpop.f32.mrf.mxu0  ;;  %v1346_v54 = vand.u32 2147483648, %v4213_v44  ;;  %vm1386_vm0 = vweird.f32 %v4317_v15 }
 0x1a2   : > { %5525 = vst [vmem:[#allocation39_spill] sm:$0xff] %v4256_v39  ;;  %v4265_v60 = vpop.f32.mrf.mxu1  ;;  %v1337_v39 = vsub.f32 1.0, %v1336_v25  ;;  %v2905_v25 = vmul.f32 -1.442695, %v4128_v34  ;;  %vm4496_vm6 = vmor %vm1385_vm13, %vm1386_vm0 }
 0x1a3   : > { %v4322_v13 = vor.u32 1.1754944e-38, %v1346_v54 }
 0x1a4   : > { %1039 = vmatmul.bf16.gmra.mxu0 %v4076_v57  ;;  %3333 = vpow2.f32 %v2905_v25  ;;  %v3157_v25 = vld [vmem:[%s3889_s1 + $0x24] sm:$0xf0] }
 0x1a5   : > { %1088 = vmatmul.bf16.gmra.mxu1 %v4078_v58  ;;  %1137 = vmatmul.bf16.gmra.mxu2 %v4076_v57  ;;  %v1338_v57 = vmul.f32 %v4237_v4, %v1337_v39  ;;  %v1328_v39 = vsel %vm4294_vm3, %v4222_v33, %v1324_v28  ;;  %v1376_v28 = vand.u32 2147483648, %v4239_v50  ;;  %3335 = vpow2.f32 %v2904_v51  ;;  %vm4472_vm3 = vmor %vm1370_vm12, %vm1371_vm14 }
 0x1a6   : > { %1186 = vmatmul.bf16.gmra.mxu3 %v4078_v58  ;;  %v4308_v58 = vadd.f32 %v4210_v41, %v4207_v38  ;;  %v4325_v38 = vadd.f32 1.0, %v3322_v24  ;;  %v2950_v24 = vor.u32 %v3156_v0, %v2947_v20  ;;  %v1333_v12 = vsel %vm4274_vm2, %v1332_v7, %v1328_v39 }
 0x1a7   : > { %v1339_v26 = vadd.f32 %v4237_v4, %v1338_v57  ;;  %v1367_v7 = vsub.f32 1.0, %v1366_v30  ;;  %v2946_v51 = vor.u32 %v3157_v25, %v2945_v19  ;;  %v4367_v57 = vmul.f32 %v1333_v12, %v4084_v61 }
 0x1a8   : > { %v4301_v2 = vpop.f32.mrf.mxu2  ;;  %5530 = vst [vmem:[#allocation40_spill] sm:$0xff] %v4308_v58  ;;  %v4329_v58 = vpop.eup %3327  ;;  %3337 = vrcp.f32 %v4325_v38  ;;  %2207 = vmatpush.bf16.msra.mxu2 %v2950_v24  ;;  %v1374_v20 = vand.u32 2147483647, %v4239_v50  ;;  %v4391_v44 = vor.u32 1.1754944e-38, %v1376_v28  ;;  %vm1400_vm2 = vweird.f32 %v4246_v53 }
 0x1a9   : > { %v4313_v22 = vpop.f32.mrf.mxu3  ;;  %v4315_v31 = vpop.f32.mrf.mxu0  ;;  %3339 = vpow2.f32 %v2906_v42  ;;  %2109 = vmatpush.bf16.msra.mxu0 %v2946_v51  ;;  %v1343_v47 = vsel %vm4373_vm10, %v4237_v4, %v1339_v26  ;;  %v1368_v51 = vmul.f32 %v4288_v29, %v1367_v7  ;;  %v4414_v4 = vadd.f32 %v4265_v60, %v4258_v40 }
 0x1aa   : > { %5531 = vst [vmem:[#allocation41_spill] sm:$0xff] %v4315_v31  ;;  %v4327_v41 = vpop.f32.mrf.mxu1  ;;  %v3330_v33 = vpop.eup %3329  ;;  %v4346_v31 = vadd.f32 %v4228_v56, %v4225_v55  ;;  %v1381_v55 = vmul.f32 %v4317_v15, %v4244_v14  ;;  %v1396_v56 = vmul.f32 %v4329_v58, %v4246_v53  ;;  %v1348_v7 = vsel %vm4335_vm8, %v4322_v13, %v1343_v47 }
 0x1ab   : > { %5532 = vst [vmem:[#allocation42_spill] sm:$0xff] %v4327_v41  ;;  %v3014_v41 = vor.u32 %v3172_v59, %v3011_v63  ;;  %v4350_v52 = vpop.eup %3331  ;;  %v1354_v59 = vadd.f32 %v4241_v27, %v1353_v11  ;;  %v4364_v0 = vadd.f32 1.0, %v3330_v33  ;;  %v3010_v63 = vor.u32 %v3173_v62, %v3009_v8  ;;  %v3154_v8 = vld [vmem:[%s3889_s1 + $0x14] sm:$0xf]  ;;  %v2939_v62 = vld [vmem:[%s3889_s1 + $0x18] sm:$0xf0] }
 0x1ac   : > { %5537 = vst [vmem:[#allocation43_spill] sm:$0xff] %v4346_v31  ;;  %v1411_v43 = vmul.f32 %v4350_v52, %v4268_v49  ;;  %v3334_v19 = vpop.eup %3333  ;;  %v1382_v24 = vsub.f32 1.0, %v1381_v55  ;;  %v1397_v25 = vsub.f32 1.0, %v1396_v56  ;;  %v3170_v55 = vld [vmem:[%s3889_s1 + $0x94] sm:$0xf]  ;;  %vm4432_vm15 = vcmp.eq.f32.partialorder %v1374_v20, 8.507059e+37 }
 0x1ad   : > { %2256 = vmatpush.bf16.msra.mxu3 %v3014_v41  ;;  %v1391_v41 = vand.u32 2147483648, %v4244_v14  ;;  %v1358_v28 = vsel %vm4386_vm11, %v4241_v27, %v1354_v59  ;;  %2158 = vmatpush.bf16.msra.mxu1 %v3010_v63  ;;  %v3336_v12 = vpop.eup %3335  ;;  %3341 = vrcp.f32 %v4364_v0  ;;  %5544 = vst [vmem:[#allocation46_spill] sm:$0xff] %v4414_v4  ;;  %v4418_v27 = vadd.f32 1.0, %v3334_v19  ;;  %v3003_v56 = vld [vmem:[%s3889_s1 + $0x98] sm:$0xf0] }
 0x1ae   : > { %v4416_v26 = vpop.eup %3337  ;;  %v1412_v11 = vsub.f32 1.0, %v1411_v43  ;;  %v2942_v59 = vor.u32 %v3154_v8, %v2939_v62  ;;  %v4424_v63 = vadd.f32 %v4313_v22, %v4301_v2  ;;  %v1363_v40 = vsel %vm4339_vm9, %v1362_v10, %v1358_v28 }
 0x1af   : > { %v1389_v43 = vand.u32 2147483647, %v4244_v14  ;;  %v1383_v19 = vmul.f32 %v4317_v15, %v1382_v24  ;;  %v1398_v22 = vmul.f32 %v4329_v58, %v1397_v25  ;;  %v1404_v2 = vand.u32 2147483647, %v4246_v53  ;;  %v3340_v13 = vpop.eup %3339 }
 0x1b0   : > { %v4380_v39 = vpop.f32.mrf.mxu2  ;;  %5545 = vst [vmem:[#allocation47_spill] sm:$0xff] %v4424_v63  ;;  %2208 = vmatpush.bf16.msra.mxu2 %v2942_v59  ;;  %v3006_v48 = vor.u32 %v3170_v55, %v3003_v56  ;;  %v1369_v54 = vadd.f32 %v4288_v29, %v1368_v51  ;;  %v1426_v10 = vmul.f32 %v4416_v26, %v4325_v38  ;;  %v4443_v20 = vadd.f32 1.0, %v3336_v12  ;;  %v3171_v63 = vld [vmem:[%s3889_s1 + $0x94] sm:$0xf0] }
 0x1b1   : > { %5540 = vst [vmem:[#allocation44_spill] sm:$0xff] %v4380_v39  ;;  %v4397_v30 = vpop.f32.mrf.mxu3  ;;  %v4399_v33 = vpop.f32.mrf.mxu0  ;;  %v4446_v61 = vmul.f32 %v1348_v7, %v4090_v1  ;;  %v1392_v8 = vor.u32 1.1754944e-38, %v1391_v41  ;;  %v1413_v62 = vmul.f32 %v4350_v52, %v1412_v11  ;;  %v4455_v24 = vmul.f32 %v1363_v40, %v4092_v3 }
 0x1b2   : > { %5543 = vst [vmem:[#allocation45_spill] sm:$0xff] %v4397_v30  ;;  %v4407_v42 = vpop.f32.mrf.mxu1  ;;  %v2907_v30 = vmul.f32 -1.442695, %v4137_v6  ;;  %2257 = vmatpush.bf16.msra.mxu3 %v3006_v48  ;;  %vm4458_vm1 = vcmp.eq.f32.partialorder %v1389_v43, 8.507059e+37  ;;  %v1406_v1 = vand.u32 2147483648, %v4246_v53  ;;  %v1384_v12 = vadd.f32 %v4317_v15, %v1383_v19 }
 0x1b3   : > { %v4452_v28 = vpop.eup %3341  ;;  %v1399_v51 = vadd.f32 %v4329_v58, %v1398_v22  ;;  %vm1401_vm4 = vweird.f32 %v4329_v58  ;;  %vm4479_vm5 = vcmp.eq.f32.partialorder %v1404_v2, 8.507059e+37  ;;  %v4483_v59 = vadd.f32 1.0, %v3340_v13  ;;  %v3169_v6 = vld [vmem:[%s3889_s1 + $0x84] sm:$0xf0] }
 0x1b4   : > { %3343 = vpow2.f32 %v2907_v30  ;;  %v1373_v50 = vsel %vm4472_vm3, %v4288_v29, %v1369_v54  ;;  %v1427_v56 = vsub.f32 1.0, %v1426_v10  ;;  %v2909_v7 = vmul.f32 -1.442695, %v4146_v18  ;;  %vm4507_vm8 = vmor %vm1400_vm2, %vm1401_vm4  ;;  %v2993_v18 = vld [vmem:[%s3889_s1 + $0x80] sm:$0xf] }
 0x1b5   : > { %3345 = vrcp.f32 %v4418_v27  ;;  %v1414_v43 = vadd.f32 %v4350_v52, %v1413_v62  ;;  %vm1416_vm7 = vweird.f32 %v4350_v52  ;;  %v1441_v29 = vmul.f32 %v4452_v28, %v4364_v0 }
 0x1b6   : > { %3347 = vrcp.f32 %v4443_v20  ;;  %v2908_v19 = vmul.f32 -1.442695, %v4144_v17  ;;  %v1407_v14 = vor.u32 1.1754944e-38, %v1406_v1  ;;  %vm1415_vm9 = vweird.f32 %v4268_v49  ;;  %v2937_v1 = vld [vmem:[%s3889_s1 + $0x10] sm:$0xf] }
 0x1b7   : > { %v1419_v48 = vand.u32 2147483647, %v4268_v49  ;;  %v1421_v13 = vand.u32 2147483648, %v4268_v49  ;;  %v1378_v10 = vsel %vm4432_vm15, %v4391_v44, %v1373_v50  ;;  %v1388_v53 = vsel %vm4496_vm6, %v4317_v15, %v1384_v12  ;;  %vm4526_vm10 = vmor %vm1415_vm9, %vm1416_vm7  ;;  %v3153_v17 = vld [vmem:[%s3889_s1 + $0x4] sm:$0xf0] }
 0x1b8   : > { %v4450_v47 = vpop.f32.mrf.mxu2  ;;  %v1403_v62 = vsel %vm4507_vm8, %v4329_v58, %v1399_v51  ;;  %3349 = vrcp.f32 %v4483_v59  ;;  %v1428_v49 = vmul.f32 %v4416_v26, %v1427_v56  ;;  %v1434_v3 = vand.u32 2147483647, %v4325_v38 }
 0x1b9   : > { %v4464_v41 = vpop.f32.mrf.mxu3  ;;  %v4466_v25 = vpop.f32.mrf.mxu0  ;;  %v1436_v44 = vand.u32 2147483648, %v4325_v38  ;;  %3351 = vpow2.f32 %v2909_v7  ;;  %v1418_v15 = vsel %vm4526_vm10, %v4350_v52, %v1414_v43  ;;  %v1442_v60 = vsub.f32 1.0, %v1441_v29 }
 0x1ba   : > { %v4485_v55 = vpop.f32.mrf.mxu1  ;;  %v3344_v22 = vpop.eup %3343  ;;  %3353 = vpow2.f32 %v2908_v19  ;;  %vm1420_vm11 = vcmp.eq.f32.partialorder %v1419_v48, 8.507059e+37  ;;  %v1422_v50 = vor.u32 1.1754944e-38, %v1421_v13  ;;  %v2910_v40 = vmul.f32 -1.442695, %v4150_v16 }
 0x1bb   : > { %v4514_v54 = vpop.eup %3345  ;;  %v4536_v12 = vadd.f32 1.0, %v3344_v22  ;;  %v4550_v52 = vmul.f32 %v1378_v10, %v4094_v9  ;;  %v1393_v43 = vsel %vm4458_vm1, %v1392_v8, %v1388_v53  ;;  %vm1430_vm12 = vweird.f32 %v4325_v38 }
 0x1bc   : > { %v4540_v51 = vpop.eup %3347  ;;  %v1471_v56 = vmul.f32 %v4514_v54, %v4418_v27  ;;  %vm1431_vm13 = vweird.f32 %v4416_v26  ;;  %v1408_v19 = vsel %vm4479_vm5, %v1407_v14, %v1403_v62  ;;  %v1423_v22 = vsel %vm1420_vm11, %v1422_v50, %v1418_v15  ;;  %v3001_v50 = vld [vmem:[%s3889_s1 + $0x90] sm:$0xf] }
 0x1bd   : > { %v1429_v48 = vadd.f32 %v4416_v26, %v1428_v49  ;;  %vm4561_vm14 = vcmp.eq.f32.partialorder %v1434_v3, 8.507059e+37  ;;  %v1437_v8 = vor.u32 1.1754944e-38, %v1436_v44  ;;  %v1443_v38 = vmul.f32 %v4452_v28, %v1442_v60  ;;  %vm4571_vm15 = vmor %vm1430_vm12, %vm1431_vm13  ;;  %v3155_v60 = vld [vmem:[%s3889_s1 + $0x14] sm:$0xf0] }
 0x1be   : > { %v4565_v9 = vpop.eup %3349  ;;  %v1456_v30 = vmul.f32 %v4540_v51, %v4443_v20  ;;  %3355 = vrcp.f32 %v4536_v12  ;;  %v1449_v10 = vand.u32 2147483647, %v4364_v0  ;;  %v1451_v53 = vand.u32 2147483648, %v4364_v0 }
 0x1bf   : > { %v3352_v11 = vpop.eup %3351  ;;  %v1472_v62 = vsub.f32 1.0, %v1471_v56  ;;  %3357 = vpow2.f32 %v2910_v40  ;;  %v4579_v3 = vmul.f32 %v1393_v43, %v4096_v45  ;;  %v4582_v44 = vmul.f32 %v1408_v19, %v4106_v21 }
 0x1c0   : > { %v4538_v58 = vpop.f32.mrf.mxu2  ;;  %v3354_v49 = vpop.eup %3353  ;;  %v4585_v15 = vmul.f32 %v1423_v22, %v4108_v23  ;;  %vm1445_vm0 = vweird.f32 %v4364_v0  ;;  %v1433_v56 = vsel %vm4571_vm15, %v4416_v26, %v1429_v48  ;;  %vm1446_vm1 = vweird.f32 %v4452_v28 }
 0x1c1   : > { %v4545_v7 = vpop.f32.mrf.mxu3  ;;  %v4547_v2 = vpop.f32.mrf.mxu0  ;;  %v1466_v45 = vand.u32 2147483648, %v4443_v20  ;;  %v1479_v40 = vand.u32 2147483647, %v4418_v27  ;;  %v1444_v21 = vadd.f32 %v4452_v28, %v1443_v38  ;;  %v1457_v43 = vsub.f32 1.0, %v1456_v30  ;;  %vm4627_vm4 = vmor %vm1445_vm0, %vm1446_vm1 }
 0x1c2   : > { %v4556_v29 = vpop.f32.mrf.mxu1  ;;  %v1486_v23 = vmul.f32 %v4565_v9, %v4483_v59  ;;  %v4600_v19 = vadd.f32 1.0, %v3352_v11  ;;  %v1473_v4 = vmul.f32 %v4514_v54, %v1472_v62  ;;  %v4605_v14 = vadd.f32 1.0, %v3354_v49 }
 0x1c3   : > { %v2938_v26 = vor.u32 %v3155_v60, %v2937_v1  ;;  %v3002_v48 = vor.u32 %v3171_v63, %v3001_v50  ;;  %vm4613_vm2 = vcmp.eq.f32.partialorder %v1449_v10, 8.507059e+37  ;;  %v1452_v30 = vor.u32 1.1754944e-38, %v1451_v53  ;;  %v3152_v50 = vld [vmem:[%s3889_s1 + $0x4] sm:$0xf]  ;;  %v2929_v53 = vld [vmem:[%s3889_s1] sm:$0xf] }
 0x1c4   : > { %v4611_v16 = vpop.eup %3355  ;;  %vm1460_vm3 = vweird.f32 %v4443_v20  ;;  %v1481_v11 = vand.u32 2147483648, %v4418_v27  ;;  %v1438_v1 = vsel %vm4561_vm14, %v1437_v8, %v1433_v56  ;;  %v4632_v49 = vor.u32 1.1754944e-38, %v1466_v45  ;;  %v2931_v56 = vld [vmem:[%s3889_s1 + $0x8] sm:$0xf0] }
 0x1c5   : > { %v3358_v63 = vpop.eup %3357  ;;  %vm4634_vm5 = vcmp.eq.f32.partialorder %v1479_v40, 8.507059e+37  ;;  %2110 = vmatpush.bf16.msra.mxu0 %v2938_v26  ;;  %2159 = vmatpush.bf16.msra.mxu1 %v3002_v48  ;;  %v1448_v0 = vsel %vm4627_vm4, %v4452_v28, %v1444_v21  ;;  %v1458_v13 = vmul.f32 %v4540_v51, %v1457_v43  ;;  %v1496_v8 = vand.u32 2147483648, %v4483_v59  ;;  %v3168_v28 = vld [vmem:[%s3889_s1 + $0x84] sm:$0xf]  ;;  %v2995_v21 = vld [vmem:[%s3889_s1 + $0x88] sm:$0xf0] }
 0x1c6   : > { %5568 = vst [vmem:[#allocation48_spill] sm:$0xff] %v4632_v49  ;;  %3359 = vrcp.f32 %v4600_v19  ;;  %v1474_v45 = vadd.f32 %v4514_v54, %v1473_v4  ;;  %vm1476_vm6 = vweird.f32 %v4514_v54  ;;  %v1487_v40 = vsub.f32 1.0, %v1486_v23 }
 0x1c7   : > { %3361 = vrcp.f32 %v4605_v14  ;;  %v1482_v26 = vor.u32 1.1754944e-38, %v1481_v11  ;;  %v1494_v43 = vand.u32 2147483647, %v4483_v59  ;;  %v1501_v48 = vmul.f32 %v4611_v16, %v4536_v12 }
 0x1c8   : > { %v4602_v22 = vpop.f32.mrf.mxu2  ;;  %v4654_v10 = vadd.f32 1.0, %v3358_v63  ;;  %v4658_v4 = vmul.f32 %v1438_v1, %v4114_v36  ;;  %vm1461_vm7 = vweird.f32 %v4540_v51  ;;  %vm1475_vm8 = vweird.f32 %v4418_v27 }
 0x1c9   : > { %v4607_v39 = vpop.f32.mrf.mxu3  ;;  %v4609_v31 = vpop.f32.mrf.mxu0  ;;  %v2934_v23 = vor.u32 %v3152_v50, %v2931_v56  ;;  %v1453_v11 = vsel %vm4613_vm2, %v1452_v30, %v1448_v0  ;;  %v4668_v5 = vadd.f32 %v4540_v51, %v1458_v13  ;;  %vm4672_vm9 = vmor %vm1475_vm8, %vm1476_vm6  ;;  %vm1490_vm10 = vweird.f32 %v4483_v59 }
 0x1ca   : > { %v4619_v62 = vpop.f32.mrf.mxu1  ;;  %v4677_v36 = vor.u32 1.1754944e-38, %v1496_v8  ;;  %v2998_v27 = vor.u32 %v3168_v28, %v2995_v21  ;;  %v1478_v38 = vsel %vm4672_vm9, %v4514_v54, %v1474_v45  ;;  %v1488_v30 = vmul.f32 %v4565_v9, %v1487_v40  ;;  %vm4698_vm11 = vmor %vm1460_vm3, %vm1461_vm7 }
 0x1cb   : > { %v1055_v0 = vadd.f32 %v4407_v42, %v4399_v33  ;;  %2209 = vmatpush.bf16.msra.mxu2 %v2934_v23  ;;  %v1153_v13 = vadd.f32 %v4464_v41, %v4450_v47  ;;  %v1502_v8 = vsub.f32 1.0, %v1501_v48  ;;  %v1057_v28 = vadd.f32 %v4485_v55, %v4466_v25 }
 0x1cc   : > { %v4687_v49 = vpop.eup %3359  ;;  %2258 = vmatpush.bf16.msra.mxu3 %v2998_v27  ;;  %v2930_v21 = vor.u32 %v3153_v17, %v2929_v53  ;;  %v2994_v54 = vor.u32 %v3169_v6, %v2993_v18  ;;  %v1808_v33 = vmul.f32 %v1453_v11, %v4117_v37  ;;  %v1511_v47 = vand.u32 2147483648, %v4536_v12  ;;  %v5584_v27 = vld [vmem:[#allocation28_spill] sm:$0xff] }
 0x1cd   : > { %v4691_v40 = vpop.eup %3361  ;;  %3363 = vrcp.f32 %v4654_v10  ;;  %v1155_v6 = vadd.f32 %v4545_v7, %v4538_v58  ;;  %v1463_v37 = vsel %vm4698_vm11, %v4540_v51, %v4668_v5  ;;  %v1483_v17 = vsel %vm4634_vm5, %v1482_v26, %v1478_v38 }
 0x1ce   : > { %vm1491_vm12 = vweird.f32 %v4565_v9  ;;  %vm1505_vm13 = vweird.f32 %v4536_v12  ;;  %v1834_v18 = vmul.f32 %v4455_v24, %v1057_v28  ;;  %2111 = vmatpush.bf16.msra.mxu0 %v2930_v21  ;;  %2160 = vmatpush.bf16.msra.mxu1 %v2994_v54  ;;  %v1531_v41 = vmul.f32 %v4687_v49, %v4600_v19  ;;  %v5588_v24 = vld [vmem:[#allocation21_spill] sm:$0xff] }
 0x1cf   : > { %v1832_v25 = vmul.f32 %v4367_v57, %v1055_v0  ;;  %v1833_v55 = vmul.f32 %v4446_v61, %v1153_v13  ;;  %v1835_v5 = vmul.f32 %v4550_v52, %v1155_v6  ;;  %v5575_v58 = vand.u32 2147483647, %v4443_v20  ;;  %vm4753_vm1 = vmor %vm1490_vm10, %vm1491_vm12 }
 0x1d0   : > { %v1110_v1 = vpop.f32.mrf.mxu2  ;;  %v1489_v7 = vadd.f32 %v4565_v9, %v1488_v30  ;;  %vm4727_vm15 = vcmp.eq.f32.partialorder %v1494_v43, 8.507059e+37  ;;  %v1503_v53 = vmul.f32 %v4611_v16, %v1502_v8  ;;  %vm1506_vm0 = vweird.f32 %v4611_v16 }
 0x1d1   : > { %v1159_v50 = vpop.f32.mrf.mxu3  ;;  %v1015_v56 = vpop.f32.mrf.mxu0  ;;  %vm4722_vm14 = vcmp.eq.f32.partialorder %v5575_v58, 8.507059e+37  ;;  %v1516_v57 = vmul.f32 %v4691_v40, %v4605_v14  ;;  %v4737_v20 = vadd.f32 %v4160_v35, %v4158_v32  ;;  %v1864_v61 = vpack.c.bf16 %v1834_v18, %v1832_v25  ;;  %v5582_v35 = vld [vmem:[#allocation29_spill] sm:$0xff]  ;;  %vm4788_vm2 = vmor %vm1505_vm13, %vm1506_vm0 }
 0x1d2   : > { %v1064_v45 = vpop.f32.mrf.mxu1  ;;  %v1865_v52 = vpack.c.bf16 %v1835_v5, %v1833_v55  ;;  %v1060_v60 = vadd.f32 %v4556_v29, %v4547_v2  ;;  %v1810_v26 = vmul.f32 %v1483_v17, %v4128_v34  ;;  %v2911_v43 = vmul.f32 -1.442695, %v4169_v46  ;;  %v5583_v29 = vld [vmem:[#allocation27_spill] sm:$0xff] }
 0x1d3   : > { %v1158_v48 = vadd.f32 %v4607_v39, %v4602_v22  ;;  %v1062_v23 = vadd.f32 %v4619_v62, %v4609_v31  ;;  %v4747_v63 = vpop.eup %3363  ;;  %v1532_v34 = vsub.f32 1.0, %v1531_v41  ;;  %v2912_v2 = vmul.f32 -1.442695, %v5582_v35  ;;  %2112 = vmatmul.bf16.vlgmr.msra.gmra.mxu0 %v1864_v61  ;;  %2210 = vmatmul.bf16.vlgmr.msra.gmra.mxu2 %v1864_v61 }
 0x1d4   : > { %v4760_v39 = vadd.f32 %v5584_v27, %v5583_v29  ;;  %v1160_v31 = vadd.f32 %v1159_v50, %v1110_v1  ;;  %v1493_v59 = vsel %vm4753_vm1, %v4565_v9, %v1489_v7  ;;  %v1504_v38 = vadd.f32 %v4611_v16, %v1503_v53  ;;  %2161 = vmatmul.bf16.vlgmr.msra.gmra.mxu1 %v1865_v52 }
 0x1d5   : > { %v1517_v30 = vsub.f32 1.0, %v1516_v57  ;;  %2259 = vmatmul.bf16.vlgmr.msra.gmra.mxu3 %v1865_v52  ;;  %v1065_v0 = vadd.f32 %v1064_v45, %v1015_v56  ;;  %v2913_v8 = vmul.f32 -1.442695, %v4737_v20  ;;  %v1836_v28 = vmul.f32 %v4579_v3, %v1060_v60  ;;  %v5589_v57 = vld [vmem:[#allocation22_spill] sm:$0xff] }
 0x1d6   : > { %v1838_v21 = vmul.f32 %v4585_v15, %v1062_v23  ;;  %v1839_v1 = vmul.f32 %v4658_v4, %v1160_v31  ;;  %v1546_v50 = vmul.f32 %v4747_v63, %v4654_v10  ;;  %3365 = vpow2.f32 %v2911_v43  ;;  %v5585_v4 = vld [vmem:[#allocation48_spill] sm:$0xff] }
 0x1d7   : > { %v1837_v9 = vmul.f32 %v4582_v44, %v1158_v48  ;;  %v1533_v42 = vmul.f32 %v4687_v49, %v1532_v34  ;;  %3367 = vpow2.f32 %v2912_v2  ;;  %v2914_v56 = vmul.f32 -1.442695, %v4760_v39 }
 0x1d8   : > { %v1113_v11 = vpop.f32.mrf.mxu2  ;;  %v1866_v45 = vpack.c.bf16 %v1838_v21, %v1836_v28  ;;  %v1509_v6 = vand.u32 2147483647, %v4536_v12  ;;  %v1840_v3 = vmul.f32 %v1808_v33, %v1065_v0  ;;  %v1468_v18 = vsel %vm4722_vm14, %v5585_v4, %v1463_v37  ;;  %v5596_v4 = vld [vmem:[#allocation25_spill] sm:$0xff] }
 0x1d9   : > { %v1162_v22 = vpop.f32.mrf.mxu3  ;;  %v1017_v62 = vpop.f32.mrf.mxu0  ;;  %v4776_v17 = vpack.c.bf16 %v1839_v1, %v1837_v9  ;;  %v1498_v44 = vsel %vm4727_vm15, %v4677_v36, %v1493_v59  ;;  %v1512_v33 = vor.u32 1.1754944e-38, %v1511_v47  ;;  %3369 = vpow2.f32 %v2913_v8  ;;  %v5593_v8 = vld [vmem:[#allocation32_spill] sm:$0xff] }
 0x1da   : > { %v1066_v13 = vpop.f32.mrf.mxu1  ;;  %v1508_v37 = vsel %vm4788_vm2, %v4611_v16, %v1504_v38  ;;  %v1547_v25 = vsub.f32 1.0, %v1546_v50  ;;  %v1163_v55 = vadd.f32 %v1162_v22, %v1113_v11  ;;  %v1518_v58 = vmul.f32 %v4691_v40, %v1517_v30  ;;  %v5592_v30 = vld [vmem:[#allocation23_spill] sm:$0xff] }
 0x1db   : > { %v1067_v54 = vadd.f32 %v1066_v13, %v1017_v62  ;;  %v1534_v51 = vadd.f32 %v4687_v49, %v1533_v42  ;;  %vm1536_vm3 = vweird.f32 %v4687_v49  ;;  %3371 = vpow2.f32 %v2914_v56 }
 0x1dc   : > { %v3366_v47 = vpop.eup %3365  ;;  %v1809_v53 = vmul.f32 %v1468_v18, %v5588_v24  ;;  %v1811_v61 = vmul.f32 %v1498_v44, %v5589_v57  ;;  %v1541_v16 = vand.u32 2147483648, %v4600_v19  ;;  %vm1510_vm4 = vcmp.eq.f32.partialorder %v1509_v6, 8.507059e+37  ;;  %v5600_v44 = vld [vmem:[#allocation31_spill] sm:$0xff] }
 0x1dd   : > { %v1842_v15 = vmul.f32 %v1810_v26, %v1067_v54  ;;  %v3368_v26 = vpop.eup %3367  ;;  %vm1520_vm5 = vweird.f32 %v4605_v14  ;;  %vm1535_vm6 = vweird.f32 %v4600_v19  ;;  %v1539_v43 = vand.u32 2147483647, %v4600_v19 }
 0x1de   : > { %v1513_v48 = vsel %vm1510_vm4, %v1512_v33, %v1508_v37  ;;  %vm4810_vm7 = vmor %vm1535_vm6, %vm1536_vm3  ;;  %v1548_v11 = vmul.f32 %v4747_v63, %v1547_v25  ;;  %v1841_v32 = vmul.f32 %v1809_v53, %v1163_v55  ;;  %v1519_v29 = vadd.f32 %v4691_v40, %v1518_v58  ;;  %v5601_v25 = vld [vmem:[#allocation34_spill] sm:$0xff]  ;;  %v5602_v55 = vld [vmem:[#allocation35_spill] sm:$0xff] }
 0x1df   : > { %v4797_v36 = vpack.c.bf16 %v1842_v15, %v1840_v3  ;;  %v3370_v2 = vpop.eup %3369  ;;  %vm1521_vm8 = vweird.f32 %v4691_v40  ;;  %v1538_v19 = vsel %vm4810_vm7, %v4687_v49, %v1534_v51  ;;  %v4820_v27 = vadd.f32 1.0, %v3366_v47  ;;  %v5603_v47 = vld [vmem:[#allocation33_spill] sm:$0xff] }
 0x1e0   : > { %v1115_v5 = vpop.f32.mrf.mxu2  ;;  %v1524_v31 = vand.u32 2147483647, %v4605_v14  ;;  %v1542_v22 = vor.u32 1.1754944e-38, %v1541_v16  ;;  %v4823_v62 = vadd.f32 1.0, %v3368_v26  ;;  %v1812_v0 = vmul.f32 %v1513_v48, %v5592_v30  ;;  %vm4832_vm10 = vmor %vm1520_vm5, %vm1521_vm8 }
 0x1e1   : > { %v1164_v7 = vpop.f32.mrf.mxu3  ;;  %v1020_v12 = vpop.f32.mrf.mxu0  ;;  %v1526_v13 = vand.u32 2147483648, %v4605_v14  ;;  %vm1540_vm9 = vcmp.eq.f32.partialorder %v1539_v43, 8.507059e+37  ;;  %v2915_v28 = vmul.f32 -1.442695, %v5593_v8  ;;  %v1549_v1 = vadd.f32 %v4747_v63, %v1548_v11  ;;  %v5604_v43 = vld [vmem:[#allocation24_spill] sm:$0xff] }
 0x1e2   : > { %v1165_v52 = vadd.f32 %v1164_v7, %v1115_v5  ;;  %v1069_v60 = vpop.f32.mrf.mxu1  ;;  %v3372_v38 = vpop.eup %3371  ;;  %v1543_v21 = vsel %vm1540_vm9, %v1542_v22, %v1538_v19  ;;  %vm1551_vm11 = vweird.f32 %v4747_v63  ;;  %v4838_v50 = vadd.f32 1.0, %v3370_v2 }
 0x1e3   : > { %v1523_v9 = vsel %vm4832_vm10, %v4691_v40, %v1519_v29  ;;  %v1556_v54 = vand.u32 2147483648, %v4654_v10  ;;  %3373 = vrcp.f32 %v4820_v27  ;;  %2117 = vmatmul.bf16.gmra.mxu0 %v1866_v45  ;;  %2215 = vmatmul.bf16.gmra.mxu2 %v1866_v45  ;;  %v1070_v14 = vadd.f32 %v1069_v60, %v1020_v12 }
 0x1e4   : > { %v1843_v34 = vmul.f32 %v1811_v61, %v1165_v52  ;;  %vm1550_vm12 = vweird.f32 %v4654_v10  ;;  %v1554_v6 = vand.u32 2147483647, %v4654_v10  ;;  %3375 = vrcp.f32 %v4823_v62  ;;  %2166 = vmatmul.bf16.gmra.mxu1 %v4776_v17  ;;  %v5599_v10 = vld [vmem:[#allocation30_spill] sm:$0xff] }
 0x1e5   : > { %v4848_v3 = vadd.f32 1.0, %v3372_v38  ;;  %2264 = vmatmul.bf16.gmra.mxu3 %v4776_v17  ;;  %v1814_v18 = vmul.f32 %v1543_v21, %v5596_v4  ;;  %vm4855_vm13 = vmor %vm1550_vm12, %vm1551_vm11  ;;  %3377 = vpow2.f32 %v2915_v28  ;;  %v4861_v41 = vadd.f32 %v5600_v44, %v5599_v10 }
 0x1e6   : > { %v4825_v59 = vpack.c.bf16 %v1843_v34, %v1841_v32  ;;  %v1527_v37 = vor.u32 1.1754944e-38, %v1526_v13  ;;  %v1553_v17 = vsel %vm4855_vm13, %v4747_v63, %v1549_v1  ;;  %3379 = vrcp.f32 %v4838_v50  ;;  %v5605_v34 = vld [vmem:[#allocation26_spill] sm:$0xff] }
 0x1e7   : > { %v4869_v5 = vadd.f32 %v5602_v55, %v5601_v25  ;;  %vm1525_vm14 = vcmp.eq.f32.partialorder %v1524_v31, 8.507059e+37  ;;  %v1557_v58 = vor.u32 1.1754944e-38, %v1556_v54  ;;  %v1844_v51 = vmul.f32 %v1812_v0, %v1070_v14 }
 0x1e8   : > { %v1118_v42 = vpop.f32.mrf.mxu2  ;;  %v1528_v12 = vsel %vm1525_vm14, %v1527_v37, %v1523_v9  ;;  %vm1555_vm15 = vcmp.eq.f32.partialorder %v1554_v6, 8.507059e+37  ;;  %3381 = vrcp.f32 %v4848_v3  ;;  %v2916_v24 = vmul.f32 -1.442695, %v5603_v47  ;;  %v5607_v37 = vld [vmem:[#allocation37_spill] sm:$0xff] }
 0x1e9   : > { %v1167_v56 = vpop.f32.mrf.mxu3  ;;  %v1022_v40 = vpop.f32.mrf.mxu0  ;;  %v1558_v57 = vsel %vm1555_vm15, %v1557_v58, %v1553_v17  ;;  %v2917_v63 = vmul.f32 -1.442695, %v4861_v41  ;;  %v2918_v52 = vmul.f32 -1.442695, %v4869_v5  ;;  %v1813_v48 = vmul.f32 %v1528_v12, %v5604_v43 }
 0x1ea   : > { %v1071_v15 = vpop.f32.mrf.mxu1  ;;  %v4873_v53 = vpop.eup %3373  ;;  %v1168_v60 = vadd.f32 %v1167_v56, %v1118_v42  ;;  %v1815_v2 = vmul.f32 %v1558_v57, %v5605_v34  ;;  %3383 = vpow2.f32 %v2916_v24  ;;  %v1569_v56 = vand.u32 2147483647, %v4820_v27 }
 0x1eb   : > { %v1072_v33 = vadd.f32 %v1071_v15, %v1022_v40  ;;  %v4878_v16 = vpop.eup %3375  ;;  %v1561_v29 = vmul.f32 %v4873_v53, %v4820_v27  ;;  %3385 = vpow2.f32 %v2917_v63  ;;  %vm1565_vm0 = vweird.f32 %v4820_v27 }
 0x1ec   : > { %v3378_v26 = vpop.eup %3377  ;;  %v1576_v31 = vmul.f32 %v4878_v16, %v4823_v62  ;;  %3387 = vpow2.f32 %v2918_v52  ;;  %v1845_v38 = vmul.f32 %v1813_v48, %v1168_v60  ;;  %v1571_v45 = vand.u32 2147483648, %v4820_v27  ;;  %v5612_v60 = vld [vmem:[#allocation40_spill] sm:$0xff] }
 0x1ed   : > { %v1846_v7 = vmul.f32 %v1814_v18, %v1072_v33  ;;  %v4882_v32 = vpop.eup %3379  ;;  %v4897_v49 = vadd.f32 1.0, %v3378_v26  ;;  %v1562_v21 = vsub.f32 1.0, %v1561_v29  ;;  %vm1580_vm1 = vweird.f32 %v4823_v62  ;;  %v5606_v33 = vld [vmem:[#allocation36_spill] sm:$0xff] }
 0x1ee   : > { %v4889_v22 = vpop.eup %3381  ;;  %v1591_v28 = vmul.f32 %v4882_v32, %v4838_v50  ;;  %v1577_v9 = vsub.f32 1.0, %v1576_v31  ;;  %v4922_v17 = vadd.f32 %v5607_v37, %v5606_v33  ;;  %v1584_v25 = vand.u32 2147483647, %v4823_v62 }
 0x1ef   : > { %v4876_v61 = vpack.c.bf16 %v1846_v7, %v1844_v51  ;;  %v1606_v54 = vmul.f32 %v4889_v22, %v4848_v3  ;;  %3389 = vrcp.f32 %v4897_v49  ;;  %v1563_v18 = vmul.f32 %v4873_v53, %v1562_v21  ;;  %v5608_v51 = vld [vmem:[#allocation38_spill] sm:$0xff]  ;;  %v5609_v7 = vld [vmem:[#allocation39_spill] sm:$0xff] }
 0x1f0   : > { %v1120_v23 = vpop.f32.mrf.mxu2  ;;  %v3384_v14 = vpop.eup %3383  ;;  %v1592_v6 = vsub.f32 1.0, %v1591_v28  ;;  %v1578_v10 = vmul.f32 %v4878_v16, %v1577_v9  ;;  %v1586_v55 = vand.u32 2147483648, %v4823_v62  ;;  %v4930_v12 = vadd.f32 %v5609_v7, %v5608_v51  ;;  %v5615_v28 = vld [vmem:[#allocation43_spill] sm:$0xff] }
 0x1f1   : > { %v1169_v11 = vpop.f32.mrf.mxu3  ;;  %v4891_v0 = vpop.f32.mrf.mxu0  ;;  %v4918_v44 = vadd.f32 1.0, %v3384_v14  ;;  %vm4932_vm2 = vcmp.eq.f32.partialorder %v1569_v56, 8.507059e+37  ;;  %vm1595_vm3 = vweird.f32 %v4838_v50  ;;  %v1599_v57 = vand.u32 2147483647, %v4838_v50 }
 0x1f2   : > { %v1170_v19 = vadd.f32 %v1169_v11, %v1120_v23  ;;  %v4893_v13 = vpop.f32.mrf.mxu1  ;;  %v3386_v42 = vpop.eup %3385  ;;  %v1593_v24 = vmul.f32 %v4882_v32, %v1592_v6  ;;  %v1564_v52 = vadd.f32 %v4873_v53, %v1563_v18  ;;  %vm1566_vm4 = vweird.f32 %v4873_v53 }
 0x1f3   : > { %2122 = vmatmul.bf16.gmra.mxu0 %v4797_v36  ;;  %2220 = vmatmul.bf16.gmra.mxu2 %v4797_v36  ;;  %v3388_v4 = vpop.eup %3387  ;;  %v1607_v36 = vsub.f32 1.0, %v1606_v54  ;;  %v4926_v58 = vadd.f32 1.0, %v3386_v42  ;;  %vm1581_vm5 = vweird.f32 %v4878_v16  ;;  %v2919_v26 = vmul.f32 -1.442695, %v5612_v60  ;;  %vm4961_vm6 = vmor %vm1565_vm0, %vm1566_vm4 }
 0x1f4   : > { %v1847_v30 = vmul.f32 %v1815_v2, %v1170_v19  ;;  %2171 = vmatmul.bf16.gmra.mxu1 %v4825_v59  ;;  %v4939_v63 = vadd.f32 1.0, %v3388_v4  ;;  %v1579_v11 = vadd.f32 %v4878_v16, %v1578_v10  ;;  %3391 = vrcp.f32 %v4918_v44  ;;  %vm4977_vm8 = vmor %vm1580_vm1, %vm1581_vm5 }
 0x1f5   : > { %2269 = vmatmul.bf16.gmra.mxu3 %v4825_v59  ;;  %v4949_v23 = vpop.eup %3389  ;;  %v1608_v34 = vmul.f32 %v4889_v22, %v1607_v36  ;;  %v2921_v2 = vmul.f32 -1.442695, %v4922_v17  ;;  %v1601_v29 = vand.u32 2147483648, %v4838_v50  ;;  %v1614_v19 = vand.u32 2147483647, %v4848_v3 }
 0x1f6   : > { %v4899_v1 = vpack.c.bf16 %v1847_v30, %v1845_v38  ;;  %3393 = vrcp.f32 %v4926_v58  ;;  %v2922_v31 = vmul.f32 -1.442695, %v4930_v12  ;;  %v1594_v30 = vadd.f32 %v4882_v32, %v1593_v24 }
 0x1f7   : > { %vm1596_vm7 = vweird.f32 %v4882_v32  ;;  %3395 = vrcp.f32 %v4939_v63  ;;  %v2920_v21 = vmul.f32 -1.442695, %v5615_v28  ;;  %vm1611_vm9 = vweird.f32 %v4889_v22 }
 0x1f8   : > { %v4907_v40 = vpop.f32.mrf.mxu2  ;;  %v1616_v14 = vand.u32 2147483648, %v4848_v3  ;;  %v1621_v42 = vmul.f32 %v4949_v23, %v4897_v49  ;;  %3397 = vpow2.f32 %v2919_v26  ;;  %v1568_v56 = vsel %vm4961_vm6, %v4873_v53, %v1564_v52  ;;  %vm4996_vm11 = vmor %vm1595_vm3, %vm1596_vm7 }
 0x1f9   : > { %v4909_v15 = vpop.f32.mrf.mxu3  ;;  %v4945_v43 = vpop.f32.mrf.mxu0  ;;  %v1583_v62 = vsel %vm4977_vm8, %v4878_v16, %v1579_v11  ;;  %v1609_v6 = vadd.f32 %v4889_v22, %v1608_v34  ;;  %3399 = vpow2.f32 %v2921_v2  ;;  %v1572_v4 = vor.u32 1.1754944e-38, %v1571_v45 }
 0x1fa   : > { %v4947_v48 = vpop.f32.mrf.mxu1  ;;  %vm1585_vm10 = vcmp.eq.f32.partialorder %v1584_v25, 8.507059e+37  ;;  %v1587_v18 = vor.u32 1.1754944e-38, %v1586_v55  ;;  %3401 = vpow2.f32 %v2922_v31  ;;  %v5000_v53 = vpop.eup %3391  ;;  %v1598_v16 = vsel %vm4996_vm11, %v4882_v32, %v1594_v30 }
 0x1fb   : > { %vm1610_vm12 = vweird.f32 %v4848_v3  ;;  %v1631_v45 = vand.u32 2147483648, %v4897_v49  ;;  %3403 = vpow2.f32 %v2920_v21  ;;  %v1573_v50 = vsel %vm4932_vm2, %v1572_v4, %v1568_v56  ;;  %v5624_v56 = vld [vmem:[#allocation41_spill] sm:$0xff] }
 0x1fc   : > { %v5007_v36 = vpop.eup %3393  ;;  %v1588_v33 = vsel %vm1585_vm10, %v1587_v18, %v1583_v62  ;;  %v1602_v37 = vor.u32 1.1754944e-38, %v1601_v29  ;;  %vm5013_vm13 = vmor %vm1610_vm12, %vm1611_vm9  ;;  %v1622_v55 = vsub.f32 1.0, %v1621_v42  ;;  %vm1600_vm14 = vcmp.eq.f32.partialorder %v1599_v57, 8.507059e+37  ;;  %v5625_v62 = vld [vmem:[#allocation42_spill] sm:$0xff] }
 0x1fd   : > { %v5017_v32 = vpop.eup %3395  ;;  %v1613_v3 = vsel %vm5013_vm13, %v4889_v22, %v1609_v6  ;;  %vm5022_vm15 = vcmp.eq.f32.partialorder %v1614_v19, 8.507059e+37  ;;  %v1617_v7 = vor.u32 1.1754944e-38, %v1616_v14  ;;  %vm1625_vm0 = vweird.f32 %v4897_v49 }
 0x1fe   : > { %v3398_v59 = vpop.eup %3397  ;;  %v1603_v24 = vsel %vm1600_vm14, %v1602_v37, %v1598_v16  ;;  %v1629_v52 = vand.u32 2147483647, %v4897_v49  ;;  %v1636_v26 = vmul.f32 %v5000_v53, %v4918_v44  ;;  %v1816_v22 = vmul.f32 %v1573_v50, %v4169_v46  ;;  %v5626_v16 = vld [vmem:[#allocation44_spill] sm:$0xff] }
 0x1ff   : > { %v3400_v34 = vpop.eup %3399  ;;  %v1817_v2 = vmul.f32 %v1588_v33, %v5582_v35  ;;  %v5036_v29 = vor.u32 1.1754944e-38, %v1631_v45  ;;  %v1651_v19 = vmul.f32 %v5007_v36, %v4926_v58  ;;  %v1618_v21 = vsel %vm5022_vm15, %v1617_v7, %v1613_v3  ;;  %v5627_v45 = vld [vmem:[#allocation45_spill] sm:$0xff] }
 0x200   : > { %v4969_v9 = vpop.f32.mrf.mxu2  ;;  %v3402_v30 = vpop.eup %3401  ;;  %v1623_v46 = vmul.f32 %v4949_v23, %v1622_v55  ;;  %vm1626_vm1 = vweird.f32 %v4949_v23  ;;  %v1666_v35 = vmul.f32 %v5017_v32, %v4939_v63  ;;  %v1818_v27 = vmul.f32 %v1603_v24, %v4737_v20 }
 0x201   : > { %v4971_v54 = vpop.f32.mrf.mxu3  ;;  %v5030_v11 = vpop.f32.mrf.mxu0  ;;  %v1644_v14 = vand.u32 2147483647, %v4918_v44  ;;  %v5056_v42 = vadd.f32 1.0, %v3398_v59  ;;  %v5060_v6 = vadd.f32 %v5625_v62, %v5624_v56  ;;  %v1637_v4 = vsub.f32 1.0, %v1636_v26  ;;  %vm5097_vm3 = vmor %vm1625_vm0, %vm1626_vm1 }
 0x202   : > { %v5032_v57 = vpop.f32.mrf.mxu1  ;;  %v1646_v18 = vand.u32 2147483648, %v4918_v44  ;;  %v5063_v10 = vadd.f32 1.0, %v3400_v34  ;;  %v5067_v50 = vadd.f32 %v5627_v45, %v5626_v16  ;;  %v1652_v20 = vsub.f32 1.0, %v1651_v19 }
 0x203   : > { %2127 = vmatmul.bf16.gmra.mxu0 %v4876_v61  ;;  %2225 = vmatmul.bf16.gmra.mxu2 %v4876_v61  ;;  %v3404_v61 = vpop.eup %3403  ;;  %v5070_v33 = vadd.f32 1.0, %v3402_v30  ;;  %v1077_v37 = vadd.f32 %v4947_v48, %v4945_v43  ;;  %v1624_v25 = vadd.f32 %v4949_v23, %v1623_v46  ;;  %vm1640_vm2 = vweird.f32 %v4918_v44 }
 0x204   : > { %2176 = vmatmul.bf16.gmra.mxu1 %v4899_v1  ;;  %v1667_v55 = vsub.f32 1.0, %v1666_v35  ;;  %v5076_v3 = vadd.f32 1.0, %v3404_v61  ;;  %v1175_v51 = vadd.f32 %v4971_v54, %v4969_v9  ;;  %v1659_v7 = vand.u32 2147483647, %v4926_v58  ;;  %v5628_v54 = vld [vmem:[#allocation46_spill] sm:$0xff] }
 0x205   : > { %2274 = vmatmul.bf16.gmra.mxu3 %v4899_v1  ;;  %v1819_v1 = vmul.f32 %v1618_v21, %v4760_v39  ;;  %3405 = vrcp.f32 %v5056_v42  ;;  %v2925_v39 = vmul.f32 -1.442695, %v5060_v6  ;;  %v1075_v59 = vadd.f32 %v4893_v13, %v4891_v0 }
 0x206   : > { %v1638_v43 = vmul.f32 %v5000_v53, %v1637_v4  ;;  %3407 = vrcp.f32 %v5063_v10  ;;  %v2926_v48 = vmul.f32 -1.442695, %v5067_v50  ;;  %v1173_v24 = vadd.f32 %v4909_v15, %v4907_v40  ;;  %v5631_v40 = vld [vmem:[#allocation47_spill] sm:$0xff] }
 0x207   : > { %v1653_v9 = vmul.f32 %v5007_v36, %v1652_v20  ;;  %3409 = vrcp.f32 %v5070_v33  ;;  %v2923_v26 = vmul.f32 -1.442695, %v5628_v54  ;;  %v1850_v34 = vmul.f32 %v1818_v27, %v1077_v37 }
 0x208   : > { %v5042_v31 = vpop.f32.mrf.mxu2  ;;  %v1668_v13 = vmul.f32 %v5017_v32, %v1667_v55  ;;  %3411 = vrcp.f32 %v5076_v3  ;;  %v2924_v15 = vmul.f32 -1.442695, %v5631_v40  ;;  %v1851_v19 = vmul.f32 %v1819_v1, %v1175_v51 }
 0x209   : > { %v5044_v38 = vpop.f32.mrf.mxu3  ;;  %v5104_v30 = vpop.f32.mrf.mxu0  ;;  %v1628_v46 = vsel %vm5097_vm3, %v4949_v23, %v1624_v25  ;;  %v1661_v35 = vand.u32 2147483648, %v4926_v58  ;;  %3413 = vpow2.f32 %v2925_v39  ;;  %v1848_v61 = vmul.f32 %v1816_v22, %v1075_v59 }
 0x20a   : > { %v1081_v21 = vpop.f32.mrf.mxu1  ;;  %vm1641_vm4 = vweird.f32 %v5000_v53  ;;  %vm1656_vm5 = vweird.f32 %v5007_v36  ;;  %3415 = vpow2.f32 %v2926_v48  ;;  %v1849_v62 = vmul.f32 %v1817_v2, %v1173_v24 }
 0x20b   : > { %v5114_v4 = vpop.eup %3405  ;;  %v1639_v16 = vadd.f32 %v5000_v53, %v1638_v43  ;;  %v1654_v45 = vadd.f32 %v5007_v36, %v1653_v9  ;;  %3417 = vpow2.f32 %v2923_v26  ;;  %v1872_v23 = vpack.c.bf16 %v1850_v34, %v1848_v61  ;;  %vm5130_vm8 = vmor %vm1640_vm2, %vm1641_vm4 }
 0x20c   : > { %v5118_v1 = vpop.eup %3407  ;;  %v1669_v22 = vadd.f32 %v5017_v32, %v1668_v13  ;;  %vm1671_vm6 = vweird.f32 %v5017_v32  ;;  %3419 = vpow2.f32 %v2924_v15  ;;  %v1873_v20 = vpack.c.bf16 %v1851_v19, %v1849_v62 }
 0x20d   : > { %v5122_v37 = vpop.eup %3409  ;;  %vm1630_vm7 = vcmp.eq.f32.partialorder %v1629_v52, 8.507059e+37  ;;  %vm1655_vm9 = vweird.f32 %v4926_v58  ;;  %v1674_v25 = vand.u32 2147483647, %v4939_v63  ;;  %v1676_v55 = vand.u32 2147483648, %v4939_v63 }
 0x20e   : > { %v5137_v51 = vpop.eup %3411  ;;  %v1633_v39 = vsel %vm1630_vm7, %v5036_v29, %v1628_v46  ;;  %vm5142_vm10 = vcmp.eq.f32.partialorder %v1644_v14, 8.507059e+37  ;;  %vm5148_vm11 = vmor %vm1655_vm9, %vm1656_vm5  ;;  %vm1670_vm12 = vweird.f32 %v4939_v63  ;;  %v1643_v59 = vsel %vm5130_vm8, %v5000_v53, %v1639_v16 }
 0x20f   : > { %v3414_v58 = vpop.eup %3413  ;;  %v1647_v29 = vor.u32 1.1754944e-38, %v1646_v18  ;;  %v1658_v14 = vsel %vm5148_vm11, %v5007_v36, %v1654_v45  ;;  %vm5163_vm13 = vmor %vm1670_vm12, %vm1671_vm6  ;;  %v1711_v63 = vmul.f32 %v5118_v1, %v5063_v10  ;;  %vm1660_vm14 = vcmp.eq.f32.partialorder %v1659_v7, 8.507059e+37 }
 0x210   : > { %v5110_v27 = vpop.f32.mrf.mxu2  ;;  %v3416_v48 = vpop.eup %3415  ;;  %v1662_v53 = vor.u32 1.1754944e-38, %v1661_v35  ;;  %v1673_v44 = vsel %vm5163_vm13, %v5017_v32, %v1669_v22  ;;  %v1726_v36 = vmul.f32 %v5122_v37, %v5070_v33  ;;  %v1820_v24 = vmul.f32 %v1633_v39, %v5593_v8 }
 0x211   : > { %v1179_v56 = vpop.f32.mrf.mxu3  ;;  %v3418_v18 = vpop.eup %3417  ;;  %vm1675_vm15 = vcmp.eq.f32.partialorder %v1674_v25, 8.507059e+37  ;;  %v1677_v9 = vor.u32 1.1754944e-38, %v1676_v55  ;;  %v1681_v26 = vmul.f32 %v5114_v4, %v5056_v42  ;;  %v1648_v7 = vsel %vm5142_vm10, %v1647_v29, %v1643_v59 }
 0x212   : > { %v3420_v34 = vpop.eup %3419  ;;  %v1663_v0 = vsel %vm1660_vm14, %v1662_v53, %v1658_v14  ;;  %v1696_v32 = vmul.f32 %v5137_v51, %v5076_v3  ;;  %v5181_v13 = vadd.f32 1.0, %v3414_v58  ;;  %v5183_v15 = vpop.f32.mrf.mxu0  ;;  %v1712_v46 = vsub.f32 1.0, %v1711_v63 }
 0x213   : > { %2132 = vmatmul.bf16.gmra.mxu0 %v1872_v23  ;;  %2230 = vmatmul.bf16.gmra.mxu2 %v1872_v23  ;;  %v5185_v19 = vpop.f32.mrf.mxu1  ;;  %v1678_v8 = vsel %vm1675_vm15, %v1677_v9, %v1673_v44  ;;  %v5187_v35 = vadd.f32 1.0, %v3416_v48  ;;  %v1082_v61 = vadd.f32 %v1081_v21, %v5104_v30  ;;  %v1691_v45 = vand.u32 2147483648, %v5056_v42 }
 0x214   : > { %2181 = vmatmul.bf16.gmra.mxu1 %v1873_v20  ;;  %v1727_v23 = vsub.f32 1.0, %v1726_v36  ;;  %v5195_v22 = vadd.f32 1.0, %v3418_v18  ;;  %v1822_v2 = vmul.f32 %v1663_v0, %v4861_v41  ;;  %v1682_v25 = vsub.f32 1.0, %v1681_v26 }
 0x215   : > { %2279 = vmatmul.bf16.gmra.mxu3 %v1873_v20  ;;  %v1180_v20 = vadd.f32 %v1179_v56, %v5110_v27  ;;  %v5199_v55 = vadd.f32 1.0, %v3420_v34  ;;  %v1080_v39 = vadd.f32 %v5032_v57, %v5030_v11  ;;  %v1823_v30 = vmul.f32 %v1678_v8, %v4869_v5 }
 0x216   : > { %v1697_v21 = vsub.f32 1.0, %v1696_v32  ;;  %3421 = vrcp.f32 %v5181_v13  ;;  %v1178_v49 = vadd.f32 %v5044_v38, %v5042_v31  ;;  %v1689_v52 = vand.u32 2147483647, %v5056_v42 }
 0x217   : > { %v1713_v27 = vmul.f32 %v5118_v1, %v1712_v46  ;;  %3423 = vrcp.f32 %v5187_v35  ;;  %v1854_v41 = vmul.f32 %v1822_v2, %v1082_v61  ;;  %v1821_v56 = vmul.f32 %v1648_v7, %v5603_v47 }
 0x218   : > { %v5190_v62 = vpop.f32.mrf.mxu2  ;;  %v1728_v58 = vmul.f32 %v5122_v37, %v1727_v23  ;;  %3425 = vrcp.f32 %v5195_v22  ;;  %v1855_v5 = vmul.f32 %v1823_v30, %v1180_v20  ;;  %v1683_v11 = vmul.f32 %v5114_v4, %v1682_v25 }
 0x219   : > { %v5192_v16 = vpop.f32.mrf.mxu3  ;;  %3427 = vrcp.f32 %v5199_v55  ;;  %v1852_v57 = vmul.f32 %v1820_v24, %v1080_v39  ;;  %vm1685_vm0 = vweird.f32 %v5056_v42  ;;  %v1692_v31 = vor.u32 1.1754944e-38, %v1691_v45 }
 0x21a   : > { %v1698_v38 = vmul.f32 %v5137_v51, %v1697_v21  ;;  %v1853_v59 = vmul.f32 %v1821_v56, %v1178_v49  ;;  %vm5217_vm1 = vcmp.eq.f32.partialorder %v1689_v52, 8.507059e+37  ;;  %v1714_v47 = vadd.f32 %v5118_v1, %v1713_v27  ;;  %v1037_v44 = vpop.f32.mrf.mxu0 }
 0x21b   : > { %vm1715_vm2 = vweird.f32 %v5063_v10  ;;  %vm1716_vm3 = vweird.f32 %v5118_v1  ;;  %v1874_v14 = vpack.c.bf16 %v1854_v41, %v1852_v57  ;;  %v1721_v63 = vand.u32 2147483648, %v5063_v10  ;;  %v1086_v36 = vpop.f32.mrf.mxu1 }
 0x21c   : > { %v5224_v43 = vpop.eup %3421  ;;  %v1729_v48 = vadd.f32 %v5122_v37, %v1728_v58  ;;  %vm1731_vm4 = vweird.f32 %v5122_v37  ;;  %v1875_v53 = vpack.c.bf16 %v1855_v5, %v1853_v59  ;;  %v1684_v24 = vadd.f32 %v5114_v4, %v1683_v11  ;;  %vm5243_vm7 = vmor %vm1715_vm2, %vm1716_vm3 }
 0x21d   : > { %v5229_v18 = vpop.eup %3423  ;;  %vm1686_vm5 = vweird.f32 %v5114_v4  ;;  %v1719_v9 = vand.u32 2147483647, %v5063_v10  ;;  %v1736_v26 = vand.u32 2147483648, %v5070_v33  ;;  %v1699_v32 = vadd.f32 %v5137_v51, %v1698_v38  ;;  %v1885_v10 = vld [vmem:[#allocation2 + $0x68] sm:$0xff] }
 0x21e   : > { %v5235_v0 = vpop.eup %3425  ;;  %vm1701_vm6 = vweird.f32 %v5137_v51  ;;  %vm1730_vm8 = vweird.f32 %v5070_v33  ;;  %v1734_v46 = vand.u32 2147483647, %v5070_v33  ;;  %vm1700_vm9 = vweird.f32 %v5076_v3  ;;  %vm5268_vm11 = vmor %vm1685_vm0, %vm1686_vm5 }
 0x21f   : > { %v5249_v61 = vpop.eup %3427  ;;  %v1706_v45 = vand.u32 2147483648, %v5076_v3  ;;  %v1718_v23 = vsel %vm5243_vm7, %v5118_v1, %v1714_v47  ;;  %vm5258_vm10 = vmor %vm1730_vm8, %vm1731_vm4  ;;  %v1771_v20 = vmul.f32 %v5224_v43, %v5181_v13  ;;  %v1704_v1 = vand.u32 2147483647, %v5076_v3 }
 0x220   : > { %v1135_v34 = vpop.f32.mrf.mxu2  ;;  %v1722_v2 = vor.u32 1.1754944e-38, %v1721_v63  ;;  %v1733_v25 = vsel %vm5258_vm10, %v5122_v37, %v1729_v48  ;;  %v1786_v39 = vmul.f32 %v5229_v18, %v5187_v35  ;;  %v1688_v42 = vsel %vm5268_vm11, %v5114_v4, %v1684_v24  ;;  %vm5285_vm12 = vmor %vm1700_vm9, %vm1701_vm6 }
 0x221   : > { %v1184_v7 = vpop.f32.mrf.mxu3  ;;  %vm1720_vm13 = vcmp.eq.f32.partialorder %v1719_v9, 8.507059e+37  ;;  %v1737_v21 = vor.u32 1.1754944e-38, %v1736_v26  ;;  %v1741_v37 = vmul.f32 %v5235_v0, %v5195_v22  ;;  %v1703_v49 = vsel %vm5285_vm12, %v5137_v51, %v1699_v32 }
 0x222   : > { %v1723_v52 = vsel %vm1720_vm13, %v1722_v2, %v1718_v23  ;;  %vm1735_vm14 = vcmp.eq.f32.partialorder %v1734_v46, 8.507059e+37  ;;  %v1756_v4 = vmul.f32 %v5249_v61, %v5199_v55  ;;  %v1707_v27 = vor.u32 1.1754944e-38, %v1706_v45  ;;  %v5304_v48 = vpop.f32.mrf.mxu0 }
 0x223   : > { %2137 = vmatmul.bf16.gmra.mxu0 %v1874_v14  ;;  %2235 = vmatmul.bf16.gmra.mxu2 %v1874_v14  ;;  %v1738_v3 = vsel %vm1735_vm14, %v1737_v21, %v1733_v25  ;;  %v1772_v41 = vsub.f32 1.0, %v1771_v20  ;;  %v1087_v56 = vadd.f32 %v1086_v36, %v1037_v44  ;;  %v1693_v58 = vsel %vm5217_vm1, %v1692_v31, %v1688_v42  ;;  %v5306_v29 = vpop.f32.mrf.mxu1 }
 0x224   : > { %2186 = vmatmul.bf16.gmra.mxu1 %v1875_v53  ;;  %vm1705_vm15 = vcmp.eq.f32.partialorder %v1704_v1, 8.507059e+37  ;;  %v1787_v5 = vsub.f32 1.0, %v1786_v39  ;;  %v1185_v11 = vadd.f32 %v1184_v7, %v1135_v34  ;;  %v1826_v38 = vmul.f32 %v1723_v52, %v4922_v17 }
 0x225   : > { %2284 = vmatmul.bf16.gmra.mxu3 %v1875_v53  ;;  %v1708_v57 = vsel %vm1705_vm15, %v1707_v27, %v1703_v49  ;;  %v1742_v59 = vsub.f32 1.0, %v1741_v37  ;;  %v1085_v51 = vadd.f32 %v5185_v19, %v5183_v15  ;;  %v1827_v47 = vmul.f32 %v1738_v3, %v4930_v12 }
 0x226   : > { %v1757_v14 = vsub.f32 1.0, %v1756_v4  ;;  %v1183_v63 = vadd.f32 %v5192_v16, %v5190_v62  ;;  %v1824_v31 = vmul.f32 %v1693_v58, %v5612_v60  ;;  %v1773_v53 = vmul.f32 %v5224_v43, %v1772_v41 }
 0x227   : > { %v1858_v44 = vmul.f32 %v1826_v38, %v1087_v56  ;;  %v1825_v15 = vmul.f32 %v1708_v57, %v5615_v28  ;;  %v1788_v12 = vmul.f32 %v5229_v18, %v1787_v5  ;;  %v1859_v19 = vmul.f32 %v1827_v47, %v1185_v11 }
 0x228   : > { %v5310_v17 = vpop.f32.mrf.mxu2  ;;  %v1743_v62 = vmul.f32 %v5235_v0, %v1742_v59  ;;  %v1856_v16 = vmul.f32 %v1824_v31, %v1085_v51  ;;  %vm1745_vm0 = vweird.f32 %v5195_v22  ;;  %v1751_v24 = vand.u32 2147483648, %v5195_v22 }
 0x229   : > { %v5312_v36 = vpop.f32.mrf.mxu3  ;;  %v1758_v60 = vmul.f32 %v5249_v61, %v1757_v14  ;;  %v1857_v9 = vmul.f32 %v1825_v15, %v1183_v63  ;;  %vm1746_vm1 = vweird.f32 %v5235_v0  ;;  %v1774_v26 = vadd.f32 %v5224_v43, %v1773_v53 }
 0x22a   : > { %vm1776_vm2 = vweird.f32 %v5224_v43  ;;  %v1876_v28 = vpack.c.bf16 %v1858_v44, %v1856_v16  ;;  %v1781_v34 = vand.u32 2147483648, %v5181_v13  ;;  %v1789_v7 = vadd.f32 %v5229_v18, %v1788_v12  ;;  %vm5351_vm9 = vmor %vm1745_vm0, %vm1746_vm1  ;;  %v1042_v42 = vpop.f32.mrf.mxu0  ;;  %v1882_v12 = vld [vmem:[#allocation2 + $0xd8] sm:$0xff] }
 0x22b   : > { %vm1791_vm3 = vweird.f32 %v5229_v18  ;;  %v1877_v32 = vpack.c.bf16 %v1859_v19, %v1857_v9  ;;  %v1744_v8 = vadd.f32 %v5235_v0, %v1743_v62  ;;  %vm1775_vm4 = vweird.f32 %v5181_v13  ;;  %v1091_v30 = vpop.f32.mrf.mxu1  ;;  %v1883_v9 = vld [vmem:[#allocation2 + $0x18] sm:$0xff] }
 0x22c   : > { %v1779_v46 = vand.u32 2147483647, %v5181_v13  ;;  %v1796_v45 = vand.u32 2147483648, %v5187_v35  ;;  %v1759_v23 = vadd.f32 %v5249_v61, %v1758_v60  ;;  %vm1761_vm5 = vweird.f32 %v5249_v61  ;;  %vm5332_vm6 = vmor %vm1775_vm4, %vm1776_vm2 }
 0x22d   : > { %vm1790_vm7 = vweird.f32 %v5187_v35  ;;  %v1794_v20 = vand.u32 2147483647, %v5187_v35  ;;  %v1749_v33 = vand.u32 2147483647, %v5195_v22  ;;  %v1766_v1 = vand.u32 2147483648, %v5199_v55 }
 0x22e   : > { %v1778_v13 = vsel %vm5332_vm6, %v5224_v43, %v1774_v26  ;;  %vm5343_vm8 = vmor %vm1790_vm7, %vm1791_vm3  ;;  %vm1760_vm10 = vweird.f32 %v5199_v55  ;;  %v1764_v25 = vand.u32 2147483647, %v5199_v55  ;;  %v1782_v39 = vor.u32 1.1754944e-38, %v1781_v34 }
 0x22f   : > { %v1793_v43 = vsel %vm5343_vm8, %v5229_v18, %v1789_v7  ;;  %v1748_v22 = vsel %vm5351_vm9, %v5235_v0, %v1744_v8  ;;  %vm5365_vm11 = vmor %vm1760_vm10, %vm1761_vm5  ;;  %vm1780_vm12 = vcmp.eq.f32.partialorder %v1779_v46, 8.507059e+37  ;;  %v1797_v55 = vor.u32 1.1754944e-38, %v1796_v45  ;;  %v1884_v7 = vld [vmem:[#allocation2 + $0x50] sm:$0xff] }
 0x230   : > { %v1140_v37 = vpop.f32.mrf.mxu2  ;;  %v1752_v52 = vor.u32 1.1754944e-38, %v1751_v24  ;;  %v1763_v18 = vsel %vm5365_vm11, %v5249_v61, %v1759_v23  ;;  %v1783_v4 = vsel %vm1780_vm12, %v1782_v39, %v1778_v13  ;;  %vm1795_vm13 = vcmp.eq.f32.partialorder %v1794_v20, 8.507059e+37  ;;  %v1886_v13 = vld [vmem:[#allocation2 + $0x30] sm:$0xff] }
 0x231   : > { %v1189_v49 = vpop.f32.mrf.mxu3  ;;  %vm1750_vm14 = vcmp.eq.f32.partialorder %v1749_v33, 8.507059e+37  ;;  %v1767_v27 = vor.u32 1.1754944e-38, %v1766_v1  ;;  %v1798_v0 = vsel %vm1795_vm13, %v1797_v55, %v1793_v43  ;;  %v1092_v3 = vadd.f32 %v1091_v30, %v1042_v42  ;;  %v1887_v42 = vld [vmem:[#allocation2 + $0x48] sm:$0xff]  ;;  %v1888_v55 = vld [vmem:[#allocation2 + $0x80] sm:$0xff] }
 0x232   : > { %v1753_v41 = vsel %vm1750_vm14, %v1752_v52, %v1748_v22  ;;  %vm1765_vm15 = vcmp.eq.f32.partialorder %v1764_v25, 8.507059e+37  ;;  %v1190_v56 = vadd.f32 %v1189_v49, %v1140_v37  ;;  %v1830_v5 = vmul.f32 %v1783_v4, %v5060_v6 }
 0x233   : > { %2142 = vmatmul.bf16.gmra.mxu0 %v1876_v28  ;;  %2240 = vmatmul.bf16.gmra.mxu2 %v1876_v28  ;;  %v1768_v58 = vsel %vm1765_vm15, %v1767_v27, %v1763_v18  ;;  %v1090_v11 = vadd.f32 %v5306_v29, %v5304_v48  ;;  %v1831_v57 = vmul.f32 %v1798_v0, %v5067_v50  ;;  %v1880_v48 = vld [vmem:[#allocation2 + $0xb0] sm:$0xff]  ;;  %v1889_v27 = vld [vmem:[#allocation2 + $0x88] sm:$0xff] }
 0x234   : > { %2191 = vmatmul.bf16.gmra.mxu1 %v1877_v32  ;;  %v1188_v61 = vadd.f32 %v5312_v36, %v5310_v17  ;;  %v1828_v38 = vmul.f32 %v1753_v41, %v5628_v54  ;;  %v1862_v59 = vmul.f32 %v1830_v5, %v1092_v3  ;;  %v1829_v51 = vmul.f32 %v1768_v58, %v5631_v40  ;;  %v1881_v54 = vld [vmem:[#allocation2] sm:$0xff] }
 0x235   : > { %2289 = vmatmul.bf16.gmra.mxu3 %v1877_v32  ;;  %v1863_v47 = vmul.f32 %v1831_v57, %v1190_v56  ;;  %v1890_v56 = vld [vmem:[#allocation2 + $0xe8] sm:$0xff] }
 0x236   : > { %v1860_v14 = vmul.f32 %v1828_v38, %v1090_v11  ;;  %v1861_v63 = vmul.f32 %v1829_v51, %v1188_v61  ;;  %v1891_v38 = vld [vmem:[#allocation2 + $0xb8] sm:$0xff] }
 0x238   : > { %v1878_v31 = vpack.c.bf16 %v1862_v59, %v1860_v14  ;;  %v1879_v53 = vpack.c.bf16 %v1863_v47, %v1861_v63  ;;  %v1892_v14 = vld [vmem:[#allocation2 + $0x60] sm:$0xff] }
 0x243   : > { %2147 = vmatmul.bf16.gmra.mxu0 %v1878_v31  ;;  %2245 = vmatmul.bf16.gmra.mxu2 %v1878_v31 }
 0x244   : > { %2196 = vmatmul.bf16.gmra.mxu1 %v1879_v53 }
 0x245   : > { %2294 = vmatmul.bf16.gmra.mxu3 %v1879_v53 }
 0x250   : > { %v2113_v6 = vpop.f32.mrf.mxu0 }
 0x251   : > { %v2162_v50 = vpop.f32.mrf.mxu1 }
 0x252   : > { %v2163_v29 = vadd.f32 %v2162_v50, %v2113_v6  ;;  %v1893_v50 = vld [vmem:[#allocation2 + $0xf0] sm:$0xff] }
 0x254   : > { %v2300_v44 = vadd.f32 %v2163_v29, %v1880_v48 }
 0x256   : > { %2332 = vst [vmem:[#allocation2 + $0xb0] sm:$0xff] %v2300_v44  ;;  %v2211_v17 = vpop.f32.mrf.mxu2 }
 0x258   : > { %v2260_v36 = vpop.f32.mrf.mxu3  ;;  %v2115_v15 = vpop.f32.mrf.mxu0 }
 0x259   : > { %v2261_v40 = vadd.f32 %v2260_v36, %v2211_v17  ;;  %v2164_v19 = vpop.f32.mrf.mxu1 }
 0x25a   : > { %v2165_v16 = vadd.f32 %v2164_v19, %v2115_v15 }
 0x25b   : > { %v2301_v62 = vadd.f32 %v2261_v40, %v1881_v54  ;;  %v1894_v54 = vld [vmem:[#allocation2 + $0x8] sm:$0xff] }
 0x25c   : > { %v2302_v24 = vadd.f32 %v2165_v16, %v1882_v12 }
 0x25d   : > { %2333 = vst [vmem:[#allocation2] sm:$0xff] %v2301_v62  ;;  %v1895_v62 = vld [vmem:[#allocation2 + $0x78] sm:$0xff] }
 0x25e   : > { %2334 = vst [vmem:[#allocation2 + $0xd8] sm:$0xff] %v2302_v24  ;;  %v2213_v60 = vpop.f32.mrf.mxu2 }
 0x260   : > { %v2262_v26 = vpop.f32.mrf.mxu3  ;;  %v2118_v28 = vpop.f32.mrf.mxu0 }
 0x261   : > { %v2263_v34 = vadd.f32 %v2262_v26, %v2213_v60  ;;  %v2167_v32 = vpop.f32.mrf.mxu1 }
 0x262   : > { %v2168_v46 = vadd.f32 %v2167_v32, %v2118_v28 }
 0x263   : > { %v2303_v8 = vadd.f32 %v2263_v34, %v1883_v9  ;;  %v1896_v9 = vld [vmem:[#allocation2 + $0x38] sm:$0xff] }
 0x264   : > { %v2304_v45 = vadd.f32 %v2168_v46, %v1884_v7 }
 0x265   : > { %2335 = vst [vmem:[#allocation2 + $0x18] sm:$0xff] %v2303_v8  ;;  %v1897_v8 = vld [vmem:[#allocation2 + $0x58] sm:$0xff] }
 0x266   : > { %2336 = vst [vmem:[#allocation2 + $0x50] sm:$0xff] %v2304_v45  ;;  %v2216_v23 = vpop.f32.mrf.mxu2 }
 0x268   : > { %v2265_v20 = vpop.f32.mrf.mxu3  ;;  %v2120_v33 = vpop.f32.mrf.mxu0 }
 0x269   : > { %v2266_v1 = vadd.f32 %v2265_v20, %v2216_v23  ;;  %v2169_v2 = vpop.f32.mrf.mxu1 }
 0x26a   : > { %v2170_v25 = vadd.f32 %v2169_v2, %v2120_v33 }
 0x26b   : > { %v2305_v35 = vadd.f32 %v2266_v1, %v1885_v10  ;;  %v1898_v10 = vld [vmem:[#allocation2 + $0x40] sm:$0xff] }
 0x26c   : > { %v2306_v39 = vadd.f32 %v2170_v25, %v1886_v13 }
 0x26d   : > { %2337 = vst [vmem:[#allocation2 + $0x68] sm:$0xff] %v2305_v35  ;;  %v1899_v35 = vld [vmem:[#allocation2 + $0xc8] sm:$0xff] }
 0x26e   : > { %2338 = vst [vmem:[#allocation2 + $0x30] sm:$0xff] %v2306_v39  ;;  %v2218_v43 = vpop.f32.mrf.mxu2 }
 0x270   : > { %v2267_v30 = vpop.f32.mrf.mxu3  ;;  %v2123_v22 = vpop.f32.mrf.mxu0 }
 0x271   : > { %v2268_v21 = vadd.f32 %v2267_v30, %v2218_v43  ;;  %v2172_v37 = vpop.f32.mrf.mxu1 }
 0x272   : > { %v2173_v52 = vadd.f32 %v2172_v37, %v2123_v22 }
 0x273   : > { %v2307_v49 = vadd.f32 %v2268_v21, %v1887_v42  ;;  %v1900_v42 = vld [vmem:[#allocation2 + $0xe0] sm:$0xff] }
 0x274   : > { %v2308_v18 = vadd.f32 %v2173_v52, %v1888_v55 }
 0x275   : > { %2339 = vst [vmem:[#allocation2 + $0x48] sm:$0xff] %v2307_v49  ;;  %v1901_v49 = vld [vmem:[#allocation2 + $0x90] sm:$0xff] }
 0x276   : > { %2340 = vst [vmem:[#allocation2 + $0x80] sm:$0xff] %v2308_v18  ;;  %v2221_v4 = vpop.f32.mrf.mxu2 }
 0x278   : > { %v2270_v0 = vpop.f32.mrf.mxu3  ;;  %v2125_v3 = vpop.f32.mrf.mxu0 }
 0x279   : > { %v2271_v41 = vadd.f32 %v2270_v0, %v2221_v4  ;;  %v2174_v58 = vpop.f32.mrf.mxu1 }
 0x27a   : > { %v2175_v11 = vadd.f32 %v2174_v58, %v2125_v3 }
 0x27b   : > { %v2309_v5 = vadd.f32 %v2271_v41, %v1889_v27  ;;  %v1902_v27 = vld [vmem:[#allocation2 + $0x70] sm:$0xff] }
 0x27c   : > { %v2310_v57 = vadd.f32 %v2175_v11, %v1890_v56 }
 0x27d   : > { %2341 = vst [vmem:[#allocation2 + $0x88] sm:$0xff] %v2309_v5  ;;  %v1903_v5 = vld [vmem:[#allocation2 + $0xc0] sm:$0xff] }
 0x27e   : > { %2342 = vst [vmem:[#allocation2 + $0xe8] sm:$0xff] %v2310_v57  ;;  %v2223_v61 = vpop.f32.mrf.mxu2 }
 0x280   : > { %v2272_v59 = vpop.f32.mrf.mxu3  ;;  %v2128_v51 = vpop.f32.mrf.mxu0 }
 0x281   : > { %v2273_v47 = vadd.f32 %v2272_v59, %v2223_v61  ;;  %v2177_v63 = vpop.f32.mrf.mxu1 }
 0x282   : > { %v2178_v53 = vadd.f32 %v2177_v63, %v2128_v51 }
 0x283   : > { %v2311_v31 = vadd.f32 %v2273_v47, %v1891_v38  ;;  %v1904_v38 = vld [vmem:[#allocation2 + $0xa8] sm:$0xff] }
 0x284   : > { %v2312_v6 = vadd.f32 %v2178_v53, %v1892_v14 }
 0x285   : > { %2343 = vst [vmem:[#allocation2 + $0xb8] sm:$0xff] %v2311_v31  ;;  %v1905_v31 = vld [vmem:[#allocation2 + $0xd0] sm:$0xff] }
 0x286   : > { %2344 = vst [vmem:[#allocation2 + $0x60] sm:$0xff] %v2312_v6  ;;  %v2226_v48 = vpop.f32.mrf.mxu2 }
 0x288   : > { %v2275_v29 = vpop.f32.mrf.mxu3  ;;  %v2130_v44 = vpop.f32.mrf.mxu0 }
 0x289   : > { %v2276_v17 = vadd.f32 %v2275_v29, %v2226_v48  ;;  %v2179_v36 = vpop.f32.mrf.mxu1 }
 0x28a   : > { %v2180_v40 = vadd.f32 %v2179_v36, %v2130_v44 }
 0x28b   : > { %v2313_v15 = vadd.f32 %v2276_v17, %v1893_v50  ;;  %v1906_v50 = vld [vmem:[#allocation2 + $0x10] sm:$0xff] }
 0x28c   : > { %v2314_v12 = vadd.f32 %v2180_v40, %v1894_v54 }
 0x28d   : > { %2345 = vst [vmem:[#allocation2 + $0xf0] sm:$0xff] %v2313_v15  ;;  %v1907_v15 = vld [vmem:[#allocation2 + $0x28] sm:$0xff] }
 0x28e   : > { %2346 = vst [vmem:[#allocation2 + $0x8] sm:$0xff] %v2314_v12  ;;  %v2228_v19 = vpop.f32.mrf.mxu2 }
 0x290   : > { %v2277_v16 = vpop.f32.mrf.mxu3  ;;  %v2133_v24 = vpop.f32.mrf.mxu0 }
 0x291   : > { %v2278_v60 = vadd.f32 %v2277_v16, %v2228_v19  ;;  %v2182_v26 = vpop.f32.mrf.mxu1 }
 0x292   : > { %v2183_v34 = vadd.f32 %v2182_v26, %v2133_v24 }
 0x293   : > { %v2315_v28 = vadd.f32 %v2278_v60, %v1895_v62  ;;  %v1908_v62 = vld [vmem:[#allocation2 + $0xa0] sm:$0xff] }
 0x294   : > { %v2316_v7 = vadd.f32 %v2183_v34, %v1896_v9 }
 0x295   : > { %2347 = vst [vmem:[#allocation2 + $0x78] sm:$0xff] %v2315_v28  ;;  %v1909_v28 = vld [vmem:[#allocation2 + $0xf8] sm:$0xff] }
 0x296   : > { %2348 = vst [vmem:[#allocation2 + $0x38] sm:$0xff] %v2316_v7  ;;  %v2231_v32 = vpop.f32.mrf.mxu2 }
 0x298   : > { %v2280_v46 = vpop.f32.mrf.mxu3  ;;  %v2135_v45 = vpop.f32.mrf.mxu0 }
 0x299   : > { %v2281_v23 = vadd.f32 %v2280_v46, %v2231_v32  ;;  %v2184_v20 = vpop.f32.mrf.mxu1 }
 0x29a   : > { %v2185_v1 = vadd.f32 %v2184_v20, %v2135_v45 }
 0x29b   : > { %v2317_v33 = vadd.f32 %v2281_v23, %v1897_v8  ;;  %v1910_v8 = vld [vmem:[#allocation2 + $0x20] sm:$0xff] }
 0x29c   : > { %v2318_v13 = vadd.f32 %v2185_v1, %v1898_v10 }
 0x29d   : > { %2349 = vst [vmem:[#allocation2 + $0x58] sm:$0xff] %v2317_v33  ;;  %v1911_v33 = vld [vmem:[#allocation2 + $0x98] sm:$0xff] }
 0x29e   : > { %2350 = vst [vmem:[#allocation2 + $0x40] sm:$0xff] %v2318_v13  ;;  %v2233_v2 = vpop.f32.mrf.mxu2 }
 0x2a0   : > { %v2282_v25 = vpop.f32.mrf.mxu3  ;;  %v2138_v39 = vpop.f32.mrf.mxu0 }
 0x2a1   : > { %v2283_v43 = vadd.f32 %v2282_v25, %v2233_v2  ;;  %v2187_v30 = vpop.f32.mrf.mxu1 }
 0x2a2   : > { %v2188_v21 = vadd.f32 %v2187_v30, %v2138_v39 }
 0x2a3   : > { %v2319_v22 = vadd.f32 %v2283_v43, %v1899_v35 }
 0x2a4   : > { %v2320_v55 = vadd.f32 %v2188_v21, %v1900_v42 }
 0x2a5   : > { %2351 = vst [vmem:[#allocation2 + $0xc8] sm:$0xff] %v2319_v22 }
 0x2a6   : > { %2352 = vst [vmem:[#allocation2 + $0xe0] sm:$0xff] %v2320_v55  ;;  %v2236_v37 = vpop.f32.mrf.mxu2 }
 0x2a8   : > { %v2285_v52 = vpop.f32.mrf.mxu3  ;;  %v2140_v18 = vpop.f32.mrf.mxu0 }
 0x2a9   : > { %v2286_v4 = vadd.f32 %v2285_v52, %v2236_v37  ;;  %v2189_v0 = vpop.f32.mrf.mxu1 }
 0x2aa   : > { %v2190_v41 = vadd.f32 %v2189_v0, %v2140_v18 }
 0x2ab   : > { %v2321_v3 = vadd.f32 %v2286_v4, %v1901_v49 }
 0x2ac   : > { %v2322_v56 = vadd.f32 %v2190_v41, %v1902_v27 }
 0x2ad   : > { %2353 = vst [vmem:[#allocation2 + $0x90] sm:$0xff] %v2321_v3 }
 0x2ae   : > { %2354 = vst [vmem:[#allocation2 + $0x70] sm:$0xff] %v2322_v56  ;;  %v2238_v58 = vpop.f32.mrf.mxu2 }
 0x2b0   : > { %v2287_v11 = vpop.f32.mrf.mxu3  ;;  %v2143_v57 = vpop.f32.mrf.mxu0 }
 0x2b1   : > { %v2288_v61 = vadd.f32 %v2287_v11, %v2238_v58  ;;  %v2192_v59 = vpop.f32.mrf.mxu1 }
 0x2b2   : > { %v2193_v47 = vadd.f32 %v2192_v59, %v2143_v57 }
 0x2b3   : > { %v2323_v51 = vadd.f32 %v2288_v61, %v1903_v5 }
 0x2b4   : > { %v2324_v14 = vadd.f32 %v2193_v47, %v1904_v38 }
 0x2b5   : > { %2355 = vst [vmem:[#allocation2 + $0xc0] sm:$0xff] %v2323_v51 }
 0x2b6   : > { %2356 = vst [vmem:[#allocation2 + $0xa8] sm:$0xff] %v2324_v14  ;;  %v2241_v63 = vpop.f32.mrf.mxu2 }
 0x2b8   : > { %v2290_v53 = vpop.f32.mrf.mxu3  ;;  %v2145_v6 = vpop.f32.mrf.mxu0 }
 0x2b9   : > { %v2291_v48 = vadd.f32 %v2290_v53, %v2241_v63  ;;  %v2194_v29 = vpop.f32.mrf.mxu1 }
 0x2ba   : > { %v2195_v17 = vadd.f32 %v2194_v29, %v2145_v6 }
 0x2bb   : > { %v2325_v44 = vadd.f32 %v2291_v48, %v1905_v31 }
 0x2bc   : > { %v2326_v54 = vadd.f32 %v2195_v17, %v1906_v50 }
 0x2bd   : > { %2357 = vst [vmem:[#allocation2 + $0xd0] sm:$0xff] %v2325_v44 }
 0x2be   : > { %2358 = vst [vmem:[#allocation2 + $0x10] sm:$0xff] %v2326_v54  ;;  %v2243_v36 = vpop.f32.mrf.mxu2 }
 0x2c0   : > { %v2292_v40 = vpop.f32.mrf.mxu3  ;;  %v2148_v12 = vpop.f32.mrf.mxu0 }
 0x2c1   : > { %v2293_v19 = vadd.f32 %v2292_v40, %v2243_v36  ;;  %v2197_v16 = vpop.f32.mrf.mxu1 }
 0x2c2   : > { %v2198_v60 = vadd.f32 %v2197_v16, %v2148_v12 }
 0x2c3   : > { %v2327_v24 = vadd.f32 %v2293_v19, %v1907_v15 }
 0x2c4   : > { %v2328_v9 = vadd.f32 %v2198_v60, %v1908_v62 }
 0x2c5   : > { %2359 = vst [vmem:[#allocation2 + $0x28] sm:$0xff] %v2327_v24 }
 0x2c6   : > { %2360 = vst [vmem:[#allocation2 + $0xa0] sm:$0xff] %v2328_v9  ;;  %v2246_v26 = vpop.f32.mrf.mxu2 }
 0x2c8   : > { %v2295_v34 = vpop.f32.mrf.mxu3  ;;  %v2150_v32 = vpop.f32.mrf.mxu0 }
 0x2c9   : > { %v2296_v7 = vadd.f32 %v2295_v34, %v2246_v26  ;;  %v2199_v46 = vpop.f32.mrf.mxu1 }
 0x2ca   : > { %v2200_v23 = vadd.f32 %v2199_v46, %v2150_v32 }
 0x2cb   : > { %v2329_v45 = vadd.f32 %v2296_v7, %v1909_v28 }
 0x2cc   : > { %v2330_v10 = vadd.f32 %v2200_v23, %v1910_v8 }
 0x2cd   : > { %2361 = vst [vmem:[#allocation2 + $0xf8] sm:$0xff] %v2329_v45 }
 0x2ce   : > { %2362 = vst [vmem:[#allocation2 + $0x20] sm:$0xff] %v2330_v10  ;;  %v2248_v20 = vpop.f32.mrf.mxu2 }
 0x2d0   : > { %v2297_v1 = vpop.f32.mrf.mxu3 }
 0x2d1   : > { %v2298_v13 = vadd.f32 %v2297_v1, %v2248_v20  ;;  %2367 = sbr.rel (%p3055_p5) target bundleno = 745 (0x2e9), region = 52 }
 0x2d3   : > { %v2331_v2 = vadd.f32 %v2298_v13, %v1911_v33 }
 0x2d5   : > { %2363 = vst [vmem:[#allocation2 + $0x98] sm:$0xff] %v2331_v2 }
 0x2d6   : > { %v2368_v35 = vld [vmem:[#allocation2 + $0xb0] sm:$0xff]  ;;  %v2369_v25 = vld [vmem:[#allocation2] sm:$0xff]  ;;  %v2370_v39 = vld [vmem:[#allocation2 + $0xd8] sm:$0xff] }
 0x2d7   : > { %v2400_v43 = vpack.c.bf16 %v2369_v25, %v2368_v35  ;;  %v2371_v42 = vld [vmem:[#allocation2 + $0x18] sm:$0xff]  ;;  %v2372_v30 = vld [vmem:[#allocation2 + $0x50] sm:$0xff]  ;;  %v2373_v22 = vld [vmem:[#allocation2 + $0x68] sm:$0xff] }
 0x2d8   : > { %v2401_v21 = vpack.c.bf16 %v2371_v42, %v2370_v39  ;;  %v2402_v55 = vpack.c.bf16 %v2373_v22, %v2372_v30  ;;  %v2374_v37 = vld [vmem:[#allocation2 + $0x30] sm:$0xff]  ;;  %v2375_v49 = vld [vmem:[#allocation2 + $0x48] sm:$0xff]  ;;  %v2376_v52 = vld [vmem:[#allocation2 + $0x80] sm:$0xff] }
 0x2d9   : > { %2416 = vst [vmem:[#allocation9] sm:$0xff] %v2400_v43  ;;  %v2403_v18 = vpack.c.bf16 %v2375_v49, %v2374_v37  ;;  %v2377_v4 = vld [vmem:[#allocation2 + $0x88] sm:$0xff]  ;;  %v2379_v0 = vld [vmem:[#allocation2 + $0xb8] sm:$0xff]  ;;  %v2380_v56 = vld [vmem:[#allocation2 + $0x60] sm:$0xff] }
 0x2da   : > { %v2378_v27 = vld [vmem:[#allocation2 + $0xe8] sm:$0xff]  ;;  %2417 = vst [vmem:[#allocation9 + $0x8] sm:$0xff] %v2401_v21  ;;  %v2404_v3 = vpack.c.bf16 %v2377_v4, %v2376_v52  ;;  %v2381_v58 = vld [vmem:[#allocation2 + $0xf0] sm:$0xff]  ;;  %v2383_v57 = vld [vmem:[#allocation2 + $0x78] sm:$0xff] }
 0x2db   : > { %v2405_v41 = vpack.c.bf16 %v2379_v0, %v2378_v27  ;;  %v2382_v5 = vld [vmem:[#allocation2 + $0x8] sm:$0xff]  ;;  %2418 = vst [vmem:[#allocation9 + $0x10] sm:$0xff] %v2402_v55  ;;  %v2406_v11 = vpack.c.bf16 %v2381_v58, %v2380_v56  ;;  %v2384_v61 = vld [vmem:[#allocation2 + $0x38] sm:$0xff]  ;;  %v2386_v51 = vld [vmem:[#allocation2 + $0x40] sm:$0xff] }
 0x2dc   : > { %v2385_v38 = vld [vmem:[#allocation2 + $0x58] sm:$0xff]  ;;  %2419 = vst [vmem:[#allocation9 + $0x18] sm:$0xff] %v2403_v18  ;;  %v2407_v59 = vpack.c.bf16 %v2383_v57, %v2382_v5  ;;  %v2387_v47 = vld [vmem:[#allocation2 + $0xc8] sm:$0xff]  ;;  %v2388_v14 = vld [vmem:[#allocation2 + $0xe0] sm:$0xff] }
 0x2dd   : > { %2420 = vst [vmem:[#allocation9 + $0x20] sm:$0xff] %v2404_v3  ;;  %v2408_v63 = vpack.c.bf16 %v2385_v38, %v2384_v61  ;;  %v2389_v31 = vld [vmem:[#allocation2 + $0x90] sm:$0xff]  ;;  %v2391_v6 = vld [vmem:[#allocation2 + $0xc0] sm:$0xff]  ;;  %v2409_v48 = vpack.c.bf16 %v2387_v47, %v2386_v51  ;;  %v2392_v50 = vld [vmem:[#allocation2 + $0xa8] sm:$0xff] }
 0x2de   : > { %v2390_v53 = vld [vmem:[#allocation2 + $0x70] sm:$0xff]  ;;  %2421 = vst [vmem:[#allocation9 + $0x28] sm:$0xff] %v2405_v41  ;;  %v2410_v44 = vpack.c.bf16 %v2389_v31, %v2388_v14  ;;  %v2395_v54 = vld [vmem:[#allocation2 + $0x28] sm:$0xff]  ;;  %v2396_v15 = vld [vmem:[#allocation2 + $0xa0] sm:$0xff] }
 0x2df   : > { %v2393_v29 = vld [vmem:[#allocation2 + $0xd0] sm:$0xff]  ;;  %2422 = vst [vmem:[#allocation9 + $0x30] sm:$0xff] %v2406_v11  ;;  %v2411_v36 = vpack.c.bf16 %v2391_v6, %v2390_v53  ;;  %v2397_v40 = vld [vmem:[#allocation2 + $0xf8] sm:$0xff]  ;;  %v2398_v19 = vld [vmem:[#allocation2 + $0x20] sm:$0xff] }
 0x2e0   : > { %v2394_v17 = vld [vmem:[#allocation2 + $0x10] sm:$0xff]  ;;  %2423 = vst [vmem:[#allocation9 + $0x38] sm:$0xff] %v2407_v59  ;;  %v2412_v12 = vpack.c.bf16 %v2393_v29, %v2392_v50  ;;  %v2399_v62 = vld [vmem:[#allocation2 + $0x98] sm:$0xff]  ;;  %v2414_v24 = vpack.c.bf16 %v2397_v40, %v2396_v15 }
 0x2e1   : > { %2424 = vst [vmem:[#allocation9 + $0x40] sm:$0xff] %v2408_v63  ;;  %v2413_v16 = vpack.c.bf16 %v2395_v54, %v2394_v17  ;;  %v2415_v60 = vpack.c.bf16 %v2399_v62, %v2398_v19 }
 0x2e2   : > { %2425 = vst [vmem:[#allocation9 + $0x48] sm:$0xff] %v2409_v48 }
 0x2e3   : > { %2426 = vst [vmem:[#allocation9 + $0x50] sm:$0xff] %v2410_v44 }
 0x2e4   : > { %2427 = vst [vmem:[#allocation9 + $0x58] sm:$0xff] %v2411_v36 }
 0x2e5   : > { %2428 = vst [vmem:[#allocation9 + $0x60] sm:$0xff] %v2412_v12 }
 0x2e6   : > { %2429 = vst [vmem:[#allocation9 + $0x68] sm:$0xff] %v2413_v16 }
 0x2e7   : > { %2430 = vst [vmem:[#allocation9 + $0x70] sm:$0xff] %v2414_v24 }
 0x2e8   : > { %2431 = vst [vmem:[#allocation9 + $0x78] sm:$0xff] %v2415_v60 }
 0x2e9 PF: > { %p5658_p4 = scmp.ne.s32.totalorder %s5499_s8, 0 }
 0x2ea   : > { %s3056_s14 = sshll.u32 (%p5658_p4), %s3653_s19, 4 }
 0x2eb   : > { %2434 = sbr.rel (!%p5658_p4) target bundleno = 784 (0x310), region = 56  ;;  %s2436_s18 = ssub.s32 (%p5658_p4), 25, %s3056_s14 }
 0x2ec   : > { %p2437_p6 = scmp.lt.s32.totalorder (%p5658_p4), %s2436_s18, 16 }
 0x2f0   : > { %s5682_s18 = smov (!%p2437_p6, %s2436_s18), 16 }
 0x2f1   : > { %s3184_s23 = sshll.u32 %s5682_s18, 3 }
 0x2f2   : > { %s2441_s28 = ssub.s32 128, %s3184_s23 }
 0x2f3   : > { %s2442_s7 = sshll.u32 %s2441_s28, 4 }
 0x2f4   : > { %2443 = vsyncadd [#allocation5], %s2442_s7  ;;  %p5387_p10 = scmp.ne.s32.totalorder %s3184_s23, 0  ;;  %s3186_s5 = sshll.u32 %s3653_s19, 7 }
 0x2f5   : > { %s2447_s12 = scalar_lea.hbm %s5463_s3, %s3186_s5  ;;  %s3676_s29 = smov [#allocation9]  }
 0x2f6   : > { %s5395_s26 = sshll.u32 %s3676_s29, 4  ;;  %s2451_s15 = sshll.u32 %s2447_s12, 4  ;;  %s2450_s26 = int_to_ptr.vmem [resolvable:$true] %s5395_s26  ;;  %s5398_s15 = int_to_ptr.hbm [resolvable:$true] %s2451_s15 }
 0x2f7   : > { %s3063_s4 = sshll.u32 %s5682_s18, 7  ;;  %s3528_s27 = sshra.s32 %s2450_s26, 4  ;;  %s3529_s27 = int_to_ptr.vmem [resolvable:$true] %s3528_s27 }
 0x2f8   : > { %s3530_s10 = sshrl.u32 %s3063_s4, 4  ;;  %s3539_s6 = scalar_lea.vmem %s3676_s29, 128 }
 0x2f9   : > { %s3535_s19 = scalar_lea.vmem %s3529_s27, %s3530_s10 }
 0x2fa   : > { %p3536_p13 = scmp.ne.s32.totalorder %s3529_s27, %s3535_s19  ;;  %p3541_p2 = scmp.lt.s32.totalorder %s3539_s6, %s3535_s19 }
 0x2fc   : > { %p3537_p0 = pnand %p3536_p13, %p5387_p10 }
 0x2fe   : > { %p3538_p1 = pneg %p3537_p0 }
 0x300   : > { %p3543_p7 = pnand %p3541_p2, %p3538_p1 }
 0x302   : > { %3546 = shalt.err (!%p3543_p7)
}
 0x303   : > { %s3547_s21 = sshra.s32 %s5398_s15, 4  ;;  %s3558_s16 = scalar_lea.hbm %s5463_s3, 200  ;;  %s3548_s21 = int_to_ptr.hbm [resolvable:$true] %s3547_s21 }
 0x304   : > { %s3554_s30 = scalar_lea.hbm %s3548_s21, %s3530_s10  ;;  %p3559_p11 = scmp.lt.s32.totalorder %s3548_s21, %s5463_s3 }
 0x305   : > { %p3555_p8 = scmp.ne.s32.totalorder %s3548_s21, %s3554_s30  ;;  %p3560_p3 = scmp.lt.s32.totalorder %s3558_s16, %s3554_s30 }
 0x307   : > { %p3556_p9 = pnand %p3555_p8, %p5387_p10  ;;  %p3561_p5 = por %p3560_p3, %p3559_p11 }
 0x309   : > { %p3557_p12 = pneg %p3556_p9 }
 0x30b   : > { %p3562_p4 = pnand %p3561_p5, %p3557_p12 }
 0x30d   : > { %3565 = shalt.err (!%p3562_p4)
}
 0x30e   : > { %s3677_s14 = smov 128   ;;  %s3678_s23 = smov 8  }
 0x30f   : > { %2457 = dma.vmem_to_hbm [thread:$0]  (%p5387_p10), %s2450_s26, %s3063_s4, %s5398_s15, [#allocation5], %s3677_s14, %s3677_s14, %s3678_s23  }
 0x310 PF: > { %p5660_p6 = scmp.ne.s32.totalorder %s5499_s8, 0 }
 0x312   : > { %3620 = dma.done.wait (%p5660_p6), [#allocation5], 2048  }
 0x313   : > { %3622 = vsyncadd (%p5660_p6), [#allocation5], 4294965248 }
 0x314 PF: > { %s18_s22 = sadd.s32 1, %s3665_s22   ;;  %s5661_s28 = sld [smem:[#allocation13_spill]] }
 0x315   : > { %p15_p13 = scmp.ge.s32.totalorder %s18_s22, 6   ;;  %s5662_s14 = sld [smem:[#allocation19_spill]] }
 0x316   : > { %s5663_s15 = sld [smem:[#allocation14_spill]]  ;;  %s5669_s12 = smov %s3629_s13 }
 0x317   : > { %s5664_s16 = sld [smem:[#allocation15_spill]]  ;;  %s5671_s18 = smov %s3657_s20 }
 0x318   : > { %s5665_s17 = sld [smem:[#allocation20_spill]] }
 0x319   : > { %s5666_s19 = sld [smem:[#allocation16_spill]] }
 0x31a   : > { %s5667_s7 = sld [smem:[#allocation17_spill]]  ;;  %s5670_s13 = smov %s5661_s28 }
 0x31b   : > { %s5668_s21 = sld [smem:[#allocation18_spill]] }
 0x31c   :  { %17 = sbr.rel (!%p15_p13) target bundleno = 12 (0xc), region = 95 }
 0x320   : > { %s5672_s20 = smov %s5667_s7 }
 0x321   :  { %2468 = vsyncpa [#allocation4], 1 }
 0x322   :  { %2470 = vsyncpa [#allocation4 + $0x1], 1 }
 0x323   :  { %2471 = vsyncpa [#allocation7], 1 }
 0x324   :  { %2473 = vsyncpa [#allocation7 + $0x1], 1 }
 0x325   :  { %2474 = vsyncpa [#allocation5], 1 }
 0x326   :  { %2476 = vsyncpa [#allocation5 + $0x1], 1 }

// kernel: tpu_custom_call.1
= control target key start
LH: loop header
LB: loop body
LE: loop exit
PB: predicated region body
PF: predicated region fallthrough
CT: control target
= control target key end

     0   :  { %s5587_s0 = inlined_call_operand.hbm [shape: bf16[200,256], index: 0, kind: input, shape index: {}]   ;;  %s5588_s1 = inlined_call_operand.hbm [shape: bf16[256,1024], index: 1, kind: input, shape index: {}]   ;;  %s5589_s2 = inlined_call_operand.hbm [shape: bf16[512,256], index: 2, kind: input, shape index: {}]   ;;  %s5590_s3 = inlined_call_operand.hbm [shape: bf16[200,256], index: 3, kind: output, shape index: {}]  }
   0x1   :  { %5615 = sst [smem:[#allocation51_spill]] %s5587_s0 }
   0x2   :  { %5616 = sst [smem:[#allocation52_spill]] %s5590_s3 }
   0x3   :  { %8 = vsyncpa [#allocation4], 0 }
   0x4   :  { %10 = vsyncpa [#allocation4 + $0x1], 0 }
   0x5   :  { %11 = vsyncpa [#allocation7], 0 }
   0x6   :  { %13 = vsyncpa [#allocation7 + $0x1], 0 }
   0x7   :  { %14 = vsyncpa [#allocation5], 0 }
   0x8   :  { %16 = vsyncpa [#allocation5 + $0x1], 0  ;;  %s3750_s12 = smov 0   ;;  %s3752_s13 = smov 0  }
   0x9   :  { %s3754_s14 = smov 0   ;;  %s3756_s15 = smov 0  }
   0xa   :  { %s3758_s16 = smov 0   ;;  %s3760_s17 = smov 0  }
   0xb   :  { %s3762_s18 = smov 0   ;;  %s3764_s19 = smov 0  }
   0xc   :  { %s3766_s20 = smov 0   ;;  %s3768_s21 = smov 0  }
   0xd   :  { %s3770_s22 = smov 0  }
   0xe LB: > { %5617 = sst [smem:[#allocation13_spill]] %s3684_s14  ;;  %s3806_s23 = sadd.s32 4294967295, %s3716_s22   ;;  %s3716_s22 = sphi %s3770_s22, %s22_s22   ;;  %s3712_s21 = sphi %s3768_s21, %s5799_s21   ;;  %s3708_s20 = sphi %s3766_s20, %s5805_s20   ;;  %s3704_s19 = sphi %s3764_s19, %s5797_s19   ;;  %s3700_s18 = sphi %s3762_s18, %s5804_s18   ;;  %s3696_s17 = sphi %s3760_s17, %s5796_s17   ;;  %s3692_s16 = sphi %s3758_s16, %s5803_s16   ;;  %s3688_s15 = sphi %s3756_s15, %s5802_s15   ;;  %s3684_s14 = sphi %s3754_s14, %s5794_s14   ;;  %s3680_s13 = sphi %s3752_s13, %s5801_s13   ;;  %s3676_s12 = sphi %s3750_s12, %s5800_s12  }
   0xf   : > { %5618 = sst [smem:[#allocation14_spill]] %s3688_s15  ;;  %s2609_s24 = sadd.s32 4294967294, %s3716_s22  }
  0x10   : > { %5619 = sst [smem:[#allocation15_spill]] %s3696_s17  ;;  %s31_s25 = sadd.s32 1, %s3708_s20 }
  0x11   : > { %5620 = sst [smem:[#allocation16_spill]] %s3704_s19  ;;  %s34_s26 = sadd.s32 1, %s3712_s21 }
  0x12   : > { %5621 = sst [smem:[#allocation17_spill]] %s3712_s21  ;;  %p32_p0 = scmp.ge.s32.totalorder %s31_s25, 2 }
  0x13   : > { %s41_s27 = sadd.s32 1, %s3696_s17  ;;  %p48_p1 = scmp.ne.s32.totalorder %s3696_s17, %s3692_s16 }
  0x14   : > { %p49_p2 = scmp.eq.s32.totalorder %s3716_s22, 0  ;;  %s5807_s25 = smov (%p32_p0, %s31_s25), 0 }
  0x15   : > { %5622 = sst [smem:[#allocation18_spill]] %s5807_s25  ;;  %s5809_s26 = smov (!%p32_p0, %s34_s26), %s3712_s21 }
  0x16   : > { %p3823_p3 = por %p49_p2, %p48_p1  ;;  %p5591_p4 = scmp.ne.s32.totalorder %s3692_s16, %s3688_s15 }
  0x17   : > { %p36_p5 = scmp.ge.s32.totalorder %s5809_s26, 2  ;;  %p55_p6 = scmp.eq.s32.totalorder %s3806_s23, 0 }
  0x18   : > { %s64_s29 = ssub.s32 %s3708_s20, %s5807_s25  ;;  %s67_s30 = sadd.s32 1, %s3684_s14 }
  0x19   : > { %s5811_s26 = smov (%p36_p5, %s5809_s26), 0  ;;  %p3840_p7 = por %p55_p6, %p5591_p4 }
  0x1a   : > { %5624 = sst [smem:[#allocation19_spill]] %s5811_s26  ;;  %p65_p8 = scmp.eq.s32.totalorder %s64_s29, 0 }
  0x1b   : > { %s38_s5 = ssub.s32 %s3712_s21, %s5811_s26  ;;  %p74_p9 = scmp.ne.s32.totalorder %s3684_s14, %s3680_s13 }
  0x1c   : > { %p39_p10 = scmp.eq.s32.totalorder %s38_s5, 0  ;;  %p80_p11 = scmp.ne.s32.totalorder %s3680_s13, %s3676_s12 }
  0x1d   : > { %s3851_s6 = scalar_select %p65_p8, %s3684_s14, %s67_s30  }
  0x1e   : > { %s3854_s7 = scalar_select %p39_p10, %s3696_s17, %s41_s27  }
  0x1f   : > { %5626 = sst [smem:[#allocation20_spill]] %s3851_s6  ;;  %p3858_p12 = por %p74_p9, %p49_p2 }
  0x20   : > { %5627 = sst [smem:[#allocation21_spill]] %s3854_s7  ;;  %p3864_p13 = por %p80_p11, %p55_p6 }
  0x21   : > { %p130_p0 = scmp.eq.s32.totalorder %s3806_s23, 3  ;;  %p136_p5 = scmp.eq.s32.totalorder %s2609_s24, 3 }
  0x22   : > { %p5631_p8 = scmp.ne.s32.totalorder %s3692_s16, %s3688_s15  ;;  %p2611_p2 = scmp.ge.s32.totalorder %s3716_s22, 4 }
  0x23   : > { %p3872_p4 = por %p130_p0, %p48_p1 }
  0x24   : > { %p3879_p10 = por %p136_p5, %p5631_p8  ;;  %152 = sbr.rel (%p2611_p2) target bundleno = 96 (0x60), region = 16 }
  0x26   : > { %s5632_s11 = scalar_select %p3879_p10, 1, 0 }
  0x28   : > { %5633 = sst [smem:[#allocation22_spill]] %s5632_s11 }
  0x29   : > { %155 = sbr.rel (!%p3823_p3) target bundleno = 84 (0x54), region = 20  ;;  %s156_s12 = sand.u32 (%p3823_p3), 1, %s3696_s17  }
  0x2a   : > { %s2613_s24 = sshll.u32 (%p3823_p3), %s3712_s21, 4  ;;  %s2612_s27 = sshll.u32 (%p3823_p3), %s156_s12, 7 }
  0x2b   : > { %s162_s29 = ssub.s32 (%p3823_p3), 25, %s2613_s24  ;;  %s3891_s25 = scalar_lea.sflag (%p3823_p3), [#allocation4], %s156_s12 }
  0x2c   : > { %p163_p1 = scmp.lt.s32.totalorder (%p3823_p3), %s162_s29, 16  ;;  %s160_s7 = scalar_lea.vmem (%p3823_p3), [#allocation3], %s2612_s27 }
  0x2e   : > { %s5813_s29 = smov (!%p163_p1, %s162_s29), 16 }
  0x2f   : > { %s3126_s30 = sshll.u32 %s5813_s29, 3 }
  0x30   : > { %s167_s5 = ssub.s32 128, %s3126_s30 }
  0x31   : > { %s168_s26 = sshll.u32 %s167_s5, 4 }
  0x32   : > { %169 = vsyncadd %s3891_s25, %s168_s26  ;;  %p3894_p3 = scmp.ne.s32.totalorder %s3126_s30, 0  ;;  %s3128_s24 = sshll.u32 %s3712_s21, 7 }
  0x33   : > { %s5635_s0 = sld [smem:[#allocation51_spill]]  ;;  %s3902_s15 = sshll.u32 %s160_s7, 4  ;;  %s178_s15 = int_to_ptr.vmem [resolvable:$true] %s3902_s15 }
  0x34   : > { %s5597_s26 = sshll.u32 %s5813_s29, 7 }
  0x35   : > { %s3486_s30 = sshrl.u32 %s5597_s26, 4 }
  0x39   : > { %s173_s11 = scalar_lea.hbm %s5635_s0, %s3128_s24  ;;  %s3495_s7 = scalar_lea.hbm %s5635_s0, 200 }
  0x3a   : > { %s175_s12 = sshll.u32 %s173_s11, 4  ;;  %s3905_s12 = int_to_ptr.hbm [resolvable:$true] %s175_s12 }
  0x3b   : > { %s3484_s27 = sshra.s32 %s3905_s12, 4  ;;  %s3485_s27 = int_to_ptr.hbm [resolvable:$true] %s3484_s27 }
  0x3c   : > { %s3491_s5 = scalar_lea.hbm %s3485_s27, %s3486_s30 }
  0x3d   : > { %p3492_p6 = scmp.ne.s32.totalorder %s3485_s27, %s3491_s5  ;;  %p3497_p0 = scmp.lt.s32.totalorder %s3495_s7, %s3491_s5 }
  0x3f   : > { %p3493_p9 = pnand %p3492_p6, %p3894_p3 }
  0x41   : > { %p3494_p11 = pneg %p3493_p9 }
  0x43   : > { %p3499_p5 = pnand %p3497_p0, %p3494_p11 }
  0x45   : > { %3502 = shalt.err (!%p3499_p5)
}
  0x46   : > { %s3503_s11 = sshra.s32 %s178_s15, 4  ;;  %s3718_s27 = smov [#allocation3]   ;;  %s3504_s11 = int_to_ptr.vmem [resolvable:$true] %s3503_s11 }
  0x47   : > { %s3510_s24 = scalar_lea.vmem %s3504_s11, %s3486_s30  ;;  %s3514_s26 = scalar_lea.vmem %s3718_s27, 256 }
  0x48   : > { %p3511_p8 = scmp.ne.s32.totalorder %s3504_s11, %s3510_s24  ;;  %p3516_p6 = scmp.lt.s32.totalorder %s3514_s26, %s3510_s24 }
  0x4a   : > { %p3512_p2 = pnand %p3511_p8, %p3894_p3 }
  0x4c   : > { %p3513_p1 = pneg %p3512_p2 }
  0x4e   : > { %p3518_p9 = pnand %p3516_p6, %p3513_p1 }
  0x50   : > { %3521 = shalt.err (!%p3518_p9)
}
  0x51   : > { %s3719_s17 = smov 128   ;;  %s3720_s5 = smov 8  }
  0x52   : > { %s5636_s6 = sshll.u32 %s5813_s29, 7 }
  0x53   : > { %183 = dma.hbm_to_vmem [thread:$0]  (%p3894_p3), %s3905_s12, %s5636_s6, %s178_s15, %s3891_s25, %s3719_s17, %s3719_s17, %s3720_s5  }
  0x54 PF: > { %s187_s30 = sand.u32 1, %s3716_s22   ;;  %s189_s26 = sand.u32 1, %s3684_s14  }
  0x55   : > { %s2621_s7 = sshll.u32 %s189_s26, 9  ;;  %s3129_s11 = sshll.u32 %s3708_s20, 4 }
  0x56   : > { %s196_s0 = scalar_lea.hbm %s5588_s1, %s3129_s11  ;;  %s191_s21 = scalar_lea.vmem [#allocation6], %s2621_s7 }
  0x57   : > { %s199_s3 = sshll.u32 %s191_s21, 4  ;;  %s197_s28 = sshll.u32 %s196_s0, 4  ;;  %s200_s3 = int_to_ptr.vmem [resolvable:$true] %s199_s3  ;;  %s198_s28 = int_to_ptr.hbm [resolvable:$true] %s197_s28 }
  0x58   : > { %s188_s15 = scalar_lea.sflag [#allocation7], %s187_s30  ;;  %s3721_s25 = smov 512  }
  0x59   : > { %s3722_s29 = smov 256   ;;  %s3723_s12 = smov 16  }
  0x5a   : > { %3247 = dma.hbm_to_vmem [thread:$0]  (%p3858_p12), %s198_s28, 8192, %s200_s3, %s188_s15, %s3721_s25, %s3722_s29, %s3723_s12  }
  0x5b   : > { %s2624_s17 = sshll.u32 %s189_s26, 8  ;;  %s3131_s5 = sshll.u32 %s3708_s20, 8 }
  0x5c   : > { %s219_s19 = scalar_lea.hbm %s5589_s2, %s3131_s5  ;;  %s213_s11 = scalar_lea.vmem [#allocation8], %s2624_s17 }
  0x5d   : > { %s220_s24 = sshll.u32 %s219_s19, 4  ;;  %s222_s7 = sshll.u32 %s213_s11, 4  ;;  %s221_s24 = int_to_ptr.hbm [resolvable:$true] %s220_s24  ;;  %s223_s7 = int_to_ptr.vmem [resolvable:$true] %s222_s7 }
  0x5e   : > { %s3724_s0 = smov 128   ;;  %s3725_s21 = smov 8  }
  0x5f   : > { %3248 = dma.hbm_to_vmem [thread:$0]  (%p3858_p12), %s221_s24, 4096, %s223_s7, %s188_s15, %s3724_s0, %s3724_s0, %s3725_s21  }
  0x60 PF: > { %p2628_p3 = scmp.ge.s32.totalorder %s3716_s22, 1  ;;  %p230_p11 = scmp.lt.s32.totalorder %s3716_s22, 5 }
  0x62   : > { %p231_p0 = pnand %p2628_p3, %p230_p11 }
  0x64   : > { %234 = sbr.rel (%p231_p0) target bundleno = 795 (0x31b), region = 32 }
  0x69   : > { %s3945_s3 = sand.u32 1, %s3692_s16  }
  0x6a   : > { %s2629_s14 = sshll.u32 %s3945_s3, 7  ;;  %s237_s19 = scalar_lea.sflag [#allocation4], %s3945_s3 }
  0x6b   : > { %s3949_s30 = scalar_lea.vmem [#allocation3], %s2629_s14 }
  0x6c   : > { %3663 = dma.done.wait (%p3840_p7), %s237_s19, 2048  }
  0x6d   : > { %3665 = vsyncadd (%p3840_p7), %s237_s19, 4294965248  ;;  %s246_s8 = sand.u32 1, %s3806_s23   ;;  %s248_s26 = sand.u32 1, %s3680_s13  }
  0x6e   : > { %s2630_s27 = sshll.u32 %s248_s26, 9  ;;  %s247_s28 = scalar_lea.sflag [#allocation7], %s246_s8 }
  0x6f   : > { %s3957_s15 = scalar_lea.vmem [#allocation6], %s2630_s27 }
  0x70   : > { %3667 = dma.done.wait (%p3864_p13), %s247_s28, 12288  }
  0x71   : > { %3669 = vsyncadd (%p3864_p13), %s247_s28, 4294955008  ;;  %s2631_s25 = sshll.u32 %s248_s26, 8  ;;  %s3965_s12 = scalar_lea.vmem [#allocation9], %s2629_s14 }
  0x72   : > { %s3963_s29 = scalar_lea.vmem [#allocation8], %s2631_s25  ;;  %p2633_p7 = scmp.ne.s32.totalorder %s3700_s18, 0 }
  0x74   : > { %311 = sbr.rel (%p2633_p7) target bundleno = 154 (0x9a), region = 48 }
  0x79   : > { %v3726_v0 = vmov 0.0  }
  0x7a   : > { %312 = vst [vmem:[#allocation2 + $0xb0] sm:$0xff] %v3726_v0 }
  0x7b   : > { %313 = vst [vmem:[#allocation2] sm:$0xff] %v3726_v0 }
  0x7c   : > { %314 = vst [vmem:[#allocation2 + $0xd8] sm:$0xff] %v3726_v0 }
  0x7d   : > { %315 = vst [vmem:[#allocation2 + $0x18] sm:$0xff] %v3726_v0 }
  0x7e   : > { %316 = vst [vmem:[#allocation2 + $0x50] sm:$0xff] %v3726_v0 }
  0x7f   : > { %317 = vst [vmem:[#allocation2 + $0x68] sm:$0xff] %v3726_v0 }
  0x80   : > { %318 = vst [vmem:[#allocation2 + $0x30] sm:$0xff] %v3726_v0 }
  0x81   : > { %319 = vst [vmem:[#allocation2 + $0x48] sm:$0xff] %v3726_v0 }
  0x82   : > { %320 = vst [vmem:[#allocation2 + $0x80] sm:$0xff] %v3726_v0 }
  0x83   : > { %321 = vst [vmem:[#allocation2 + $0x88] sm:$0xff] %v3726_v0 }
  0x84   : > { %322 = vst [vmem:[#allocation2 + $0xe8] sm:$0xff] %v3726_v0 }
  0x85   : > { %323 = vst [vmem:[#allocation2 + $0xb8] sm:$0xff] %v3726_v0 }
  0x86   : > { %324 = vst [vmem:[#allocation2 + $0x60] sm:$0xff] %v3726_v0 }
  0x87   : > { %325 = vst [vmem:[#allocation2 + $0xf0] sm:$0xff] %v3726_v0 }
  0x88   : > { %326 = vst [vmem:[#allocation2 + $0x8] sm:$0xff] %v3726_v0 }
  0x89   : > { %327 = vst [vmem:[#allocation2 + $0x78] sm:$0xff] %v3726_v0 }
  0x8a   : > { %328 = vst [vmem:[#allocation2 + $0x38] sm:$0xff] %v3726_v0 }
  0x8b   : > { %329 = vst [vmem:[#allocation2 + $0x58] sm:$0xff] %v3726_v0 }
  0x8c   : > { %330 = vst [vmem:[#allocation2 + $0x40] sm:$0xff] %v3726_v0 }
  0x8d   : > { %331 = vst [vmem:[#allocation2 + $0xc8] sm:$0xff] %v3726_v0 }
  0x8e   : > { %332 = vst [vmem:[#allocation2 + $0xe0] sm:$0xff] %v3726_v0 }
  0x8f   : > { %333 = vst [vmem:[#allocation2 + $0x90] sm:$0xff] %v3726_v0 }
  0x90   : > { %334 = vst [vmem:[#allocation2 + $0x70] sm:$0xff] %v3726_v0 }
  0x91   : > { %335 = vst [vmem:[#allocation2 + $0xc0] sm:$0xff] %v3726_v0 }
  0x92   : > { %336 = vst [vmem:[#allocation2 + $0xa8] sm:$0xff] %v3726_v0 }
  0x93   : > { %337 = vst [vmem:[#allocation2 + $0xd0] sm:$0xff] %v3726_v0 }
  0x94   : > { %338 = vst [vmem:[#allocation2 + $0x10] sm:$0xff] %v3726_v0 }
  0x95   : > { %339 = vst [vmem:[#allocation2 + $0x28] sm:$0xff] %v3726_v0 }
  0x96   : > { %340 = vst [vmem:[#allocation2 + $0xa0] sm:$0xff] %v3726_v0 }
  0x97   : > { %341 = vst [vmem:[#allocation2 + $0xf8] sm:$0xff] %v3726_v0 }
  0x98   : > { %342 = vst [vmem:[#allocation2 + $0x20] sm:$0xff] %v3726_v0 }
  0x99   : > { %343 = vst [vmem:[#allocation2 + $0x98] sm:$0xff] %v3726_v0 }
  0x9a PF: > { %v2812_v1 = vld [vmem:[%s3957_s15 + $0xe0] sm:$0xf]  ;;  %v3178_v2 = vld [vmem:[%s3957_s15 + $0xec] sm:$0xf0]  ;;  %v3176_v6 = vld [vmem:[%s3957_s15 + $0xe4] sm:$0xf] }
  0x9b   : > { %v2940_v3 = vld [vmem:[%s3957_s15 + $0x1e0] sm:$0xf]  ;;  %v2813_v4 = vor.u32 %v3178_v2, %v2812_v1  ;;  %v3210_v5 = vld [vmem:[%s3957_s15 + $0x1ec] sm:$0xf0]  ;;  %v2814_v7 = vld [vmem:[%s3957_s15 + $0xf0] sm:$0xf0] }
  0x9c   : > { %v2941_v8 = vor.u32 %v3210_v5, %v2940_v3  ;;  %v2817_v9 = vor.u32 %v3176_v6, %v2814_v7  ;;  %v3208_v10 = vld [vmem:[%s3957_s15 + $0x1e4] sm:$0xf]  ;;  %v2942_v11 = vld [vmem:[%s3957_s15 + $0x1f0] sm:$0xf0]  ;;  %v2796_v12 = vld [vmem:[%s3957_s15 + $0xc0] sm:$0xf] }
  0x9d   : > { %824 = vmatpush.bf16.msra.mxu0 %v2813_v4  ;;  %v2945_v13 = vor.u32 %v3208_v10, %v2942_v11  ;;  %v3174_v14 = vld [vmem:[%s3957_s15 + $0xcc] sm:$0xf0]  ;;  %v2924_v15 = vld [vmem:[%s3957_s15 + $0x1c0] sm:$0xf]  ;;  %v3172_v19 = vld [vmem:[%s3957_s15 + $0xc4] sm:$0xf] }
  0x9e   : > { %v3206_v16 = vld [vmem:[%s3957_s15 + $0x1cc] sm:$0xf0]  ;;  %873 = vmatpush.bf16.msra.mxu1 %v2941_v8  ;;  %922 = vmatpush.bf16.msra.mxu2 %v2817_v9  ;;  %v2797_v17 = vor.u32 %v3174_v14, %v2796_v12  ;;  %v2798_v20 = vld [vmem:[%s3957_s15 + $0xd0] sm:$0xf0]  ;;  %v3204_v21 = vld [vmem:[%s3957_s15 + $0x1c4] sm:$0xf] }
  0x9f   : > { %v2925_v18 = vor.u32 %v3206_v16, %v2924_v15  ;;  %971 = vmatpush.bf16.msra.mxu3 %v2945_v13  ;;  %v2801_v22 = vor.u32 %v3172_v19, %v2798_v20  ;;  %v2926_v23 = vld [vmem:[%s3957_s15 + $0x1d0] sm:$0xf0]  ;;  %v2780_v24 = vld [vmem:[%s3957_s15 + $0xa0] sm:$0xf]  ;;  %v3170_v25 = vld [vmem:[%s3957_s15 + $0xac] sm:$0xf0] }
  0xa0   : > { %v2929_v26 = vor.u32 %v3204_v21, %v2926_v23  ;;  %v2908_v27 = vld [vmem:[%s3957_s15 + $0x1a0] sm:$0xf]  ;;  %v3202_v28 = vld [vmem:[%s3957_s15 + $0x1ac] sm:$0xf0]  ;;  %v3168_v29 = vld [vmem:[%s3957_s15 + $0xa4] sm:$0xf]  ;;  %v2781_v30 = vor.u32 %v3170_v25, %v2780_v24 }
  0xa1   : > { %825 = vmatpush.bf16.msra.mxu0 %v2797_v17  ;;  %v2782_v31 = vld [vmem:[%s3957_s15 + $0xb0] sm:$0xf0]  ;;  %v3200_v32 = vld [vmem:[%s3957_s15 + $0x1a4] sm:$0xf]  ;;  %v2909_v34 = vor.u32 %v3202_v28, %v2908_v27  ;;  %v2764_v36 = vld [vmem:[%s3957_s15 + $0x80] sm:$0xf] }
  0xa2   : > { %v2910_v33 = vld [vmem:[%s3957_s15 + $0x1b0] sm:$0xf0]  ;;  %874 = vmatpush.bf16.msra.mxu1 %v2925_v18  ;;  %923 = vmatpush.bf16.msra.mxu2 %v2801_v22  ;;  %v2785_v35 = vor.u32 %v3168_v29, %v2782_v31  ;;  %v3166_v37 = vld [vmem:[%s3957_s15 + $0x8c] sm:$0xf0]  ;;  %v2892_v38 = vld [vmem:[%s3957_s15 + $0x180] sm:$0xf] }
  0xa3   : > { %972 = vmatpush.bf16.msra.mxu3 %v2929_v26  ;;  %v2913_v39 = vor.u32 %v3200_v32, %v2910_v33  ;;  %v3198_v40 = vld [vmem:[%s3957_s15 + $0x18c] sm:$0xf0]  ;;  %v3164_v41 = vld [vmem:[%s3957_s15 + $0x84] sm:$0xf]  ;;  %v2766_v42 = vld [vmem:[%s3957_s15 + $0x90] sm:$0xf0]  ;;  %v2765_v45 = vor.u32 %v3166_v37, %v2764_v36 }
  0xa4   : > { %v3196_v43 = vld [vmem:[%s3957_s15 + $0x184] sm:$0xf]  ;;  %v2894_v44 = vld [vmem:[%s3957_s15 + $0x190] sm:$0xf0]  ;;  %v2893_v46 = vor.u32 %v3198_v40, %v2892_v38  ;;  %v2769_v47 = vor.u32 %v3164_v41, %v2766_v42  ;;  %v2748_v48 = vld [vmem:[%s3957_s15 + $0x60] sm:$0xf] }
  0xa5   : > { %826 = vmatpush.bf16.msra.mxu0 %v2781_v30  ;;  %v3162_v49 = vld [vmem:[%s3957_s15 + $0x6c] sm:$0xf0]  ;;  %v2876_v50 = vld [vmem:[%s3957_s15 + $0x160] sm:$0xf]  ;;  %v2897_v51 = vor.u32 %v3196_v43, %v2894_v44  ;;  %v3160_v53 = vld [vmem:[%s3957_s15 + $0x64] sm:$0xf] }
  0xa6   : > { %875 = vmatpush.bf16.msra.mxu1 %v2909_v34  ;;  %924 = vmatpush.bf16.msra.mxu2 %v2785_v35  ;;  %v3194_v52 = vld [vmem:[%s3957_s15 + $0x16c] sm:$0xf0]  ;;  %v2750_v54 = vld [vmem:[%s3957_s15 + $0x70] sm:$0xf0]  ;;  %v3192_v55 = vld [vmem:[%s3957_s15 + $0x164] sm:$0xf]  ;;  %v2749_v57 = vor.u32 %v3162_v49, %v2748_v48 }
  0xa7   : > { %973 = vmatpush.bf16.msra.mxu3 %v2913_v39  ;;  %v2878_v56 = vld [vmem:[%s3957_s15 + $0x170] sm:$0xf0]  ;;  %v2877_v58 = vor.u32 %v3194_v52, %v2876_v50  ;;  %v2753_v59 = vor.u32 %v3160_v53, %v2750_v54  ;;  %v2732_v60 = vld [vmem:[%s3957_s15 + $0x40] sm:$0xf]  ;;  %v3158_v61 = vld [vmem:[%s3957_s15 + $0x4c] sm:$0xf0] }
  0xa8   : > { %v2860_v62 = vld [vmem:[%s3957_s15 + $0x140] sm:$0xf]  ;;  %v2881_v63 = vor.u32 %v3192_v55, %v2878_v56  ;;  %v3190_v0 = vld [vmem:[%s3957_s15 + $0x14c] sm:$0xf0]  ;;  %v3156_v1 = vld [vmem:[%s3957_s15 + $0x44] sm:$0xf]  ;;  %v2733_v5 = vor.u32 %v3158_v61, %v2732_v60 }
  0xa9   : > { %827 = vmatpush.bf16.msra.mxu0 %v2765_v45  ;;  %v2734_v2 = vld [vmem:[%s3957_s15 + $0x50] sm:$0xf0]  ;;  %v3188_v3 = vld [vmem:[%s3957_s15 + $0x144] sm:$0xf]  ;;  %v2861_v6 = vor.u32 %v3190_v0, %v2860_v62  ;;  %v2716_v8 = vld [vmem:[%s3957_s15 + $0x20] sm:$0xf] }
  0xaa   : > { %876 = vmatpush.bf16.msra.mxu1 %v2893_v46  ;;  %925 = vmatpush.bf16.msra.mxu2 %v2769_v47  ;;  %v2862_v4 = vld [vmem:[%s3957_s15 + $0x150] sm:$0xf0]  ;;  %v2737_v7 = vor.u32 %v3156_v1, %v2734_v2  ;;  %v3154_v9 = vld [vmem:[%s3957_s15 + $0x2c] sm:$0xf0]  ;;  %v2844_v10 = vld [vmem:[%s3957_s15 + $0x120] sm:$0xf] }
  0xab   : > { %974 = vmatpush.bf16.msra.mxu3 %v2897_v51  ;;  %v2865_v11 = vor.u32 %v3188_v3, %v2862_v4  ;;  %v3186_v12 = vld [vmem:[%s3957_s15 + $0x12c] sm:$0xf0]  ;;  %v3152_v13 = vld [vmem:[%s3957_s15 + $0x24] sm:$0xf]  ;;  %v2718_v14 = vld [vmem:[%s3957_s15 + $0x30] sm:$0xf0]  ;;  %v2717_v17 = vor.u32 %v3154_v9, %v2716_v8 }
  0xac   : > { %v3184_v15 = vld [vmem:[%s3957_s15 + $0x124] sm:$0xf]  ;;  %v2846_v16 = vld [vmem:[%s3957_s15 + $0x130] sm:$0xf0]  ;;  %v2700_v18 = vld [vmem:[%s3957_s15] sm:$0xf]  ;;  %v2845_v20 = vor.u32 %v3186_v12, %v2844_v10  ;;  %v2721_v21 = vor.u32 %v3152_v13, %v2718_v14 }
  0xad   : > { %828 = vmatpush.bf16.msra.mxu0 %v2749_v57  ;;  %v3150_v19 = vld [vmem:[%s3957_s15 + $0xc] sm:$0xf0]  ;;  %v2828_v22 = vld [vmem:[%s3957_s15 + $0x100] sm:$0xf]  ;;  %v3148_v24 = vld [vmem:[%s3957_s15 + $0x4] sm:$0xf]  ;;  %v2849_v25 = vor.u32 %v3184_v15, %v2846_v16 }
  0xae   : > { %877 = vmatpush.bf16.msra.mxu1 %v2877_v58  ;;  %926 = vmatpush.bf16.msra.mxu2 %v2753_v59  ;;  %v3182_v23 = vld [vmem:[%s3957_s15 + $0x10c] sm:$0xf0]  ;;  %v2702_v26 = vld [vmem:[%s3957_s15 + $0x10] sm:$0xf0]  ;;  %v3180_v27 = vld [vmem:[%s3957_s15 + $0x104] sm:$0xf]  ;;  %v2701_v32 = vor.u32 %v3150_v19, %v2700_v18 }
  0xaf   : > { %975 = vmatpush.bf16.msra.mxu3 %v2881_v63  ;;  %v2830_v28 = vld [vmem:[%s3957_s15 + $0x110] sm:$0xf0]  ;;  %v2636_v29 = vld [vmem:[%s3949_s30] sm:$0xf]  ;;  %v3177_v30 = vld [vmem:[%s3957_s15 + $0xec] sm:$0xf]  ;;  %v2829_v36 = vor.u32 %v3182_v23, %v2828_v22  ;;  %v2705_v37 = vor.u32 %v3148_v24, %v2702_v26 }
  0xb0   : > { %v2822_v31 = vld [vmem:[%s3957_s15 + $0xf8] sm:$0xf0]  ;;  %v3133_v33 = vld [vmem:[%s3949_s30 + $0x4] sm:$0xf0]  ;;  %v3209_v34 = vld [vmem:[%s3957_s15 + $0x1ec] sm:$0xf]  ;;  %v2833_v40 = vor.u32 %v3180_v27, %v2830_v28 }
  0xb1   : > { %829 = vmatpush.bf16.msra.mxu0 %v2733_v5  ;;  %v2950_v35 = vld [vmem:[%s3957_s15 + $0x1f8] sm:$0xf0]  ;;  %v3132_v38 = vld [vmem:[%s3949_s30 + $0x4] sm:$0xf]  ;;  %v2638_v39 = vld [vmem:[%s3949_s30 + $0x8] sm:$0xf0]  ;;  %v2825_v41 = vor.u32 %v3177_v30, %v2822_v31  ;;  %v4043_v45 = vor.u32 %v3133_v33, %v2636_v29 }
  0xb2   : > { %878 = vmatpush.bf16.msra.mxu1 %v2861_v6  ;;  %927 = vmatpush.bf16.msra.mxu2 %v2737_v7  ;;  %v2820_v42 = vld [vmem:[%s3957_s15 + $0xe8] sm:$0xf]  ;;  %v3179_v43 = vld [vmem:[%s3957_s15 + $0xf4] sm:$0xf0]  ;;  %v2953_v46 = vor.u32 %v3209_v34, %v2950_v35  ;;  %v3173_v48 = vld [vmem:[%s3957_s15 + $0xcc] sm:$0xf]  ;;  %v4048_v50 = vor.u32 %v3132_v38, %v2638_v39 }
  0xb3   : > { %976 = vmatpush.bf16.msra.mxu3 %v2865_v11  ;;  %v2948_v44 = vld [vmem:[%s3957_s15 + $0x1e8] sm:$0xf]  ;;  %v3211_v47 = vld [vmem:[%s3957_s15 + $0x1f4] sm:$0xf0]  ;;  %v2806_v49 = vld [vmem:[%s3957_s15 + $0xd8] sm:$0xf0]  ;;  %v2821_v53 = vor.u32 %v3179_v43, %v2820_v42 }
  0xb4   : > { %v3205_v51 = vld [vmem:[%s3957_s15 + $0x1cc] sm:$0xf]  ;;  %v2934_v52 = vld [vmem:[%s3957_s15 + $0x1d8] sm:$0xf0]  ;;  %v2949_v54 = vor.u32 %v3211_v47, %v2948_v44  ;;  %v2809_v55 = vor.u32 %v3173_v48, %v2806_v49  ;;  %v2804_v56 = vld [vmem:[%s3957_s15 + $0xc8] sm:$0xf] }
  0xb5   : > { %830 = vmatpush.bf16.msra.mxu0 %v2717_v17  ;;  %v3175_v57 = vld [vmem:[%s3957_s15 + $0xd4] sm:$0xf0]  ;;  %v2937_v58 = vor.u32 %v3205_v51, %v2934_v52  ;;  %v2932_v59 = vld [vmem:[%s3957_s15 + $0x1c8] sm:$0xf]  ;;  %v3169_v62 = vld [vmem:[%s3957_s15 + $0xac] sm:$0xf] }
  0xb6   : > { %879 = vmatpush.bf16.msra.mxu1 %v2845_v20  ;;  %928 = vmatpush.bf16.msra.mxu2 %v2721_v21  ;;  %v3207_v60 = vld [vmem:[%s3957_s15 + $0x1d4] sm:$0xf0]  ;;  %v2805_v61 = vor.u32 %v3175_v57, %v2804_v56  ;;  %v2790_v63 = vld [vmem:[%s3957_s15 + $0xb8] sm:$0xf0]  ;;  %v3201_v0 = vld [vmem:[%s3957_s15 + $0x1ac] sm:$0xf] }
  0xb7   : > { %977 = vmatpush.bf16.msra.mxu3 %v2849_v25  ;;  %v2933_v1 = vor.u32 %v3207_v60, %v2932_v59  ;;  %v2793_v2 = vor.u32 %v3169_v62, %v2790_v63  ;;  %v2918_v3 = vld [vmem:[%s3957_s15 + $0x1b8] sm:$0xf0]  ;;  %v2788_v4 = vld [vmem:[%s3957_s15 + $0xa8] sm:$0xf]  ;;  %v3171_v5 = vld [vmem:[%s3957_s15 + $0xb4] sm:$0xf0] }
  0xb8   : > { %v2921_v6 = vor.u32 %v3201_v0, %v2918_v3  ;;  %v2916_v7 = vld [vmem:[%s3957_s15 + $0x1a8] sm:$0xf]  ;;  %v3203_v8 = vld [vmem:[%s3957_s15 + $0x1b4] sm:$0xf0]  ;;  %v2789_v9 = vor.u32 %v3171_v5, %v2788_v4  ;;  %v2644_v11 = vld [vmem:[%s3949_s30 + $0x10] sm:$0xf] }
  0xb9   : > { %831 = vmatpush.bf16.msra.mxu0 %v2701_v32  ;;  %v2917_v10 = vor.u32 %v3203_v8, %v2916_v7  ;;  %v3135_v12 = vld [vmem:[%s3949_s30 + $0x14] sm:$0xf0]  ;;  %v3134_v13 = vld [vmem:[%s3949_s30 + $0x14] sm:$0xf]  ;;  %v2646_v14 = vld [vmem:[%s3949_s30 + $0x18] sm:$0xf0] }
  0xba   : > { %880 = vmatpush.bf16.msra.mxu1 %v2829_v36  ;;  %929 = vmatpush.bf16.msra.mxu2 %v2705_v37  ;;  %v4072_v15 = vor.u32 %v3135_v12, %v2644_v11  ;;  %v4074_v16 = vor.u32 %v3134_v13, %v2646_v14  ;;  %v3165_v17 = vld [vmem:[%s3957_s15 + $0x8c] sm:$0xf]  ;;  %v2774_v18 = vld [vmem:[%s3957_s15 + $0x98] sm:$0xf0]  ;;  %v2772_v22 = vld [vmem:[%s3957_s15 + $0x88] sm:$0xf] }
  0xbb   : > { %978 = vmatpush.bf16.msra.mxu3 %v2833_v40  ;;  %v3197_v19 = vld [vmem:[%s3957_s15 + $0x18c] sm:$0xf]  ;;  %v2777_v20 = vor.u32 %v3165_v17, %v2774_v18  ;;  %v2902_v21 = vld [vmem:[%s3957_s15 + $0x198] sm:$0xf0]  ;;  %v3167_v23 = vld [vmem:[%s3957_s15 + $0x94] sm:$0xf0] }
  0xbc   : > { %832 = vmatmul.bf16.vlgmr.msra.gmra.mxu0 %v4043_v45  ;;  %v2905_v24 = vor.u32 %v3197_v19, %v2902_v21  ;;  %v2773_v25 = vor.u32 %v3167_v23, %v2772_v22  ;;  %v2900_v26 = vld [vmem:[%s3957_s15 + $0x188] sm:$0xf]  ;;  %v3199_v27 = vld [vmem:[%s3957_s15 + $0x194] sm:$0xf0]  ;;  %v2652_v29 = vld [vmem:[%s3949_s30 + $0x20] sm:$0xf] }
  0xbd   : > { %881 = vmatmul.bf16.vlgmr.msra.gmra.mxu1 %v4048_v50  ;;  %930 = vmatmul.bf16.vlgmr.msra.gmra.mxu2 %v4043_v45  ;;  %v2901_v28 = vor.u32 %v3199_v27, %v2900_v26  ;;  %v3137_v30 = vld [vmem:[%s3949_s30 + $0x24] sm:$0xf0]  ;;  %v3136_v31 = vld [vmem:[%s3949_s30 + $0x24] sm:$0xf]  ;;  %v2654_v32 = vld [vmem:[%s3949_s30 + $0x28] sm:$0xf0] }
  0xbe   : > { %1118 = vmatpush.bf16.msrb.mxu2 %v2825_v41  ;;  %979 = vmatmul.bf16.vlgmr.msra.gmra.mxu3 %v4048_v50  ;;  %v4092_v33 = vor.u32 %v3137_v30, %v2652_v29  ;;  %v4094_v34 = vor.u32 %v3136_v31, %v2654_v32  ;;  %v3161_v35 = vld [vmem:[%s3957_s15 + $0x6c] sm:$0xf]  ;;  %v2758_v36 = vld [vmem:[%s3957_s15 + $0x78] sm:$0xf0]  ;;  %v2756_v40 = vld [vmem:[%s3957_s15 + $0x68] sm:$0xf] }
  0xbf   : > { %1167 = vmatpush.bf16.msrb.mxu3 %v2953_v46  ;;  %1020 = vmatpush.bf16.msrb.mxu0 %v2821_v53  ;;  %v3193_v37 = vld [vmem:[%s3957_s15 + $0x16c] sm:$0xf]  ;;  %v2761_v38 = vor.u32 %v3161_v35, %v2758_v36  ;;  %v2886_v39 = vld [vmem:[%s3957_s15 + $0x178] sm:$0xf0]  ;;  %v3163_v41 = vld [vmem:[%s3957_s15 + $0x74] sm:$0xf0] }
  0xc0   : > { %1069 = vmatpush.bf16.msrb.mxu1 %v2949_v54  ;;  %v2889_v42 = vor.u32 %v3193_v37, %v2886_v39  ;;  %v2757_v43 = vor.u32 %v3163_v41, %v2756_v40  ;;  %v2884_v44 = vld [vmem:[%s3957_s15 + $0x168] sm:$0xf]  ;;  %v3195_v46 = vld [vmem:[%s3957_s15 + $0x174] sm:$0xf0]  ;;  %v2660_v48 = vld [vmem:[%s3949_s30 + $0x30] sm:$0xf] }
  0xc1   : > { %v2885_v47 = vor.u32 %v3195_v46, %v2884_v44  ;;  %v3139_v49 = vld [vmem:[%s3949_s30 + $0x34] sm:$0xf0]  ;;  %v3138_v51 = vld [vmem:[%s3949_s30 + $0x34] sm:$0xf]  ;;  %v2662_v52 = vld [vmem:[%s3949_s30 + $0x38] sm:$0xf0] }
  0xc2   : > { %1119 = vmatpush.bf16.msrb.mxu2 %v2809_v55  ;;  %v4112_v53 = vor.u32 %v3139_v49, %v2660_v48  ;;  %v4114_v54 = vor.u32 %v3138_v51, %v2662_v52  ;;  %v3157_v55 = vld [vmem:[%s3957_s15 + $0x4c] sm:$0xf]  ;;  %v2742_v56 = vld [vmem:[%s3957_s15 + $0x58] sm:$0xf0]  ;;  %v2740_v60 = vld [vmem:[%s3957_s15 + $0x48] sm:$0xf] }
  0xc3   : > { %1168 = vmatpush.bf16.msrb.mxu3 %v2937_v58  ;;  %1021 = vmatpush.bf16.msrb.mxu0 %v2805_v61  ;;  %v3189_v57 = vld [vmem:[%s3957_s15 + $0x14c] sm:$0xf]  ;;  %v2745_v58 = vor.u32 %v3157_v55, %v2742_v56  ;;  %v2870_v59 = vld [vmem:[%s3957_s15 + $0x158] sm:$0xf0]  ;;  %v3159_v61 = vld [vmem:[%s3957_s15 + $0x54] sm:$0xf0] }
  0xc4   : > { %1070 = vmatpush.bf16.msrb.mxu1 %v2933_v1  ;;  %v2873_v62 = vor.u32 %v3189_v57, %v2870_v59  ;;  %v2741_v63 = vor.u32 %v3159_v61, %v2740_v60  ;;  %v2868_v0 = vld [vmem:[%s3957_s15 + $0x148] sm:$0xf]  ;;  %v3191_v1 = vld [vmem:[%s3957_s15 + $0x154] sm:$0xf0]  ;;  %v2668_v3 = vld [vmem:[%s3949_s30 + $0x40] sm:$0xf] }
  0xc5   : > { %v3141_v4 = vld [vmem:[%s3949_s30 + $0x44] sm:$0xf0]  ;;  %v3140_v5 = vld [vmem:[%s3949_s30 + $0x44] sm:$0xf]  ;;  %v3185_v11 = vld [vmem:[%s3957_s15 + $0x12c] sm:$0xf] }
  0xc6   : > { %1120 = vmatpush.bf16.msrb.mxu2 %v2793_v2  ;;  %v2869_v2 = vor.u32 %v3191_v1, %v2868_v0  ;;  %v4132_v7 = vor.u32 %v3141_v4, %v2668_v3  ;;  %v2854_v13 = vld [vmem:[%s3957_s15 + $0x138] sm:$0xf0]  ;;  %v2724_v14 = vld [vmem:[%s3957_s15 + $0x28] sm:$0xf]  ;;  %v3155_v17 = vld [vmem:[%s3957_s15 + $0x34] sm:$0xf0] }
  0xc7   : > { %1169 = vmatpush.bf16.msrb.mxu3 %v2921_v6  ;;  %1022 = vmatpush.bf16.msrb.mxu0 %v2789_v9  ;;  %v2670_v6 = vld [vmem:[%s3949_s30 + $0x48] sm:$0xf0]  ;;  %v2857_v18 = vor.u32 %v3185_v11, %v2854_v13  ;;  %v2725_v19 = vor.u32 %v3155_v17, %v2724_v14  ;;  %v3187_v21 = vld [vmem:[%s3957_s15 + $0x134] sm:$0xf0]  ;;  %v2676_v23 = vld [vmem:[%s3949_s30 + $0x50] sm:$0xf] }
  0xc8   : > { %1071 = vmatpush.bf16.msrb.mxu1 %v2917_v10  ;;  %v4134_v8 = vor.u32 %v3140_v5, %v2670_v6  ;;  %v3153_v9 = vld [vmem:[%s3957_s15 + $0x2c] sm:$0xf]  ;;  %v2726_v10 = vld [vmem:[%s3957_s15 + $0x38] sm:$0xf0]  ;;  %v2708_v36 = vld [vmem:[%s3957_s15 + $0x8] sm:$0xf] }
  0xc9   : > { %v2729_v12 = vor.u32 %v3153_v9, %v2726_v10  ;;  %v2678_v26 = vld [vmem:[%s3949_s30 + $0x58] sm:$0xf0]  ;;  %v3149_v29 = vld [vmem:[%s3957_s15 + $0xc] sm:$0xf]  ;;  %v3151_v37 = vld [vmem:[%s3957_s15 + $0x14] sm:$0xf0] }
  0xca   : > { %1121 = vmatpush.bf16.msrb.mxu2 %v2777_v20  ;;  %v2852_v20 = vld [vmem:[%s3957_s15 + $0x128] sm:$0xf]  ;;  %v2710_v30 = vld [vmem:[%s3957_s15 + $0x18] sm:$0xf0]  ;;  %v3181_v31 = vld [vmem:[%s3957_s15 + $0x10c] sm:$0xf]  ;;  %v2709_v39 = vor.u32 %v3151_v37, %v2708_v36 }
  0xcb   : > { %1170 = vmatpush.bf16.msrb.mxu3 %v2905_v24  ;;  %1023 = vmatpush.bf16.msrb.mxu0 %v2773_v25  ;;  %v2853_v22 = vor.u32 %v3187_v21, %v2852_v20  ;;  %v3143_v24 = vld [vmem:[%s3949_s30 + $0x54] sm:$0xf0]  ;;  %v3142_v25 = vld [vmem:[%s3949_s30 + $0x54] sm:$0xf]  ;;  %v2713_v32 = vor.u32 %v3149_v29, %v2710_v30  ;;  %v2838_v35 = vld [vmem:[%s3957_s15 + $0x118] sm:$0xf0] }
  0xcc   : > { %837 = vmatmul.bf16.gmra.mxu0 %v4072_v15  ;;  %1072 = vmatpush.bf16.msrb.mxu1 %v2901_v28  ;;  %v4152_v27 = vor.u32 %v3143_v24, %v2676_v23  ;;  %v4154_v28 = vor.u32 %v3142_v25, %v2678_v26  ;;  %v2836_v40 = vld [vmem:[%s3957_s15 + $0x108] sm:$0xf]  ;;  %v3183_v41 = vld [vmem:[%s3957_s15 + $0x114] sm:$0xf0]  ;;  %v3144_v46 = vld [vmem:[%s3949_s30 + $0x64] sm:$0xf] }
  0xcd   : > { %886 = vmatmul.bf16.gmra.mxu1 %v4074_v16  ;;  %935 = vmatmul.bf16.gmra.mxu2 %v4072_v15  ;;  %v3145_v44 = vld [vmem:[%s3949_s30 + $0x64] sm:$0xf0]  ;;  %v2692_v51 = vld [vmem:[%s3949_s30 + $0x70] sm:$0xf]  ;;  %v3147_v52 = vld [vmem:[%s3949_s30 + $0x74] sm:$0xf0] }
  0xce   : > { %984 = vmatmul.bf16.gmra.mxu3 %v4074_v16  ;;  %1122 = vmatpush.bf16.msrb.mxu2 %v2761_v38  ;;  %v2841_v38 = vor.u32 %v3181_v31, %v2838_v35  ;;  %v3146_v55 = vld [vmem:[%s3949_s30 + $0x74] sm:$0xf]  ;;  %v2694_v56 = vld [vmem:[%s3949_s30 + $0x78] sm:$0xf0]  ;;  %v4184_v57 = vor.u32 %v3147_v52, %v2692_v51  ;;  %v3044_v24 = vld [vmem:[%s3963_s29 + $0x70] sm:$0xf] }
  0xcf   : > { %1171 = vmatpush.bf16.msrb.mxu3 %v2889_v42  ;;  %1024 = vmatpush.bf16.msrb.mxu0 %v2757_v43  ;;  %v2837_v42 = vor.u32 %v3183_v41, %v2836_v40  ;;  %v2684_v43 = vld [vmem:[%s3949_s30 + $0x60] sm:$0xf]  ;;  %v3046_v11 = vld [vmem:[%s3963_s29 + $0x78] sm:$0xf0]  ;;  %v3242_v13 = vld [vmem:[%s3963_s29 + $0xf4] sm:$0xf] }
  0xd0   : > { %1073 = vmatpush.bf16.msrb.mxu1 %v2885_v47  ;;  %v2686_v47 = vld [vmem:[%s3949_s30 + $0x68] sm:$0xf0]  ;;  %v4172_v48 = vor.u32 %v3145_v44, %v2684_v43  ;;  %v3110_v14 = vld [vmem:[%s3963_s29 + $0xf8] sm:$0xf0]  ;;  %v3243_v26 = vld [vmem:[%s3963_s29 + $0xf4] sm:$0xf0] }
  0xd1   : > { %v4174_v49 = vor.u32 %v3144_v46, %v2686_v47  ;;  %v3113_v20 = vor.u32 %v3242_v13, %v3110_v14  ;;  %v3224_v41 = vld [vmem:[%s3963_s29 + $0x64] sm:$0xf]  ;;  %v3102_v46 = vld [vmem:[%s3963_s29 + $0xe8] sm:$0xf0]  ;;  %v3030_v14 = vld [vmem:[%s3963_s29 + $0x58] sm:$0xf0] }
  0xd2   : > { %1123 = vmatpush.bf16.msrb.mxu2 %v2745_v58  ;;  %v4186_v58 = vor.u32 %v3146_v55, %v2694_v56  ;;  %v3240_v44 = vld [vmem:[%s3963_s29 + $0xe4] sm:$0xf]  ;;  %p3114_p12 = scmp.ne.s32.totalorder %s3700_s18, 1 }
  0xd3   : > { %1172 = vmatpush.bf16.msrb.mxu3 %v2873_v62  ;;  %1025 = vmatpush.bf16.msrb.mxu0 %v2741_v63  ;;  %v3105_v51 = vor.u32 %v3240_v44, %v3102_v46 }
  0xd4   : > { %1074 = vmatpush.bf16.msrb.mxu1 %v2869_v2 }
  0xd6   : > { %1124 = vmatpush.bf16.msrb.mxu2 %v2729_v12 }
  0xd7   : > { %1173 = vmatpush.bf16.msrb.mxu3 %v2857_v18  ;;  %1026 = vmatpush.bf16.msrb.mxu0 %v2725_v19 }
  0xd8   : > { %1075 = vmatpush.bf16.msrb.mxu1 %v2853_v22 }
  0xda   : > { %1125 = vmatpush.bf16.msrb.mxu2 %v2713_v32 }
  0xdb   : > { %1174 = vmatpush.bf16.msrb.mxu3 %v2841_v38  ;;  %1027 = vmatpush.bf16.msrb.mxu0 %v2709_v39 }
  0xdc   : > { %842 = vmatmul.bf16.gmra.mxu0 %v4092_v33  ;;  %1076 = vmatpush.bf16.msrb.mxu1 %v2837_v42  ;;  %v3038_v42 = vld [vmem:[%s3963_s29 + $0x68] sm:$0xf0] }
  0xdd   : > { %891 = vmatmul.bf16.gmra.mxu1 %v4094_v34  ;;  %940 = vmatmul.bf16.gmra.mxu2 %v4092_v33  ;;  %v3041_v47 = vor.u32 %v3224_v41, %v3038_v42 }
  0xde   : > { %989 = vmatmul.bf16.gmra.mxu3 %v4094_v34 }
  0xdf   : > { %2275 = vmatpush.bf16.msra.mxu3 %v3113_v20  ;;  %v3094_v20 = vld [vmem:[%s3963_s29 + $0xd8] sm:$0xf0] }
  0xe3   : > { %2276 = vmatpush.bf16.msra.mxu3 %v3105_v51  ;;  %v3022_v51 = vld [vmem:[%s3963_s29 + $0x48] sm:$0xf0] }
  0xec   : > { %847 = vmatmul.bf16.gmra.mxu0 %v4112_v53 }
  0xed   : > { %896 = vmatmul.bf16.gmra.mxu1 %v4114_v54  ;;  %945 = vmatmul.bf16.gmra.mxu2 %v4112_v53 }
  0xee   : > { %994 = vmatmul.bf16.gmra.mxu3 %v4114_v54 }
  0xfc   : > { %852 = vmatmul.bf16.gmra.mxu0 %v4132_v7 }
  0xfd   : > { %901 = vmatmul.bf16.gmra.mxu1 %v4134_v8  ;;  %950 = vmatmul.bf16.gmra.mxu2 %v4132_v7 }
  0xfe   : > { %999 = vmatmul.bf16.gmra.mxu3 %v4134_v8 }
 0x10c   : > { %857 = vmatmul.bf16.gmra.mxu0 %v4152_v27 }
 0x10d   : > { %906 = vmatmul.bf16.gmra.mxu1 %v4154_v28  ;;  %955 = vmatmul.bf16.gmra.mxu2 %v4152_v27 }
 0x10e   : > { %1004 = vmatmul.bf16.gmra.mxu3 %v4154_v28 }
 0x11c   : > { %862 = vmatmul.bf16.gmra.mxu0 %v4172_v48 }
 0x11d   : > { %911 = vmatmul.bf16.gmra.mxu1 %v4174_v49  ;;  %960 = vmatmul.bf16.gmra.mxu2 %v4172_v48 }
 0x11e   : > { %1009 = vmatmul.bf16.gmra.mxu3 %v4174_v49 }
 0x12c   : > { %867 = vmatmul.bf16.gmra.mxu0 %v4184_v57 }
 0x12d   : > { %916 = vmatmul.bf16.gmra.mxu1 %v4186_v58  ;;  %965 = vmatmul.bf16.gmra.mxu2 %v4184_v57 }
 0x12e   : > { %1014 = vmatmul.bf16.gmra.mxu3 %v4186_v58 }
 0x139   : > { %v833_v59 = vpop.f32.mrf.mxu0 }
 0x13a   : > { %v882_v60 = vpop.f32.mrf.mxu1 }
 0x13b   : > { %v4192_v61 = vadd.f32 %v882_v60, %v833_v59  ;;  %v3036_v59 = vld [vmem:[%s3963_s29 + $0x60] sm:$0xf]  ;;  %v3225_v60 = vld [vmem:[%s3963_s29 + $0x64] sm:$0xf0] }
 0x13c   : > { %1028 = vmatmul.bf16.vlgmr.msrb.gmra.mxu0 %v4043_v45 }
 0x13d   : > { %1077 = vmatmul.bf16.vlgmr.msrb.gmra.mxu1 %v4048_v50  ;;  %1126 = vmatmul.bf16.vlgmr.msrb.gmra.mxu2 %v4043_v45 }
 0x13e   : > { %1175 = vmatmul.bf16.vlgmr.msrb.gmra.mxu3 %v4048_v50  ;;  %v3226_v50 = vld [vmem:[%s3963_s29 + $0x74] sm:$0xf] }
 0x13f   : > { %v3049_v12 = vor.u32 %v3226_v50, %v3046_v11 }
 0x140   : > { %v931_v62 = vpop.f32.mrf.mxu2 }
 0x141   : > { %v980_v63 = vpop.f32.mrf.mxu3  ;;  %v835_v0 = vpop.f32.mrf.mxu0  ;;  %2226 = vmatpush.bf16.msra.mxu2 %v3049_v12  ;;  %v3222_v12 = vld [vmem:[%s3963_s29 + $0x54] sm:$0xf] }
 0x142   : > { %v4198_v1 = vadd.f32 %v980_v63, %v931_v62  ;;  %v884_v2 = vpop.f32.mrf.mxu1  ;;  %v3100_v62 = vld [vmem:[%s3963_s29 + $0xe0] sm:$0xf] }
 0x143   : > { %v4200_v3 = vadd.f32 %v884_v2, %v835_v0  ;;  %v3037_v0 = vor.u32 %v3225_v60, %v3036_v59  ;;  %v3241_v2 = vld [vmem:[%s3963_s29 + $0xe4] sm:$0xf0] }
 0x144   : > { %v2955_v59 = vmul.f32 -1.442695, %v4198_v1 }
 0x145   : > { %2227 = vmatpush.bf16.msra.mxu2 %v3041_v47  ;;  %v3220_v47 = vld [vmem:[%s3963_s29 + $0x44] sm:$0xf] }
 0x148   : > { %v933_v4 = vpop.f32.mrf.mxu2 }
 0x149   : > { %v982_v5 = vpop.f32.mrf.mxu3  ;;  %v838_v6 = vpop.f32.mrf.mxu0 }
 0x14a   : > { %v4202_v9 = vadd.f32 %v982_v5, %v933_v4  ;;  %v887_v10 = vpop.f32.mrf.mxu1  ;;  %v3101_v4 = vor.u32 %v3241_v2, %v3100_v62  ;;  %v2956_v2 = vmul.f32 -1.442695, %v4200_v3 }
 0x14b   : > { %v4204_v45 = vadd.f32 %v887_v10, %v838_v6 }
 0x14c   : > { %1033 = vmatmul.bf16.gmra.mxu0 %v4072_v15 }
 0x14d   : > { %1082 = vmatmul.bf16.gmra.mxu1 %v4074_v16  ;;  %1131 = vmatmul.bf16.gmra.mxu2 %v4072_v15  ;;  %v3227_v15 = vld [vmem:[%s3963_s29 + $0x74] sm:$0xf0] }
 0x14e   : > { %1180 = vmatmul.bf16.gmra.mxu3 %v4074_v16  ;;  %v3045_v25 = vor.u32 %v3227_v15, %v3044_v24  ;;  %v3108_v16 = vld [vmem:[%s3963_s29 + $0xf0] sm:$0xf] }
 0x14f   : > { %v3109_v32 = vor.u32 %v3243_v26, %v3108_v16 }
 0x150   : > { %v936_v17 = vpop.f32.mrf.mxu2  ;;  %2128 = vmatpush.bf16.msra.mxu0 %v3045_v25 }
 0x151   : > { %v985_v18 = vpop.f32.mrf.mxu3  ;;  %v840_v19 = vpop.f32.mrf.mxu0  ;;  %2177 = vmatpush.bf16.msra.mxu1 %v3109_v32 }
 0x152   : > { %v4214_v21 = vadd.f32 %v985_v18, %v936_v17  ;;  %v889_v22 = vpop.f32.mrf.mxu1 }
 0x153   : > { %v4216_v23 = vadd.f32 %v889_v22, %v840_v19  ;;  %v3238_v19 = vld [vmem:[%s3963_s29 + $0xd4] sm:$0xf]  ;;  %v3033_v22 = vor.u32 %v3222_v12, %v3030_v14 }
 0x154   : > { %2129 = vmatpush.bf16.msra.mxu0 %v3037_v0  ;;  %v3221_v0 = vld [vmem:[%s3963_s29 + $0x44] sm:$0xf0] }
 0x155   : > { %2178 = vmatpush.bf16.msra.mxu1 %v3101_v4  ;;  %2228 = vmatpush.bf16.msra.mxu2 %v3033_v22  ;;  %v3084_v4 = vld [vmem:[%s3963_s29 + $0xc0] sm:$0xf] }
 0x158   : > { %v938_v29 = vpop.f32.mrf.mxu2 }
 0x159   : > { %v987_v30 = vpop.f32.mrf.mxu3  ;;  %v843_v31 = vpop.f32.mrf.mxu0 }
 0x15a   : > { %v892_v35 = vpop.f32.mrf.mxu1  ;;  %v4222_v36 = vadd.f32 %v987_v30, %v938_v29  ;;  %v3028_v29 = vld [vmem:[%s3963_s29 + $0x50] sm:$0xf]  ;;  %v3223_v30 = vld [vmem:[%s3963_s29 + $0x54] sm:$0xf0] }
 0x15b   : > { %v4225_v37 = vadd.f32 %v892_v35, %v843_v31 }
 0x15c   : > { %1038 = vmatmul.bf16.gmra.mxu0 %v4092_v33 }
 0x15d   : > { %1087 = vmatmul.bf16.gmra.mxu1 %v4094_v34  ;;  %1136 = vmatmul.bf16.gmra.mxu2 %v4092_v33 }
 0x15e   : > { %1185 = vmatmul.bf16.gmra.mxu3 %v4094_v34 }
 0x160   : > { %v941_v38 = vpop.f32.mrf.mxu2 }
 0x161   : > { %v990_v39 = vpop.f32.mrf.mxu3  ;;  %v845_v40 = vpop.f32.mrf.mxu0 }
 0x162   : > { %v894_v43 = vpop.f32.mrf.mxu1  ;;  %v4234_v52 = vadd.f32 %v990_v39, %v941_v38  ;;  %v3029_v38 = vor.u32 %v3223_v30, %v3028_v29  ;;  %v3092_v39 = vld [vmem:[%s3963_s29 + $0xd0] sm:$0xf]  ;;  %v3078_v30 = vld [vmem:[%s3963_s29 + $0xb8] sm:$0xf0] }
 0x163   : > { %v4236_v34 = vadd.f32 %v894_v43, %v845_v40  ;;  %v3239_v40 = vld [vmem:[%s3963_s29 + $0xd4] sm:$0xf0] }
 0x164   : > { %5637 = vst [vmem:[#allocation23_spill] sm:$0xff] %v4234_v52  ;;  %2130 = vmatpush.bf16.msra.mxu0 %v3029_v38  ;;  %v3093_v41 = vor.u32 %v3239_v40, %v3092_v39  ;;  %v2958_v40 = vmul.f32 -1.442695, %v4204_v45 }
 0x166   : > { %2179 = vmatpush.bf16.msra.mxu1 %v3093_v41 }
 0x168   : > { %v943_v33 = vpop.f32.mrf.mxu2 }
 0x169   : > { %v992_v55 = vpop.f32.mrf.mxu3  ;;  %v848_v56 = vpop.f32.mrf.mxu0 }
 0x16a   : > { %v897_v63 = vpop.f32.mrf.mxu1  ;;  %v4243_v5 = vadd.f32 %v992_v55, %v943_v33  ;;  %v3236_v33 = vld [vmem:[%s3963_s29 + $0xc4] sm:$0xf]  ;;  %v3086_v55 = vld [vmem:[%s3963_s29 + $0xc8] sm:$0xf0] }
 0x16b   : > { %v4245_v6 = vadd.f32 %v897_v63, %v848_v56  ;;  %v3025_v56 = vor.u32 %v3220_v47, %v3022_v51  ;;  %v3089_v60 = vor.u32 %v3236_v33, %v3086_v55  ;;  %v3020_v63 = vld [vmem:[%s3963_s29 + $0x40] sm:$0xf]  ;;  %v2960_v51 = vmul.f32 -1.442695, %v4216_v23 }
 0x16c   : > { %1043 = vmatmul.bf16.gmra.mxu0 %v4112_v53  ;;  %5638 = vst [vmem:[#allocation24_spill] sm:$0xff] %v4243_v5  ;;  %v3021_v12 = vor.u32 %v3221_v0, %v3020_v63 }
 0x16d   : > { %5639 = vst [vmem:[#allocation25_spill] sm:$0xff] %v4245_v6  ;;  %1092 = vmatmul.bf16.gmra.mxu1 %v4114_v54  ;;  %1141 = vmatmul.bf16.gmra.mxu2 %v4112_v53  ;;  %v3097_v53 = vor.u32 %v3238_v19, %v3094_v20 }
 0x16e   : > { %1190 = vmatmul.bf16.gmra.mxu3 %v4114_v54  ;;  %2229 = vmatpush.bf16.msra.mxu2 %v3025_v56 }
 0x16f   : > { %2277 = vmatpush.bf16.msra.mxu3 %v3097_v53  ;;  %2131 = vmatpush.bf16.msra.mxu0 %v3021_v12  ;;  %v3218_v53 = vld [vmem:[%s3963_s29 + $0x34] sm:$0xf] }
 0x170   : > { %v946_v10 = vpop.f32.mrf.mxu2 }
 0x171   : > { %v995_v50 = vpop.f32.mrf.mxu3  ;;  %v850_v11 = vpop.f32.mrf.mxu0 }
 0x172   : > { %v899_v13 = vpop.f32.mrf.mxu1  ;;  %v4252_v17 = vadd.f32 %v995_v50, %v946_v10  ;;  %v3237_v10 = vld [vmem:[%s3963_s29 + $0xc4] sm:$0xf0] }
 0x173   : > { %v4254_v18 = vadd.f32 %v899_v13, %v850_v11  ;;  %2278 = vmatpush.bf16.msra.mxu3 %v3089_v60  ;;  %v3085_v14 = vor.u32 %v3237_v10, %v3084_v4 }
 0x174   : > { %5640 = vst [vmem:[#allocation26_spill] sm:$0xff] %v4252_v17 }
 0x175   : > { %5641 = vst [vmem:[#allocation27_spill] sm:$0xff] %v4254_v18  ;;  %2180 = vmatpush.bf16.msra.mxu1 %v3085_v14 }
 0x178   : > { %v948_v24 = vpop.f32.mrf.mxu2 }
 0x179   : > { %v997_v54 = vpop.f32.mrf.mxu3  ;;  %v853_v15 = vpop.f32.mrf.mxu0 }
 0x17a   : > { %v902_v25 = vpop.f32.mrf.mxu1  ;;  %v4258_v16 = vadd.f32 %v997_v54, %v948_v24  ;;  %v3014_v24 = vld [vmem:[%s3963_s29 + $0x38] sm:$0xf0]  ;;  %v3234_v54 = vld [vmem:[%s3963_s29 + $0xb4] sm:$0xf] }
 0x17b   : > { %v4277_v46 = vadd.f32 %v902_v25, %v853_v15  ;;  %v3017_v29 = vor.u32 %v3218_v53, %v3014_v24  ;;  %v3012_v24 = vld [vmem:[%s3963_s29 + $0x30] sm:$0xf] }
 0x17c   : > { %5642 = vst [vmem:[#allocation28_spill] sm:$0xff] %v4258_v16  ;;  %1048 = vmatmul.bf16.gmra.mxu0 %v4132_v7 }
 0x17d   : > { %1097 = vmatmul.bf16.gmra.mxu1 %v4134_v8  ;;  %1146 = vmatmul.bf16.gmra.mxu2 %v4132_v7  ;;  %v2954_v7 = vmul.f32 -1.442695, %v4192_v61 }
 0x17e   : > { %1195 = vmatmul.bf16.gmra.mxu3 %v4134_v8  ;;  %2230 = vmatpush.bf16.msra.mxu2 %v3017_v29  ;;  %v3076_v29 = vld [vmem:[%s3963_s29 + $0xb0] sm:$0xf] }
 0x17f   : > { %3356 = vpow2.f32 %v2954_v7  ;;  %v2959_v7 = vmul.f32 -1.442695, %v4214_v21 }
 0x180   : > { %v951_v26 = vpop.f32.mrf.mxu2  ;;  %3358 = vpow2.f32 %v2955_v59 }
 0x181   : > { %v1000_v31 = vpop.f32.mrf.mxu3  ;;  %v4266_v32 = vpop.f32.mrf.mxu0  ;;  %3360 = vpow2.f32 %v2956_v2  ;;  %v2961_v2 = vmul.f32 -1.442695, %v4222_v36 }
 0x182   : > { %v4268_v35 = vpop.f32.mrf.mxu1  ;;  %v4288_v62 = vadd.f32 %v1000_v31, %v951_v26  ;;  %v2957_v26 = vmul.f32 -1.442695, %v4202_v9 }
 0x184   : > { %5645 = vst [vmem:[#allocation31_spill] sm:$0xff] %v4288_v62  ;;  %v3233_v62 = vld [vmem:[%s3963_s29 + $0xa4] sm:$0xf0] }
 0x188   : > { %v4273_v8 = vpop.f32.mrf.mxu2 }
 0x189   : > { %5643 = vst [vmem:[#allocation29_spill] sm:$0xff] %v4273_v8  ;;  %v4275_v42 = vpop.f32.mrf.mxu3  ;;  %v858_v43 = vpop.f32.mrf.mxu0  ;;  %v3068_v8 = vld [vmem:[%s3963_s29 + $0xa0] sm:$0xf] }
 0x18a   : > { %5644 = vst [vmem:[#allocation30_spill] sm:$0xff] %v4275_v42  ;;  %v907_v44 = vpop.f32.mrf.mxu1  ;;  %v2965_v42 = vmul.f32 -1.442695, %v4243_v5 }
 0x18b   : > { %v4299_v19 = vadd.f32 %v907_v44, %v858_v43  ;;  %v3081_v43 = vor.u32 %v3234_v54, %v3078_v30  ;;  %v3235_v30 = vld [vmem:[%s3963_s29 + $0xb4] sm:$0xf0] }
 0x18c   : > { %1053 = vmatmul.bf16.gmra.mxu0 %v4152_v27 }
 0x18d   : > { %1102 = vmatmul.bf16.gmra.mxu1 %v4154_v28  ;;  %1151 = vmatmul.bf16.gmra.mxu2 %v4152_v27  ;;  %5648 = vst [vmem:[#allocation34_spill] sm:$0xff] %v4299_v19  ;;  %v3004_v19 = vld [vmem:[%s3963_s29 + $0x20] sm:$0xf] }
 0x18e   : > { %1200 = vmatmul.bf16.gmra.mxu3 %v4154_v28  ;;  %v3357_v28 = vpop.eup %3356 }
 0x18f   : > { %v4301_v20 = vadd.f32 1.0, %v3357_v28  ;;  %v3359_v25 = vpop.eup %3358  ;;  %2279 = vmatpush.bf16.msra.mxu3 %v3081_v43 }
 0x190   : > { %v956_v50 = vpop.f32.mrf.mxu2  ;;  %v3361_v39 = vpop.eup %3360  ;;  %v4321_v44 = vadd.f32 1.0, %v3359_v25 }
 0x191   : > { %v1005_v27 = vpop.f32.mrf.mxu3  ;;  %v4295_v11 = vpop.f32.mrf.mxu0  ;;  %3362 = vrcp.f32 %v4301_v20  ;;  %v4324_v47 = vadd.f32 1.0, %v3361_v39  ;;  %v1353_v12 = vand.u32 2147483647, %v4301_v20  ;;  %vm1349_vm0 = vweird.f32 %v4301_v20 }
 0x192   : > { %5646 = vst [vmem:[#allocation32_spill] sm:$0xff] %v4295_v11  ;;  %v4297_v13 = vpop.f32.mrf.mxu1  ;;  %v4303_v22 = vadd.f32 %v1005_v27, %v956_v50  ;;  %3364 = vpow2.f32 %v2957_v26  ;;  %v3219_v26 = vld [vmem:[%s3963_s29 + $0x34] sm:$0xf0]  ;;  %vm1364_vm4 = vweird.f32 %v4321_v44 }
 0x193   : > { %5647 = vst [vmem:[#allocation33_spill] sm:$0xff] %v4297_v13  ;;  %3366 = vpow2.f32 %v2958_v40  ;;  %vm4382_vm2 = vcmp.eq.f32.partialorder %v1353_v12, 8.507059e+37  ;;  %v1368_v12 = vand.u32 2147483647, %v4321_v44  ;;  %vm1379_vm5 = vweird.f32 %v4324_v47 }
 0x194   : > { %5649 = vst [vmem:[#allocation35_spill] sm:$0xff] %v4303_v22  ;;  %3368 = vpow2.f32 %v2959_v7 }
 0x195   : > { %3370 = vrcp.f32 %v4321_v44  ;;  %vm4443_vm8 = vcmp.eq.f32.partialorder %v1368_v12, 8.507059e+37 }
 0x196   : > { %3372 = vrcp.f32 %v4324_v47 }
 0x197   : > { %v4330_v33 = vpop.eup %3362  ;;  %3374 = vpow2.f32 %v2960_v51  ;;  %v2962_v51 = vmul.f32 -1.442695, %v4225_v37 }
 0x198   : > { %v4308_v15 = vpop.f32.mrf.mxu2  ;;  %v1345_v60 = vmul.f32 %v4330_v33, %v4301_v20  ;;  %3376 = vpow2.f32 %v2961_v2  ;;  %v3077_v2 = vor.u32 %v3235_v30, %v3076_v29  ;;  %vm1350_vm1 = vweird.f32 %v4330_v33 }
 0x199   : > { %5650 = vst [vmem:[#allocation36_spill] sm:$0xff] %v4308_v15  ;;  %v4313_v31 = vpop.f32.mrf.mxu3  ;;  %v4315_v38 = vpop.f32.mrf.mxu0  ;;  %vm4402_vm3 = vmor %vm1349_vm0, %vm1350_vm1 }
 0x19a   : > { %5651 = vst [vmem:[#allocation37_spill] sm:$0xff] %v4313_v31  ;;  %v4318_v41 = vpop.f32.mrf.mxu1  ;;  %v1346_v10 = vsub.f32 1.0, %v1345_v60  ;;  %2181 = vmatpush.bf16.msra.mxu1 %v3077_v2 }
 0x19c   : > { %1058 = vmatmul.bf16.gmra.mxu0 %v4172_v48  ;;  %v1347_v7 = vmul.f32 %v4330_v33, %v1346_v10 }
 0x19d   : > { %1107 = vmatmul.bf16.gmra.mxu1 %v4174_v49  ;;  %1156 = vmatmul.bf16.gmra.mxu2 %v4172_v48 }
 0x19e   : > { %1205 = vmatmul.bf16.gmra.mxu3 %v4174_v49  ;;  %v3365_v49 = vpop.eup %3364 }
 0x19f   : > { %v3367_v63 = vpop.eup %3366  ;;  %v4347_v50 = vadd.f32 1.0, %v3365_v49 }
 0x1a0   : > { %v4333_v55 = vpop.f32.mrf.mxu2  ;;  %v3369_v0 = vpop.eup %3368  ;;  %v4352_v14 = vadd.f32 1.0, %v3367_v63  ;;  %v1355_v63 = vand.u32 2147483648, %v4301_v20  ;;  %v3006_v20 = vld [vmem:[%s3963_s29 + $0x28] sm:$0xf0] }
 0x1a1   : > { %v4336_v56 = vpop.f32.mrf.mxu3  ;;  %v4338_v59 = vpop.f32.mrf.mxu0  ;;  %v4354_v53 = vadd.f32 1.0, %v3369_v0  ;;  %3378 = vrcp.f32 %v4347_v50  ;;  %v3013_v0 = vor.u32 %v3219_v26, %v3012_v24  ;;  %v1383_v26 = vand.u32 2147483647, %v4324_v47 }
 0x1a2   : > { %5652 = vst [vmem:[#allocation38_spill] sm:$0xff] %v4338_v59  ;;  %v4342_v48 = vpop.f32.mrf.mxu1  ;;  %v4345_v4 = vpop.eup %3370  ;;  %3380 = vrcp.f32 %v4352_v14  ;;  %v3232_v59 = vld [vmem:[%s3963_s29 + $0xa4] sm:$0xf]  ;;  %vm1394_vm12 = vweird.f32 %v4347_v50  ;;  %vm1409_vm13 = vweird.f32 %v4352_v14 }
 0x1a3   : > { %5653 = vst [vmem:[#allocation39_spill] sm:$0xff] %v4342_v48  ;;  %v4349_v27 = vpop.eup %3372  ;;  %v1360_v25 = vmul.f32 %v4345_v4, %v4321_v44  ;;  %3382 = vrcp.f32 %v4354_v53  ;;  %2132 = vmatpush.bf16.msra.mxu0 %v3013_v0  ;;  %v3216_v0 = vld [vmem:[%s3963_s29 + $0x24] sm:$0xf]  ;;  %vm1365_vm6 = vweird.f32 %v4345_v4  ;;  %vm4447_vm9 = vcmp.eq.f32.partialorder %v1383_v26, 8.507059e+37 }
 0x1a4   : > { %v3375_v28 = vpop.eup %3374  ;;  %v1375_v43 = vmul.f32 %v4349_v27, %v4324_v47  ;;  %3384 = vpow2.f32 %v2962_v51  ;;  %v2963_v51 = vmul.f32 -1.442695, %v4234_v52  ;;  %vm1380_vm7 = vweird.f32 %v4349_v27  ;;  %vm4481_vm10 = vmor %vm1364_vm4, %vm1365_vm6 }
 0x1a5   : > { %v4376_v49 = vadd.f32 1.0, %v3375_v28  ;;  %v1348_v28 = vadd.f32 %v4330_v33, %v1347_v7  ;;  %v3377_v24 = vpop.eup %3376  ;;  %v1356_v7 = vor.u32 1.1754944e-38, %v1355_v63  ;;  %v3070_v63 = vld [vmem:[%s3963_s29 + $0xa8] sm:$0xf0]  ;;  %vm4494_vm11 = vmor %vm1379_vm5, %vm1380_vm7 }
 0x1a6   : > { %v1376_v48 = vsub.f32 1.0, %v1375_v43  ;;  %v1385_v43 = vand.u32 2147483648, %v4324_v47 }
 0x1a7   : > { %3386 = vrcp.f32 %v4376_v49  ;;  %v4396_v29 = vpop.eup %3378 }
 0x1a8   : > { %v4357_v54 = vpop.f32.mrf.mxu2  ;;  %v4425_v15 = vpop.eup %3380  ;;  %v1377_v11 = vmul.f32 %v4349_v27, %v1376_v48  ;;  %v1390_v30 = vmul.f32 %v4396_v29, %v4347_v50  ;;  %v1386_v10 = vor.u32 1.1754944e-38, %v1385_v43  ;;  %vm1395_vm14 = vweird.f32 %v4396_v29 }
 0x1a9   : > { %5654 = vst [vmem:[#allocation40_spill] sm:$0xff] %v4357_v54  ;;  %v4364_v39 = vpop.f32.mrf.mxu3  ;;  %v4366_v40 = vpop.f32.mrf.mxu0  ;;  %v1370_v54 = vand.u32 2147483648, %v4321_v44  ;;  %vm1410_vm0 = vweird.f32 %v4425_v15 }
 0x1aa   : > { %5655 = vst [vmem:[#allocation41_spill] sm:$0xff] %v4364_v39  ;;  %v4373_v60 = vpop.f32.mrf.mxu1  ;;  %v1361_v39 = vsub.f32 1.0, %v1360_v25  ;;  %v2964_v25 = vmul.f32 -1.442695, %v4236_v34  ;;  %vm4604_vm6 = vmor %vm1409_vm13, %vm1410_vm0 }
 0x1ab   : > { %v4430_v13 = vor.u32 1.1754944e-38, %v1370_v54 }
 0x1ac   : > { %1063 = vmatmul.bf16.gmra.mxu0 %v4184_v57  ;;  %3388 = vpow2.f32 %v2964_v25  ;;  %v3217_v25 = vld [vmem:[%s3963_s29 + $0x24] sm:$0xf0] }
 0x1ad   : > { %1112 = vmatmul.bf16.gmra.mxu1 %v4186_v58  ;;  %1161 = vmatmul.bf16.gmra.mxu2 %v4184_v57  ;;  %v1362_v57 = vmul.f32 %v4345_v4, %v1361_v39  ;;  %v1352_v39 = vsel %vm4402_vm3, %v4330_v33, %v1348_v28  ;;  %v1400_v28 = vand.u32 2147483648, %v4347_v50  ;;  %3390 = vpow2.f32 %v2963_v51  ;;  %vm4580_vm3 = vmor %vm1394_vm12, %vm1395_vm14 }
 0x1ae   : > { %1210 = vmatmul.bf16.gmra.mxu3 %v4186_v58  ;;  %v4416_v58 = vadd.f32 %v4318_v41, %v4315_v38  ;;  %v4433_v38 = vadd.f32 1.0, %v3377_v24  ;;  %v3009_v24 = vor.u32 %v3216_v0, %v3006_v20  ;;  %v1357_v12 = vsel %vm4382_vm2, %v1356_v7, %v1352_v39 }
 0x1af   : > { %v1363_v26 = vadd.f32 %v4345_v4, %v1362_v57  ;;  %v1391_v7 = vsub.f32 1.0, %v1390_v30  ;;  %v3005_v51 = vor.u32 %v3217_v25, %v3004_v19  ;;  %v4475_v57 = vmul.f32 %v1357_v12, %v4192_v61 }
 0x1b0   : > { %v4409_v2 = vpop.f32.mrf.mxu2  ;;  %5660 = vst [vmem:[#allocation42_spill] sm:$0xff] %v4416_v58  ;;  %v4437_v58 = vpop.eup %3382  ;;  %3392 = vrcp.f32 %v4433_v38  ;;  %2231 = vmatpush.bf16.msra.mxu2 %v3009_v24  ;;  %v1398_v20 = vand.u32 2147483647, %v4347_v50  ;;  %v4499_v44 = vor.u32 1.1754944e-38, %v1400_v28  ;;  %vm1424_vm2 = vweird.f32 %v4354_v53 }
 0x1b1   : > { %v4421_v22 = vpop.f32.mrf.mxu3  ;;  %v4423_v31 = vpop.f32.mrf.mxu0  ;;  %3394 = vpow2.f32 %v2965_v42  ;;  %2133 = vmatpush.bf16.msra.mxu0 %v3005_v51  ;;  %v1367_v47 = vsel %vm4481_vm10, %v4345_v4, %v1363_v26  ;;  %v1392_v51 = vmul.f32 %v4396_v29, %v1391_v7  ;;  %v4522_v4 = vadd.f32 %v4373_v60, %v4366_v40 }
 0x1b2   : > { %5661 = vst [vmem:[#allocation43_spill] sm:$0xff] %v4423_v31  ;;  %v4435_v41 = vpop.f32.mrf.mxu1  ;;  %v3385_v33 = vpop.eup %3384  ;;  %v4454_v31 = vadd.f32 %v4336_v56, %v4333_v55  ;;  %v1405_v55 = vmul.f32 %v4425_v15, %v4352_v14  ;;  %v1420_v56 = vmul.f32 %v4437_v58, %v4354_v53  ;;  %v1372_v7 = vsel %vm4443_vm8, %v4430_v13, %v1367_v47 }
 0x1b3   : > { %5662 = vst [vmem:[#allocation44_spill] sm:$0xff] %v4435_v41  ;;  %v3073_v41 = vor.u32 %v3232_v59, %v3070_v63  ;;  %v4458_v52 = vpop.eup %3386  ;;  %v1378_v59 = vadd.f32 %v4349_v27, %v1377_v11  ;;  %v4472_v0 = vadd.f32 1.0, %v3385_v33  ;;  %v3069_v63 = vor.u32 %v3233_v62, %v3068_v8  ;;  %v3214_v8 = vld [vmem:[%s3963_s29 + $0x14] sm:$0xf]  ;;  %v2998_v62 = vld [vmem:[%s3963_s29 + $0x18] sm:$0xf0] }
 0x1b4   : > { %5667 = vst [vmem:[#allocation45_spill] sm:$0xff] %v4454_v31  ;;  %v1435_v43 = vmul.f32 %v4458_v52, %v4376_v49  ;;  %v3389_v19 = vpop.eup %3388  ;;  %v1406_v24 = vsub.f32 1.0, %v1405_v55  ;;  %v1421_v25 = vsub.f32 1.0, %v1420_v56  ;;  %v3230_v55 = vld [vmem:[%s3963_s29 + $0x94] sm:$0xf]  ;;  %vm4540_vm15 = vcmp.eq.f32.partialorder %v1398_v20, 8.507059e+37 }
 0x1b5   : > { %2280 = vmatpush.bf16.msra.mxu3 %v3073_v41  ;;  %v1415_v41 = vand.u32 2147483648, %v4352_v14  ;;  %v1382_v28 = vsel %vm4494_vm11, %v4349_v27, %v1378_v59  ;;  %2182 = vmatpush.bf16.msra.mxu1 %v3069_v63  ;;  %v3391_v12 = vpop.eup %3390  ;;  %3396 = vrcp.f32 %v4472_v0  ;;  %5674 = vst [vmem:[#allocation48_spill] sm:$0xff] %v4522_v4  ;;  %v4526_v27 = vadd.f32 1.0, %v3389_v19  ;;  %v3062_v56 = vld [vmem:[%s3963_s29 + $0x98] sm:$0xf0] }
 0x1b6   : > { %v4524_v26 = vpop.eup %3392  ;;  %v1436_v11 = vsub.f32 1.0, %v1435_v43  ;;  %v3001_v59 = vor.u32 %v3214_v8, %v2998_v62  ;;  %v4532_v63 = vadd.f32 %v4421_v22, %v4409_v2  ;;  %v1387_v40 = vsel %vm4447_vm9, %v1386_v10, %v1382_v28 }
 0x1b7   : > { %v1413_v43 = vand.u32 2147483647, %v4352_v14  ;;  %v1407_v19 = vmul.f32 %v4425_v15, %v1406_v24  ;;  %v1422_v22 = vmul.f32 %v4437_v58, %v1421_v25  ;;  %v1428_v2 = vand.u32 2147483647, %v4354_v53  ;;  %v3395_v13 = vpop.eup %3394 }
 0x1b8   : > { %v4488_v39 = vpop.f32.mrf.mxu2  ;;  %5675 = vst [vmem:[#allocation49_spill] sm:$0xff] %v4532_v63  ;;  %2232 = vmatpush.bf16.msra.mxu2 %v3001_v59  ;;  %v3065_v48 = vor.u32 %v3230_v55, %v3062_v56  ;;  %v1393_v54 = vadd.f32 %v4396_v29, %v1392_v51  ;;  %v1450_v10 = vmul.f32 %v4524_v26, %v4433_v38  ;;  %v4551_v20 = vadd.f32 1.0, %v3391_v12  ;;  %v3231_v63 = vld [vmem:[%s3963_s29 + $0x94] sm:$0xf0] }
 0x1b9   : > { %5670 = vst [vmem:[#allocation46_spill] sm:$0xff] %v4488_v39  ;;  %v4505_v30 = vpop.f32.mrf.mxu3  ;;  %v4507_v33 = vpop.f32.mrf.mxu0  ;;  %v4554_v61 = vmul.f32 %v1372_v7, %v4198_v1  ;;  %v1416_v8 = vor.u32 1.1754944e-38, %v1415_v41  ;;  %v1437_v62 = vmul.f32 %v4458_v52, %v1436_v11  ;;  %v4563_v24 = vmul.f32 %v1387_v40, %v4200_v3 }
 0x1ba   : > { %5673 = vst [vmem:[#allocation47_spill] sm:$0xff] %v4505_v30  ;;  %v4515_v42 = vpop.f32.mrf.mxu1  ;;  %v2966_v30 = vmul.f32 -1.442695, %v4245_v6  ;;  %2281 = vmatpush.bf16.msra.mxu3 %v3065_v48  ;;  %vm4566_vm1 = vcmp.eq.f32.partialorder %v1413_v43, 8.507059e+37  ;;  %v1430_v1 = vand.u32 2147483648, %v4354_v53  ;;  %v1408_v12 = vadd.f32 %v4425_v15, %v1407_v19 }
 0x1bb   : > { %v4560_v28 = vpop.eup %3396  ;;  %v1423_v51 = vadd.f32 %v4437_v58, %v1422_v22  ;;  %vm1425_vm4 = vweird.f32 %v4437_v58  ;;  %vm4587_vm5 = vcmp.eq.f32.partialorder %v1428_v2, 8.507059e+37  ;;  %v4591_v59 = vadd.f32 1.0, %v3395_v13  ;;  %v3229_v6 = vld [vmem:[%s3963_s29 + $0x84] sm:$0xf0] }
 0x1bc   : > { %3398 = vpow2.f32 %v2966_v30  ;;  %v1397_v50 = vsel %vm4580_vm3, %v4396_v29, %v1393_v54  ;;  %v1451_v56 = vsub.f32 1.0, %v1450_v10  ;;  %v2968_v7 = vmul.f32 -1.442695, %v4254_v18  ;;  %vm4615_vm8 = vmor %vm1424_vm2, %vm1425_vm4  ;;  %v3052_v18 = vld [vmem:[%s3963_s29 + $0x80] sm:$0xf] }
 0x1bd   : > { %3400 = vrcp.f32 %v4526_v27  ;;  %v1438_v43 = vadd.f32 %v4458_v52, %v1437_v62  ;;  %vm1440_vm7 = vweird.f32 %v4458_v52  ;;  %v1465_v29 = vmul.f32 %v4560_v28, %v4472_v0 }
 0x1be   : > { %3402 = vrcp.f32 %v4551_v20  ;;  %v2967_v19 = vmul.f32 -1.442695, %v4252_v17  ;;  %v1431_v14 = vor.u32 1.1754944e-38, %v1430_v1  ;;  %vm1439_vm9 = vweird.f32 %v4376_v49  ;;  %v2996_v1 = vld [vmem:[%s3963_s29 + $0x10] sm:$0xf] }
 0x1bf   : > { %v1443_v48 = vand.u32 2147483647, %v4376_v49  ;;  %v1445_v13 = vand.u32 2147483648, %v4376_v49  ;;  %v1402_v10 = vsel %vm4540_vm15, %v4499_v44, %v1397_v50  ;;  %v1412_v53 = vsel %vm4604_vm6, %v4425_v15, %v1408_v12  ;;  %vm4634_vm10 = vmor %vm1439_vm9, %vm1440_vm7  ;;  %v3213_v17 = vld [vmem:[%s3963_s29 + $0x4] sm:$0xf0] }
 0x1c0   : > { %v4558_v47 = vpop.f32.mrf.mxu2  ;;  %v1427_v62 = vsel %vm4615_vm8, %v4437_v58, %v1423_v51  ;;  %3404 = vrcp.f32 %v4591_v59  ;;  %v1452_v49 = vmul.f32 %v4524_v26, %v1451_v56  ;;  %v1458_v3 = vand.u32 2147483647, %v4433_v38 }
 0x1c1   : > { %v4572_v41 = vpop.f32.mrf.mxu3  ;;  %v4574_v25 = vpop.f32.mrf.mxu0  ;;  %v1460_v44 = vand.u32 2147483648, %v4433_v38  ;;  %3406 = vpow2.f32 %v2968_v7  ;;  %v1442_v15 = vsel %vm4634_vm10, %v4458_v52, %v1438_v43  ;;  %v1466_v60 = vsub.f32 1.0, %v1465_v29 }
 0x1c2   : > { %v4593_v55 = vpop.f32.mrf.mxu1  ;;  %v3399_v22 = vpop.eup %3398  ;;  %3408 = vpow2.f32 %v2967_v19  ;;  %vm1444_vm11 = vcmp.eq.f32.partialorder %v1443_v48, 8.507059e+37  ;;  %v1446_v50 = vor.u32 1.1754944e-38, %v1445_v13  ;;  %v2969_v40 = vmul.f32 -1.442695, %v4258_v16 }
 0x1c3   : > { %v4622_v54 = vpop.eup %3400  ;;  %v4644_v12 = vadd.f32 1.0, %v3399_v22  ;;  %v4658_v52 = vmul.f32 %v1402_v10, %v4202_v9  ;;  %v1417_v43 = vsel %vm4566_vm1, %v1416_v8, %v1412_v53  ;;  %vm1454_vm12 = vweird.f32 %v4433_v38 }
 0x1c4   : > { %v4648_v51 = vpop.eup %3402  ;;  %v1495_v56 = vmul.f32 %v4622_v54, %v4526_v27  ;;  %vm1455_vm13 = vweird.f32 %v4524_v26  ;;  %v1432_v19 = vsel %vm4587_vm5, %v1431_v14, %v1427_v62  ;;  %v1447_v22 = vsel %vm1444_vm11, %v1446_v50, %v1442_v15  ;;  %v3060_v50 = vld [vmem:[%s3963_s29 + $0x90] sm:$0xf] }
 0x1c5   : > { %v1453_v48 = vadd.f32 %v4524_v26, %v1452_v49  ;;  %vm4669_vm14 = vcmp.eq.f32.partialorder %v1458_v3, 8.507059e+37  ;;  %v1461_v8 = vor.u32 1.1754944e-38, %v1460_v44  ;;  %v1467_v38 = vmul.f32 %v4560_v28, %v1466_v60  ;;  %vm4679_vm15 = vmor %vm1454_vm12, %vm1455_vm13  ;;  %v3215_v60 = vld [vmem:[%s3963_s29 + $0x14] sm:$0xf0] }
 0x1c6   : > { %v4673_v9 = vpop.eup %3404  ;;  %v1480_v30 = vmul.f32 %v4648_v51, %v4551_v20  ;;  %3410 = vrcp.f32 %v4644_v12  ;;  %v1473_v10 = vand.u32 2147483647, %v4472_v0  ;;  %v1475_v53 = vand.u32 2147483648, %v4472_v0 }
 0x1c7   : > { %v3407_v11 = vpop.eup %3406  ;;  %v1496_v62 = vsub.f32 1.0, %v1495_v56  ;;  %3412 = vpow2.f32 %v2969_v40  ;;  %v4687_v3 = vmul.f32 %v1417_v43, %v4204_v45  ;;  %v4690_v44 = vmul.f32 %v1432_v19, %v4214_v21 }
 0x1c8   : > { %v4646_v58 = vpop.f32.mrf.mxu2  ;;  %v3409_v49 = vpop.eup %3408  ;;  %v4693_v15 = vmul.f32 %v1447_v22, %v4216_v23  ;;  %vm1469_vm0 = vweird.f32 %v4472_v0  ;;  %v1457_v56 = vsel %vm4679_vm15, %v4524_v26, %v1453_v48  ;;  %vm1470_vm1 = vweird.f32 %v4560_v28 }
 0x1c9   : > { %v4653_v7 = vpop.f32.mrf.mxu3  ;;  %v4655_v2 = vpop.f32.mrf.mxu0  ;;  %v1490_v45 = vand.u32 2147483648, %v4551_v20  ;;  %v1503_v40 = vand.u32 2147483647, %v4526_v27  ;;  %v1468_v21 = vadd.f32 %v4560_v28, %v1467_v38  ;;  %v1481_v43 = vsub.f32 1.0, %v1480_v30  ;;  %vm4735_vm4 = vmor %vm1469_vm0, %vm1470_vm1 }
 0x1ca   : > { %v4664_v29 = vpop.f32.mrf.mxu1  ;;  %v1510_v23 = vmul.f32 %v4673_v9, %v4591_v59  ;;  %v4708_v19 = vadd.f32 1.0, %v3407_v11  ;;  %v1497_v4 = vmul.f32 %v4622_v54, %v1496_v62  ;;  %v4713_v14 = vadd.f32 1.0, %v3409_v49 }
 0x1cb   : > { %v2997_v26 = vor.u32 %v3215_v60, %v2996_v1  ;;  %v3061_v48 = vor.u32 %v3231_v63, %v3060_v50  ;;  %vm4721_vm2 = vcmp.eq.f32.partialorder %v1473_v10, 8.507059e+37  ;;  %v1476_v30 = vor.u32 1.1754944e-38, %v1475_v53  ;;  %v3212_v50 = vld [vmem:[%s3963_s29 + $0x4] sm:$0xf]  ;;  %v2988_v53 = vld [vmem:[%s3963_s29] sm:$0xf] }
 0x1cc   : > { %v4719_v16 = vpop.eup %3410  ;;  %vm1484_vm3 = vweird.f32 %v4551_v20  ;;  %v1505_v11 = vand.u32 2147483648, %v4526_v27  ;;  %v1462_v1 = vsel %vm4669_vm14, %v1461_v8, %v1457_v56  ;;  %v4740_v49 = vor.u32 1.1754944e-38, %v1490_v45  ;;  %v2990_v56 = vld [vmem:[%s3963_s29 + $0x8] sm:$0xf0] }
 0x1cd   : > { %v3413_v63 = vpop.eup %3412  ;;  %vm4742_vm5 = vcmp.eq.f32.partialorder %v1503_v40, 8.507059e+37  ;;  %2134 = vmatpush.bf16.msra.mxu0 %v2997_v26  ;;  %2183 = vmatpush.bf16.msra.mxu1 %v3061_v48  ;;  %v1472_v0 = vsel %vm4735_vm4, %v4560_v28, %v1468_v21  ;;  %v1482_v13 = vmul.f32 %v4648_v51, %v1481_v43  ;;  %v1520_v8 = vand.u32 2147483648, %v4591_v59  ;;  %v3228_v28 = vld [vmem:[%s3963_s29 + $0x84] sm:$0xf]  ;;  %v3054_v21 = vld [vmem:[%s3963_s29 + $0x88] sm:$0xf0] }
 0x1ce   : > { %5698 = vst [vmem:[#allocation50_spill] sm:$0xff] %v4740_v49  ;;  %3414 = vrcp.f32 %v4708_v19  ;;  %v1498_v45 = vadd.f32 %v4622_v54, %v1497_v4  ;;  %vm1500_vm6 = vweird.f32 %v4622_v54  ;;  %v1511_v40 = vsub.f32 1.0, %v1510_v23 }
 0x1cf   : > { %3416 = vrcp.f32 %v4713_v14  ;;  %v1506_v26 = vor.u32 1.1754944e-38, %v1505_v11  ;;  %v1518_v43 = vand.u32 2147483647, %v4591_v59  ;;  %v1525_v48 = vmul.f32 %v4719_v16, %v4644_v12 }
 0x1d0   : > { %v4710_v22 = vpop.f32.mrf.mxu2  ;;  %v4762_v10 = vadd.f32 1.0, %v3413_v63  ;;  %v4766_v4 = vmul.f32 %v1462_v1, %v4222_v36  ;;  %vm1485_vm7 = vweird.f32 %v4648_v51  ;;  %vm1499_vm8 = vweird.f32 %v4526_v27 }
 0x1d1   : > { %v4715_v39 = vpop.f32.mrf.mxu3  ;;  %v4717_v31 = vpop.f32.mrf.mxu0  ;;  %v2993_v23 = vor.u32 %v3212_v50, %v2990_v56  ;;  %v1477_v11 = vsel %vm4721_vm2, %v1476_v30, %v1472_v0  ;;  %v4776_v5 = vadd.f32 %v4648_v51, %v1482_v13  ;;  %vm4780_vm9 = vmor %vm1499_vm8, %vm1500_vm6  ;;  %vm1514_vm10 = vweird.f32 %v4591_v59 }
 0x1d2   : > { %v4727_v62 = vpop.f32.mrf.mxu1  ;;  %v4785_v36 = vor.u32 1.1754944e-38, %v1520_v8  ;;  %v3057_v27 = vor.u32 %v3228_v28, %v3054_v21  ;;  %v1502_v38 = vsel %vm4780_vm9, %v4622_v54, %v1498_v45  ;;  %v1512_v30 = vmul.f32 %v4673_v9, %v1511_v40  ;;  %vm4806_vm11 = vmor %vm1484_vm3, %vm1485_vm7 }
 0x1d3   : > { %v1079_v0 = vadd.f32 %v4515_v42, %v4507_v33  ;;  %2233 = vmatpush.bf16.msra.mxu2 %v2993_v23  ;;  %v1177_v13 = vadd.f32 %v4572_v41, %v4558_v47  ;;  %v1526_v8 = vsub.f32 1.0, %v1525_v48  ;;  %v1081_v28 = vadd.f32 %v4593_v55, %v4574_v25 }
 0x1d4   : > { %v4795_v49 = vpop.eup %3414  ;;  %2282 = vmatpush.bf16.msra.mxu3 %v3057_v27  ;;  %v2989_v21 = vor.u32 %v3213_v17, %v2988_v53  ;;  %v3053_v54 = vor.u32 %v3229_v6, %v3052_v18  ;;  %v1832_v33 = vmul.f32 %v1477_v11, %v4225_v37  ;;  %v1535_v47 = vand.u32 2147483648, %v4644_v12  ;;  %v5714_v27 = vld [vmem:[#allocation30_spill] sm:$0xff] }
 0x1d5   : > { %v4799_v40 = vpop.eup %3416  ;;  %3418 = vrcp.f32 %v4762_v10  ;;  %v1179_v6 = vadd.f32 %v4653_v7, %v4646_v58  ;;  %v1487_v37 = vsel %vm4806_vm11, %v4648_v51, %v4776_v5  ;;  %v1507_v17 = vsel %vm4742_vm5, %v1506_v26, %v1502_v38 }
 0x1d6   : > { %vm1515_vm12 = vweird.f32 %v4673_v9  ;;  %vm1529_vm13 = vweird.f32 %v4644_v12  ;;  %v1858_v18 = vmul.f32 %v4563_v24, %v1081_v28  ;;  %2135 = vmatpush.bf16.msra.mxu0 %v2989_v21  ;;  %2184 = vmatpush.bf16.msra.mxu1 %v3053_v54  ;;  %v1555_v41 = vmul.f32 %v4795_v49, %v4708_v19  ;;  %v5718_v24 = vld [vmem:[#allocation23_spill] sm:$0xff] }
 0x1d7   : > { %v1856_v25 = vmul.f32 %v4475_v57, %v1079_v0  ;;  %v1857_v55 = vmul.f32 %v4554_v61, %v1177_v13  ;;  %v1859_v5 = vmul.f32 %v4658_v52, %v1179_v6  ;;  %v5705_v58 = vand.u32 2147483647, %v4551_v20  ;;  %vm4861_vm1 = vmor %vm1514_vm10, %vm1515_vm12 }
 0x1d8   : > { %v1134_v1 = vpop.f32.mrf.mxu2  ;;  %v1513_v7 = vadd.f32 %v4673_v9, %v1512_v30  ;;  %vm4835_vm15 = vcmp.eq.f32.partialorder %v1518_v43, 8.507059e+37  ;;  %v1527_v53 = vmul.f32 %v4719_v16, %v1526_v8  ;;  %vm1530_vm0 = vweird.f32 %v4719_v16 }
 0x1d9   : > { %v1183_v50 = vpop.f32.mrf.mxu3  ;;  %v1039_v56 = vpop.f32.mrf.mxu0  ;;  %vm4830_vm14 = vcmp.eq.f32.partialorder %v5705_v58, 8.507059e+37  ;;  %v1540_v57 = vmul.f32 %v4799_v40, %v4713_v14  ;;  %v4845_v20 = vadd.f32 %v4268_v35, %v4266_v32  ;;  %v1888_v61 = vpack.c.bf16 %v1858_v18, %v1856_v25  ;;  %v5712_v35 = vld [vmem:[#allocation31_spill] sm:$0xff]  ;;  %vm4896_vm2 = vmor %vm1529_vm13, %vm1530_vm0 }
 0x1da   : > { %v1088_v45 = vpop.f32.mrf.mxu1  ;;  %v1889_v52 = vpack.c.bf16 %v1859_v5, %v1857_v55  ;;  %v1084_v60 = vadd.f32 %v4664_v29, %v4655_v2  ;;  %v1834_v26 = vmul.f32 %v1507_v17, %v4236_v34  ;;  %v2970_v43 = vmul.f32 -1.442695, %v4277_v46  ;;  %v5713_v29 = vld [vmem:[#allocation29_spill] sm:$0xff] }
 0x1db   : > { %v1182_v48 = vadd.f32 %v4715_v39, %v4710_v22  ;;  %v1086_v23 = vadd.f32 %v4727_v62, %v4717_v31  ;;  %v4855_v63 = vpop.eup %3418  ;;  %v1556_v34 = vsub.f32 1.0, %v1555_v41  ;;  %v2971_v2 = vmul.f32 -1.442695, %v5712_v35  ;;  %2136 = vmatmul.bf16.vlgmr.msra.gmra.mxu0 %v1888_v61  ;;  %2234 = vmatmul.bf16.vlgmr.msra.gmra.mxu2 %v1888_v61 }
 0x1dc   : > { %v4868_v39 = vadd.f32 %v5714_v27, %v5713_v29  ;;  %v1184_v31 = vadd.f32 %v1183_v50, %v1134_v1  ;;  %v1517_v59 = vsel %vm4861_vm1, %v4673_v9, %v1513_v7  ;;  %v1528_v38 = vadd.f32 %v4719_v16, %v1527_v53  ;;  %2185 = vmatmul.bf16.vlgmr.msra.gmra.mxu1 %v1889_v52 }
 0x1dd   : > { %v1541_v30 = vsub.f32 1.0, %v1540_v57  ;;  %2283 = vmatmul.bf16.vlgmr.msra.gmra.mxu3 %v1889_v52  ;;  %v1089_v0 = vadd.f32 %v1088_v45, %v1039_v56  ;;  %v2972_v8 = vmul.f32 -1.442695, %v4845_v20  ;;  %v1860_v28 = vmul.f32 %v4687_v3, %v1084_v60  ;;  %v5719_v57 = vld [vmem:[#allocation24_spill] sm:$0xff] }
 0x1de   : > { %v1862_v21 = vmul.f32 %v4693_v15, %v1086_v23  ;;  %v1863_v1 = vmul.f32 %v4766_v4, %v1184_v31  ;;  %v1570_v50 = vmul.f32 %v4855_v63, %v4762_v10  ;;  %3420 = vpow2.f32 %v2970_v43  ;;  %v5715_v4 = vld [vmem:[#allocation50_spill] sm:$0xff] }
 0x1df   : > { %v1861_v9 = vmul.f32 %v4690_v44, %v1182_v48  ;;  %v1557_v42 = vmul.f32 %v4795_v49, %v1556_v34  ;;  %3422 = vpow2.f32 %v2971_v2  ;;  %v2973_v56 = vmul.f32 -1.442695, %v4868_v39 }
 0x1e0   : > { %v1137_v11 = vpop.f32.mrf.mxu2  ;;  %v1890_v45 = vpack.c.bf16 %v1862_v21, %v1860_v28  ;;  %v1533_v6 = vand.u32 2147483647, %v4644_v12  ;;  %v1864_v3 = vmul.f32 %v1832_v33, %v1089_v0  ;;  %v1492_v18 = vsel %vm4830_vm14, %v5715_v4, %v1487_v37  ;;  %v5726_v4 = vld [vmem:[#allocation27_spill] sm:$0xff] }
 0x1e1   : > { %v1186_v22 = vpop.f32.mrf.mxu3  ;;  %v1041_v62 = vpop.f32.mrf.mxu0  ;;  %v4884_v17 = vpack.c.bf16 %v1863_v1, %v1861_v9  ;;  %v1522_v44 = vsel %vm4835_vm15, %v4785_v36, %v1517_v59  ;;  %v1536_v33 = vor.u32 1.1754944e-38, %v1535_v47  ;;  %3424 = vpow2.f32 %v2972_v8  ;;  %v5723_v8 = vld [vmem:[#allocation34_spill] sm:$0xff] }
 0x1e2   : > { %v1090_v13 = vpop.f32.mrf.mxu1  ;;  %v1532_v37 = vsel %vm4896_vm2, %v4719_v16, %v1528_v38  ;;  %v1571_v25 = vsub.f32 1.0, %v1570_v50  ;;  %v1187_v55 = vadd.f32 %v1186_v22, %v1137_v11  ;;  %v1542_v58 = vmul.f32 %v4799_v40, %v1541_v30  ;;  %v5722_v30 = vld [vmem:[#allocation25_spill] sm:$0xff] }
 0x1e3   : > { %v1091_v54 = vadd.f32 %v1090_v13, %v1041_v62  ;;  %v1558_v51 = vadd.f32 %v4795_v49, %v1557_v42  ;;  %vm1560_vm3 = vweird.f32 %v4795_v49  ;;  %3426 = vpow2.f32 %v2973_v56 }
 0x1e4   : > { %v3421_v47 = vpop.eup %3420  ;;  %v1833_v53 = vmul.f32 %v1492_v18, %v5718_v24  ;;  %v1835_v61 = vmul.f32 %v1522_v44, %v5719_v57  ;;  %v1565_v16 = vand.u32 2147483648, %v4708_v19  ;;  %vm1534_vm4 = vcmp.eq.f32.partialorder %v1533_v6, 8.507059e+37  ;;  %v5730_v44 = vld [vmem:[#allocation33_spill] sm:$0xff] }
 0x1e5   : > { %v1866_v15 = vmul.f32 %v1834_v26, %v1091_v54  ;;  %v3423_v26 = vpop.eup %3422  ;;  %vm1544_vm5 = vweird.f32 %v4713_v14  ;;  %vm1559_vm6 = vweird.f32 %v4708_v19  ;;  %v1563_v43 = vand.u32 2147483647, %v4708_v19 }
 0x1e6   : > { %v1537_v48 = vsel %vm1534_vm4, %v1536_v33, %v1532_v37  ;;  %vm4918_vm7 = vmor %vm1559_vm6, %vm1560_vm3  ;;  %v1572_v11 = vmul.f32 %v4855_v63, %v1571_v25  ;;  %v1865_v32 = vmul.f32 %v1833_v53, %v1187_v55  ;;  %v1543_v29 = vadd.f32 %v4799_v40, %v1542_v58  ;;  %v5731_v25 = vld [vmem:[#allocation36_spill] sm:$0xff]  ;;  %v5732_v55 = vld [vmem:[#allocation37_spill] sm:$0xff] }
 0x1e7   : > { %v4905_v36 = vpack.c.bf16 %v1866_v15, %v1864_v3  ;;  %v3425_v2 = vpop.eup %3424  ;;  %vm1545_vm8 = vweird.f32 %v4799_v40  ;;  %v1562_v19 = vsel %vm4918_vm7, %v4795_v49, %v1558_v51  ;;  %v4928_v27 = vadd.f32 1.0, %v3421_v47  ;;  %v5733_v47 = vld [vmem:[#allocation35_spill] sm:$0xff] }
 0x1e8   : > { %v1139_v5 = vpop.f32.mrf.mxu2  ;;  %v1548_v31 = vand.u32 2147483647, %v4713_v14  ;;  %v1566_v22 = vor.u32 1.1754944e-38, %v1565_v16  ;;  %v4931_v62 = vadd.f32 1.0, %v3423_v26  ;;  %v1836_v0 = vmul.f32 %v1537_v48, %v5722_v30  ;;  %vm4940_vm10 = vmor %vm1544_vm5, %vm1545_vm8 }
 0x1e9   : > { %v1188_v7 = vpop.f32.mrf.mxu3  ;;  %v1044_v12 = vpop.f32.mrf.mxu0  ;;  %v1550_v13 = vand.u32 2147483648, %v4713_v14  ;;  %vm1564_vm9 = vcmp.eq.f32.partialorder %v1563_v43, 8.507059e+37  ;;  %v2974_v28 = vmul.f32 -1.442695, %v5723_v8  ;;  %v1573_v1 = vadd.f32 %v4855_v63, %v1572_v11  ;;  %v5734_v43 = vld [vmem:[#allocation26_spill] sm:$0xff] }
 0x1ea   : > { %v1189_v52 = vadd.f32 %v1188_v7, %v1139_v5  ;;  %v1093_v60 = vpop.f32.mrf.mxu1  ;;  %v3427_v38 = vpop.eup %3426  ;;  %v1567_v21 = vsel %vm1564_vm9, %v1566_v22, %v1562_v19  ;;  %vm1575_vm11 = vweird.f32 %v4855_v63  ;;  %v4946_v50 = vadd.f32 1.0, %v3425_v2 }
 0x1eb   : > { %v1547_v9 = vsel %vm4940_vm10, %v4799_v40, %v1543_v29  ;;  %v1580_v54 = vand.u32 2147483648, %v4762_v10  ;;  %3428 = vrcp.f32 %v4928_v27  ;;  %2141 = vmatmul.bf16.gmra.mxu0 %v1890_v45  ;;  %2239 = vmatmul.bf16.gmra.mxu2 %v1890_v45  ;;  %v1094_v14 = vadd.f32 %v1093_v60, %v1044_v12 }
 0x1ec   : > { %v1867_v34 = vmul.f32 %v1835_v61, %v1189_v52  ;;  %vm1574_vm12 = vweird.f32 %v4762_v10  ;;  %v1578_v6 = vand.u32 2147483647, %v4762_v10  ;;  %3430 = vrcp.f32 %v4931_v62  ;;  %2190 = vmatmul.bf16.gmra.mxu1 %v4884_v17  ;;  %v5729_v10 = vld [vmem:[#allocation32_spill] sm:$0xff] }
 0x1ed   : > { %v4956_v3 = vadd.f32 1.0, %v3427_v38  ;;  %2288 = vmatmul.bf16.gmra.mxu3 %v4884_v17  ;;  %v1838_v18 = vmul.f32 %v1567_v21, %v5726_v4  ;;  %vm4963_vm13 = vmor %vm1574_vm12, %vm1575_vm11  ;;  %3432 = vpow2.f32 %v2974_v28  ;;  %v4969_v41 = vadd.f32 %v5730_v44, %v5729_v10 }
 0x1ee   : > { %v4933_v59 = vpack.c.bf16 %v1867_v34, %v1865_v32  ;;  %v1551_v37 = vor.u32 1.1754944e-38, %v1550_v13  ;;  %v1577_v17 = vsel %vm4963_vm13, %v4855_v63, %v1573_v1  ;;  %3434 = vrcp.f32 %v4946_v50  ;;  %v5735_v34 = vld [vmem:[#allocation28_spill] sm:$0xff] }
 0x1ef   : > { %v4977_v5 = vadd.f32 %v5732_v55, %v5731_v25  ;;  %vm1549_vm14 = vcmp.eq.f32.partialorder %v1548_v31, 8.507059e+37  ;;  %v1581_v58 = vor.u32 1.1754944e-38, %v1580_v54  ;;  %v1868_v51 = vmul.f32 %v1836_v0, %v1094_v14 }
 0x1f0   : > { %v1142_v42 = vpop.f32.mrf.mxu2  ;;  %v1552_v12 = vsel %vm1549_vm14, %v1551_v37, %v1547_v9  ;;  %vm1579_vm15 = vcmp.eq.f32.partialorder %v1578_v6, 8.507059e+37  ;;  %3436 = vrcp.f32 %v4956_v3  ;;  %v2975_v24 = vmul.f32 -1.442695, %v5733_v47  ;;  %v5737_v37 = vld [vmem:[#allocation39_spill] sm:$0xff] }
 0x1f1   : > { %v1191_v56 = vpop.f32.mrf.mxu3  ;;  %v1046_v40 = vpop.f32.mrf.mxu0  ;;  %v1582_v57 = vsel %vm1579_vm15, %v1581_v58, %v1577_v17  ;;  %v2976_v63 = vmul.f32 -1.442695, %v4969_v41  ;;  %v2977_v52 = vmul.f32 -1.442695, %v4977_v5  ;;  %v1837_v48 = vmul.f32 %v1552_v12, %v5734_v43 }
 0x1f2   : > { %v1095_v15 = vpop.f32.mrf.mxu1  ;;  %v4981_v53 = vpop.eup %3428  ;;  %v1192_v60 = vadd.f32 %v1191_v56, %v1142_v42  ;;  %v1839_v2 = vmul.f32 %v1582_v57, %v5735_v34  ;;  %3438 = vpow2.f32 %v2975_v24  ;;  %v1593_v56 = vand.u32 2147483647, %v4928_v27 }
 0x1f3   : > { %v1096_v33 = vadd.f32 %v1095_v15, %v1046_v40  ;;  %v4986_v16 = vpop.eup %3430  ;;  %v1585_v29 = vmul.f32 %v4981_v53, %v4928_v27  ;;  %3440 = vpow2.f32 %v2976_v63  ;;  %vm1589_vm0 = vweird.f32 %v4928_v27 }
 0x1f4   : > { %v3433_v26 = vpop.eup %3432  ;;  %v1600_v31 = vmul.f32 %v4986_v16, %v4931_v62  ;;  %3442 = vpow2.f32 %v2977_v52  ;;  %v1869_v38 = vmul.f32 %v1837_v48, %v1192_v60  ;;  %v1595_v45 = vand.u32 2147483648, %v4928_v27  ;;  %v5742_v60 = vld [vmem:[#allocation42_spill] sm:$0xff] }
 0x1f5   : > { %v1870_v7 = vmul.f32 %v1838_v18, %v1096_v33  ;;  %v4990_v32 = vpop.eup %3434  ;;  %v5005_v49 = vadd.f32 1.0, %v3433_v26  ;;  %v1586_v21 = vsub.f32 1.0, %v1585_v29  ;;  %vm1604_vm1 = vweird.f32 %v4931_v62  ;;  %v5736_v33 = vld [vmem:[#allocation38_spill] sm:$0xff] }
 0x1f6   : > { %v4997_v22 = vpop.eup %3436  ;;  %v1615_v28 = vmul.f32 %v4990_v32, %v4946_v50  ;;  %v1601_v9 = vsub.f32 1.0, %v1600_v31  ;;  %v5030_v17 = vadd.f32 %v5737_v37, %v5736_v33  ;;  %v1608_v25 = vand.u32 2147483647, %v4931_v62 }
 0x1f7   : > { %v4984_v61 = vpack.c.bf16 %v1870_v7, %v1868_v51  ;;  %v1630_v54 = vmul.f32 %v4997_v22, %v4956_v3  ;;  %3444 = vrcp.f32 %v5005_v49  ;;  %v1587_v18 = vmul.f32 %v4981_v53, %v1586_v21  ;;  %v5738_v51 = vld [vmem:[#allocation40_spill] sm:$0xff]  ;;  %v5739_v7 = vld [vmem:[#allocation41_spill] sm:$0xff] }
 0x1f8   : > { %v1144_v23 = vpop.f32.mrf.mxu2  ;;  %v3439_v14 = vpop.eup %3438  ;;  %v1616_v6 = vsub.f32 1.0, %v1615_v28  ;;  %v1602_v10 = vmul.f32 %v4986_v16, %v1601_v9  ;;  %v1610_v55 = vand.u32 2147483648, %v4931_v62  ;;  %v5038_v12 = vadd.f32 %v5739_v7, %v5738_v51  ;;  %v5745_v28 = vld [vmem:[#allocation45_spill] sm:$0xff] }
 0x1f9   : > { %v1193_v11 = vpop.f32.mrf.mxu3  ;;  %v4999_v0 = vpop.f32.mrf.mxu0  ;;  %v5026_v44 = vadd.f32 1.0, %v3439_v14  ;;  %vm5040_vm2 = vcmp.eq.f32.partialorder %v1593_v56, 8.507059e+37  ;;  %vm1619_vm3 = vweird.f32 %v4946_v50  ;;  %v1623_v57 = vand.u32 2147483647, %v4946_v50 }
 0x1fa   : > { %v1194_v19 = vadd.f32 %v1193_v11, %v1144_v23  ;;  %v5001_v13 = vpop.f32.mrf.mxu1  ;;  %v3441_v42 = vpop.eup %3440  ;;  %v1617_v24 = vmul.f32 %v4990_v32, %v1616_v6  ;;  %v1588_v52 = vadd.f32 %v4981_v53, %v1587_v18  ;;  %vm1590_vm4 = vweird.f32 %v4981_v53 }
 0x1fb   : > { %2146 = vmatmul.bf16.gmra.mxu0 %v4905_v36  ;;  %2244 = vmatmul.bf16.gmra.mxu2 %v4905_v36  ;;  %v3443_v4 = vpop.eup %3442  ;;  %v1631_v36 = vsub.f32 1.0, %v1630_v54  ;;  %v5034_v58 = vadd.f32 1.0, %v3441_v42  ;;  %vm1605_vm5 = vweird.f32 %v4986_v16  ;;  %v2978_v26 = vmul.f32 -1.442695, %v5742_v60  ;;  %vm5069_vm6 = vmor %vm1589_vm0, %vm1590_vm4 }
 0x1fc   : > { %v1871_v30 = vmul.f32 %v1839_v2, %v1194_v19  ;;  %2195 = vmatmul.bf16.gmra.mxu1 %v4933_v59  ;;  %v5047_v63 = vadd.f32 1.0, %v3443_v4  ;;  %v1603_v11 = vadd.f32 %v4986_v16, %v1602_v10  ;;  %3446 = vrcp.f32 %v5026_v44  ;;  %vm5085_vm8 = vmor %vm1604_vm1, %vm1605_vm5 }
 0x1fd   : > { %2293 = vmatmul.bf16.gmra.mxu3 %v4933_v59  ;;  %v5057_v23 = vpop.eup %3444  ;;  %v1632_v34 = vmul.f32 %v4997_v22, %v1631_v36  ;;  %v2980_v2 = vmul.f32 -1.442695, %v5030_v17  ;;  %v1625_v29 = vand.u32 2147483648, %v4946_v50  ;;  %v1638_v19 = vand.u32 2147483647, %v4956_v3 }
 0x1fe   : > { %v5007_v1 = vpack.c.bf16 %v1871_v30, %v1869_v38  ;;  %3448 = vrcp.f32 %v5034_v58  ;;  %v2981_v31 = vmul.f32 -1.442695, %v5038_v12  ;;  %v1618_v30 = vadd.f32 %v4990_v32, %v1617_v24 }
 0x1ff   : > { %vm1620_vm7 = vweird.f32 %v4990_v32  ;;  %3450 = vrcp.f32 %v5047_v63  ;;  %v2979_v21 = vmul.f32 -1.442695, %v5745_v28  ;;  %vm1635_vm9 = vweird.f32 %v4997_v22 }
 0x200   : > { %v5015_v40 = vpop.f32.mrf.mxu2  ;;  %v1640_v14 = vand.u32 2147483648, %v4956_v3  ;;  %v1645_v42 = vmul.f32 %v5057_v23, %v5005_v49  ;;  %3452 = vpow2.f32 %v2978_v26  ;;  %v1592_v56 = vsel %vm5069_vm6, %v4981_v53, %v1588_v52  ;;  %vm5104_vm11 = vmor %vm1619_vm3, %vm1620_vm7 }
 0x201   : > { %v5017_v15 = vpop.f32.mrf.mxu3  ;;  %v5053_v43 = vpop.f32.mrf.mxu0  ;;  %v1607_v62 = vsel %vm5085_vm8, %v4986_v16, %v1603_v11  ;;  %v1633_v6 = vadd.f32 %v4997_v22, %v1632_v34  ;;  %3454 = vpow2.f32 %v2980_v2  ;;  %v1596_v4 = vor.u32 1.1754944e-38, %v1595_v45 }
 0x202   : > { %v5055_v48 = vpop.f32.mrf.mxu1  ;;  %vm1609_vm10 = vcmp.eq.f32.partialorder %v1608_v25, 8.507059e+37  ;;  %v1611_v18 = vor.u32 1.1754944e-38, %v1610_v55  ;;  %3456 = vpow2.f32 %v2981_v31  ;;  %v5108_v53 = vpop.eup %3446  ;;  %v1622_v16 = vsel %vm5104_vm11, %v4990_v32, %v1618_v30 }
 0x203   : > { %vm1634_vm12 = vweird.f32 %v4956_v3  ;;  %v1655_v45 = vand.u32 2147483648, %v5005_v49  ;;  %3458 = vpow2.f32 %v2979_v21  ;;  %v1597_v50 = vsel %vm5040_vm2, %v1596_v4, %v1592_v56  ;;  %v5754_v56 = vld [vmem:[#allocation43_spill] sm:$0xff] }
 0x204   : > { %v5115_v36 = vpop.eup %3448  ;;  %v1612_v33 = vsel %vm1609_vm10, %v1611_v18, %v1607_v62  ;;  %v1626_v37 = vor.u32 1.1754944e-38, %v1625_v29  ;;  %vm5121_vm13 = vmor %vm1634_vm12, %vm1635_vm9  ;;  %v1646_v55 = vsub.f32 1.0, %v1645_v42  ;;  %vm1624_vm14 = vcmp.eq.f32.partialorder %v1623_v57, 8.507059e+37  ;;  %v5755_v62 = vld [vmem:[#allocation44_spill] sm:$0xff] }
 0x205   : > { %v5125_v32 = vpop.eup %3450  ;;  %v1637_v3 = vsel %vm5121_vm13, %v4997_v22, %v1633_v6  ;;  %vm5130_vm15 = vcmp.eq.f32.partialorder %v1638_v19, 8.507059e+37  ;;  %v1641_v7 = vor.u32 1.1754944e-38, %v1640_v14  ;;  %vm1649_vm0 = vweird.f32 %v5005_v49 }
 0x206   : > { %v3453_v59 = vpop.eup %3452  ;;  %v1627_v24 = vsel %vm1624_vm14, %v1626_v37, %v1622_v16  ;;  %v1653_v52 = vand.u32 2147483647, %v5005_v49  ;;  %v1660_v26 = vmul.f32 %v5108_v53, %v5026_v44  ;;  %v1840_v22 = vmul.f32 %v1597_v50, %v4277_v46  ;;  %v5756_v16 = vld [vmem:[#allocation46_spill] sm:$0xff] }
 0x207   : > { %v3455_v34 = vpop.eup %3454  ;;  %v1841_v2 = vmul.f32 %v1612_v33, %v5712_v35  ;;  %v5144_v29 = vor.u32 1.1754944e-38, %v1655_v45  ;;  %v1675_v19 = vmul.f32 %v5115_v36, %v5034_v58  ;;  %v1642_v21 = vsel %vm5130_vm15, %v1641_v7, %v1637_v3  ;;  %v5757_v45 = vld [vmem:[#allocation47_spill] sm:$0xff] }
 0x208   : > { %v5077_v9 = vpop.f32.mrf.mxu2  ;;  %v3457_v30 = vpop.eup %3456  ;;  %v1647_v46 = vmul.f32 %v5057_v23, %v1646_v55  ;;  %vm1650_vm1 = vweird.f32 %v5057_v23  ;;  %v1690_v35 = vmul.f32 %v5125_v32, %v5047_v63  ;;  %v1842_v27 = vmul.f32 %v1627_v24, %v4845_v20 }
 0x209   : > { %v5079_v54 = vpop.f32.mrf.mxu3  ;;  %v5138_v11 = vpop.f32.mrf.mxu0  ;;  %v1668_v14 = vand.u32 2147483647, %v5026_v44  ;;  %v5164_v42 = vadd.f32 1.0, %v3453_v59  ;;  %v5168_v6 = vadd.f32 %v5755_v62, %v5754_v56  ;;  %v1661_v4 = vsub.f32 1.0, %v1660_v26  ;;  %vm5205_vm3 = vmor %vm1649_vm0, %vm1650_vm1 }
 0x20a   : > { %v5140_v57 = vpop.f32.mrf.mxu1  ;;  %v1670_v18 = vand.u32 2147483648, %v5026_v44  ;;  %v5171_v10 = vadd.f32 1.0, %v3455_v34  ;;  %v5175_v50 = vadd.f32 %v5757_v45, %v5756_v16  ;;  %v1676_v20 = vsub.f32 1.0, %v1675_v19 }
 0x20b   : > { %2151 = vmatmul.bf16.gmra.mxu0 %v4984_v61  ;;  %2249 = vmatmul.bf16.gmra.mxu2 %v4984_v61  ;;  %v3459_v61 = vpop.eup %3458  ;;  %v5178_v33 = vadd.f32 1.0, %v3457_v30  ;;  %v1101_v37 = vadd.f32 %v5055_v48, %v5053_v43  ;;  %v1648_v25 = vadd.f32 %v5057_v23, %v1647_v46  ;;  %vm1664_vm2 = vweird.f32 %v5026_v44 }
 0x20c   : > { %2200 = vmatmul.bf16.gmra.mxu1 %v5007_v1  ;;  %v1691_v55 = vsub.f32 1.0, %v1690_v35  ;;  %v5184_v3 = vadd.f32 1.0, %v3459_v61  ;;  %v1199_v51 = vadd.f32 %v5079_v54, %v5077_v9  ;;  %v1683_v7 = vand.u32 2147483647, %v5034_v58  ;;  %v5758_v54 = vld [vmem:[#allocation48_spill] sm:$0xff] }
 0x20d   : > { %2298 = vmatmul.bf16.gmra.mxu3 %v5007_v1  ;;  %v1843_v1 = vmul.f32 %v1642_v21, %v4868_v39  ;;  %3460 = vrcp.f32 %v5164_v42  ;;  %v2984_v39 = vmul.f32 -1.442695, %v5168_v6  ;;  %v1099_v59 = vadd.f32 %v5001_v13, %v4999_v0 }
 0x20e   : > { %v1662_v43 = vmul.f32 %v5108_v53, %v1661_v4  ;;  %3462 = vrcp.f32 %v5171_v10  ;;  %v2985_v48 = vmul.f32 -1.442695, %v5175_v50  ;;  %v1197_v24 = vadd.f32 %v5017_v15, %v5015_v40  ;;  %v5761_v40 = vld [vmem:[#allocation49_spill] sm:$0xff] }
 0x20f   : > { %v1677_v9 = vmul.f32 %v5115_v36, %v1676_v20  ;;  %3464 = vrcp.f32 %v5178_v33  ;;  %v2982_v26 = vmul.f32 -1.442695, %v5758_v54  ;;  %v1874_v34 = vmul.f32 %v1842_v27, %v1101_v37 }
 0x210   : > { %v5150_v31 = vpop.f32.mrf.mxu2  ;;  %v1692_v13 = vmul.f32 %v5125_v32, %v1691_v55  ;;  %3466 = vrcp.f32 %v5184_v3  ;;  %v2983_v15 = vmul.f32 -1.442695, %v5761_v40  ;;  %v1875_v19 = vmul.f32 %v1843_v1, %v1199_v51 }
 0x211   : > { %v5152_v38 = vpop.f32.mrf.mxu3  ;;  %v5212_v30 = vpop.f32.mrf.mxu0  ;;  %v1652_v46 = vsel %vm5205_vm3, %v5057_v23, %v1648_v25  ;;  %v1685_v35 = vand.u32 2147483648, %v5034_v58  ;;  %3468 = vpow2.f32 %v2984_v39  ;;  %v1872_v61 = vmul.f32 %v1840_v22, %v1099_v59 }
 0x212   : > { %v1105_v21 = vpop.f32.mrf.mxu1  ;;  %vm1665_vm4 = vweird.f32 %v5108_v53  ;;  %vm1680_vm5 = vweird.f32 %v5115_v36  ;;  %3470 = vpow2.f32 %v2985_v48  ;;  %v1873_v62 = vmul.f32 %v1841_v2, %v1197_v24 }
 0x213   : > { %v5222_v4 = vpop.eup %3460  ;;  %v1663_v16 = vadd.f32 %v5108_v53, %v1662_v43  ;;  %v1678_v45 = vadd.f32 %v5115_v36, %v1677_v9  ;;  %3472 = vpow2.f32 %v2982_v26  ;;  %v1896_v23 = vpack.c.bf16 %v1874_v34, %v1872_v61  ;;  %vm5238_vm8 = vmor %vm1664_vm2, %vm1665_vm4 }
 0x214   : > { %v5226_v1 = vpop.eup %3462  ;;  %v1693_v22 = vadd.f32 %v5125_v32, %v1692_v13  ;;  %vm1695_vm6 = vweird.f32 %v5125_v32  ;;  %3474 = vpow2.f32 %v2983_v15  ;;  %v1897_v20 = vpack.c.bf16 %v1875_v19, %v1873_v62 }
 0x215   : > { %v5230_v37 = vpop.eup %3464  ;;  %vm1654_vm7 = vcmp.eq.f32.partialorder %v1653_v52, 8.507059e+37  ;;  %vm1679_vm9 = vweird.f32 %v5034_v58  ;;  %v1698_v25 = vand.u32 2147483647, %v5047_v63  ;;  %v1700_v55 = vand.u32 2147483648, %v5047_v63 }
 0x216   : > { %v5245_v51 = vpop.eup %3466  ;;  %v1657_v39 = vsel %vm1654_vm7, %v5144_v29, %v1652_v46  ;;  %vm5250_vm10 = vcmp.eq.f32.partialorder %v1668_v14, 8.507059e+37  ;;  %vm5256_vm11 = vmor %vm1679_vm9, %vm1680_vm5  ;;  %vm1694_vm12 = vweird.f32 %v5047_v63  ;;  %v1667_v59 = vsel %vm5238_vm8, %v5108_v53, %v1663_v16 }
 0x217   : > { %v3469_v58 = vpop.eup %3468  ;;  %v1671_v29 = vor.u32 1.1754944e-38, %v1670_v18  ;;  %v1682_v14 = vsel %vm5256_vm11, %v5115_v36, %v1678_v45  ;;  %vm5271_vm13 = vmor %vm1694_vm12, %vm1695_vm6  ;;  %v1735_v63 = vmul.f32 %v5226_v1, %v5171_v10  ;;  %vm1684_vm14 = vcmp.eq.f32.partialorder %v1683_v7, 8.507059e+37 }
 0x218   : > { %v5218_v27 = vpop.f32.mrf.mxu2  ;;  %v3471_v48 = vpop.eup %3470  ;;  %v1686_v53 = vor.u32 1.1754944e-38, %v1685_v35  ;;  %v1697_v44 = vsel %vm5271_vm13, %v5125_v32, %v1693_v22  ;;  %v1750_v36 = vmul.f32 %v5230_v37, %v5178_v33  ;;  %v1844_v24 = vmul.f32 %v1657_v39, %v5723_v8 }
 0x219   : > { %v1203_v56 = vpop.f32.mrf.mxu3  ;;  %v3473_v18 = vpop.eup %3472  ;;  %vm1699_vm15 = vcmp.eq.f32.partialorder %v1698_v25, 8.507059e+37  ;;  %v1701_v9 = vor.u32 1.1754944e-38, %v1700_v55  ;;  %v1705_v26 = vmul.f32 %v5222_v4, %v5164_v42  ;;  %v1672_v7 = vsel %vm5250_vm10, %v1671_v29, %v1667_v59 }
 0x21a   : > { %v3475_v34 = vpop.eup %3474  ;;  %v1687_v0 = vsel %vm1684_vm14, %v1686_v53, %v1682_v14  ;;  %v1720_v32 = vmul.f32 %v5245_v51, %v5184_v3  ;;  %v5289_v13 = vadd.f32 1.0, %v3469_v58  ;;  %v5291_v15 = vpop.f32.mrf.mxu0  ;;  %v1736_v46 = vsub.f32 1.0, %v1735_v63 }
 0x21b   : > { %2156 = vmatmul.bf16.gmra.mxu0 %v1896_v23  ;;  %2254 = vmatmul.bf16.gmra.mxu2 %v1896_v23  ;;  %v5293_v19 = vpop.f32.mrf.mxu1  ;;  %v1702_v8 = vsel %vm1699_vm15, %v1701_v9, %v1697_v44  ;;  %v5295_v35 = vadd.f32 1.0, %v3471_v48  ;;  %v1106_v61 = vadd.f32 %v1105_v21, %v5212_v30  ;;  %v1715_v45 = vand.u32 2147483648, %v5164_v42 }
 0x21c   : > { %2205 = vmatmul.bf16.gmra.mxu1 %v1897_v20  ;;  %v1751_v23 = vsub.f32 1.0, %v1750_v36  ;;  %v5303_v22 = vadd.f32 1.0, %v3473_v18  ;;  %v1846_v2 = vmul.f32 %v1687_v0, %v4969_v41  ;;  %v1706_v25 = vsub.f32 1.0, %v1705_v26 }
 0x21d   : > { %2303 = vmatmul.bf16.gmra.mxu3 %v1897_v20  ;;  %v1204_v20 = vadd.f32 %v1203_v56, %v5218_v27  ;;  %v5307_v55 = vadd.f32 1.0, %v3475_v34  ;;  %v1104_v39 = vadd.f32 %v5140_v57, %v5138_v11  ;;  %v1847_v30 = vmul.f32 %v1702_v8, %v4977_v5 }
 0x21e   : > { %v1721_v21 = vsub.f32 1.0, %v1720_v32  ;;  %3476 = vrcp.f32 %v5289_v13  ;;  %v1202_v49 = vadd.f32 %v5152_v38, %v5150_v31  ;;  %v1713_v52 = vand.u32 2147483647, %v5164_v42 }
 0x21f   : > { %v1737_v27 = vmul.f32 %v5226_v1, %v1736_v46  ;;  %3478 = vrcp.f32 %v5295_v35  ;;  %v1878_v41 = vmul.f32 %v1846_v2, %v1106_v61  ;;  %v1845_v56 = vmul.f32 %v1672_v7, %v5733_v47 }
 0x220   : > { %v5298_v62 = vpop.f32.mrf.mxu2  ;;  %v1752_v58 = vmul.f32 %v5230_v37, %v1751_v23  ;;  %3480 = vrcp.f32 %v5303_v22  ;;  %v1879_v5 = vmul.f32 %v1847_v30, %v1204_v20  ;;  %v1707_v11 = vmul.f32 %v5222_v4, %v1706_v25 }
 0x221   : > { %v5300_v16 = vpop.f32.mrf.mxu3  ;;  %3482 = vrcp.f32 %v5307_v55  ;;  %v1876_v57 = vmul.f32 %v1844_v24, %v1104_v39  ;;  %vm1709_vm0 = vweird.f32 %v5164_v42  ;;  %v1716_v31 = vor.u32 1.1754944e-38, %v1715_v45 }
 0x222   : > { %v1722_v38 = vmul.f32 %v5245_v51, %v1721_v21  ;;  %v1877_v59 = vmul.f32 %v1845_v56, %v1202_v49  ;;  %vm5325_vm1 = vcmp.eq.f32.partialorder %v1713_v52, 8.507059e+37  ;;  %v1738_v47 = vadd.f32 %v5226_v1, %v1737_v27  ;;  %v1061_v44 = vpop.f32.mrf.mxu0 }
 0x223   : > { %vm1739_vm2 = vweird.f32 %v5171_v10  ;;  %vm1740_vm3 = vweird.f32 %v5226_v1  ;;  %v1898_v14 = vpack.c.bf16 %v1878_v41, %v1876_v57  ;;  %v1745_v63 = vand.u32 2147483648, %v5171_v10  ;;  %v1110_v36 = vpop.f32.mrf.mxu1 }
 0x224   : > { %v5332_v43 = vpop.eup %3476  ;;  %v1753_v48 = vadd.f32 %v5230_v37, %v1752_v58  ;;  %vm1755_vm4 = vweird.f32 %v5230_v37  ;;  %v1899_v53 = vpack.c.bf16 %v1879_v5, %v1877_v59  ;;  %v1708_v24 = vadd.f32 %v5222_v4, %v1707_v11  ;;  %vm5351_vm7 = vmor %vm1739_vm2, %vm1740_vm3 }
 0x225   : > { %v5337_v18 = vpop.eup %3478  ;;  %vm1710_vm5 = vweird.f32 %v5222_v4  ;;  %v1743_v9 = vand.u32 2147483647, %v5171_v10  ;;  %v1760_v26 = vand.u32 2147483648, %v5178_v33  ;;  %v1723_v32 = vadd.f32 %v5245_v51, %v1722_v38  ;;  %v1909_v10 = vld [vmem:[#allocation2 + $0x68] sm:$0xff] }
 0x226   : > { %v5343_v0 = vpop.eup %3480  ;;  %vm1725_vm6 = vweird.f32 %v5245_v51  ;;  %vm1754_vm8 = vweird.f32 %v5178_v33  ;;  %v1758_v46 = vand.u32 2147483647, %v5178_v33  ;;  %vm1724_vm9 = vweird.f32 %v5184_v3  ;;  %vm5376_vm11 = vmor %vm1709_vm0, %vm1710_vm5 }
 0x227   : > { %v5357_v61 = vpop.eup %3482  ;;  %v1730_v45 = vand.u32 2147483648, %v5184_v3  ;;  %v1742_v23 = vsel %vm5351_vm7, %v5226_v1, %v1738_v47  ;;  %vm5366_vm10 = vmor %vm1754_vm8, %vm1755_vm4  ;;  %v1795_v20 = vmul.f32 %v5332_v43, %v5289_v13  ;;  %v1728_v1 = vand.u32 2147483647, %v5184_v3 }
 0x228   : > { %v1159_v34 = vpop.f32.mrf.mxu2  ;;  %v1746_v2 = vor.u32 1.1754944e-38, %v1745_v63  ;;  %v1757_v25 = vsel %vm5366_vm10, %v5230_v37, %v1753_v48  ;;  %v1810_v39 = vmul.f32 %v5337_v18, %v5295_v35  ;;  %v1712_v42 = vsel %vm5376_vm11, %v5222_v4, %v1708_v24  ;;  %vm5393_vm12 = vmor %vm1724_vm9, %vm1725_vm6 }
 0x229   : > { %v1208_v7 = vpop.f32.mrf.mxu3  ;;  %vm1744_vm13 = vcmp.eq.f32.partialorder %v1743_v9, 8.507059e+37  ;;  %v1761_v21 = vor.u32 1.1754944e-38, %v1760_v26  ;;  %v1765_v37 = vmul.f32 %v5343_v0, %v5303_v22  ;;  %v1727_v49 = vsel %vm5393_vm12, %v5245_v51, %v1723_v32 }
 0x22a   : > { %v1747_v52 = vsel %vm1744_vm13, %v1746_v2, %v1742_v23  ;;  %vm1759_vm14 = vcmp.eq.f32.partialorder %v1758_v46, 8.507059e+37  ;;  %v1780_v4 = vmul.f32 %v5357_v61, %v5307_v55  ;;  %v1731_v27 = vor.u32 1.1754944e-38, %v1730_v45  ;;  %v5412_v48 = vpop.f32.mrf.mxu0 }
 0x22b   : > { %2161 = vmatmul.bf16.gmra.mxu0 %v1898_v14  ;;  %2259 = vmatmul.bf16.gmra.mxu2 %v1898_v14  ;;  %v1762_v3 = vsel %vm1759_vm14, %v1761_v21, %v1757_v25  ;;  %v1796_v41 = vsub.f32 1.0, %v1795_v20  ;;  %v1111_v56 = vadd.f32 %v1110_v36, %v1061_v44  ;;  %v1717_v58 = vsel %vm5325_vm1, %v1716_v31, %v1712_v42  ;;  %v5414_v29 = vpop.f32.mrf.mxu1 }
 0x22c   : > { %2210 = vmatmul.bf16.gmra.mxu1 %v1899_v53  ;;  %vm1729_vm15 = vcmp.eq.f32.partialorder %v1728_v1, 8.507059e+37  ;;  %v1811_v5 = vsub.f32 1.0, %v1810_v39  ;;  %v1209_v11 = vadd.f32 %v1208_v7, %v1159_v34  ;;  %v1850_v38 = vmul.f32 %v1747_v52, %v5030_v17 }
 0x22d   : > { %2308 = vmatmul.bf16.gmra.mxu3 %v1899_v53  ;;  %v1732_v57 = vsel %vm1729_vm15, %v1731_v27, %v1727_v49  ;;  %v1766_v59 = vsub.f32 1.0, %v1765_v37  ;;  %v1109_v51 = vadd.f32 %v5293_v19, %v5291_v15  ;;  %v1851_v47 = vmul.f32 %v1762_v3, %v5038_v12 }
 0x22e   : > { %v1781_v14 = vsub.f32 1.0, %v1780_v4  ;;  %v1207_v63 = vadd.f32 %v5300_v16, %v5298_v62  ;;  %v1848_v31 = vmul.f32 %v1717_v58, %v5742_v60  ;;  %v1797_v53 = vmul.f32 %v5332_v43, %v1796_v41 }
 0x22f   : > { %v1882_v44 = vmul.f32 %v1850_v38, %v1111_v56  ;;  %v1849_v15 = vmul.f32 %v1732_v57, %v5745_v28  ;;  %v1812_v12 = vmul.f32 %v5337_v18, %v1811_v5  ;;  %v1883_v19 = vmul.f32 %v1851_v47, %v1209_v11 }
 0x230   : > { %v5418_v17 = vpop.f32.mrf.mxu2  ;;  %v1767_v62 = vmul.f32 %v5343_v0, %v1766_v59  ;;  %v1880_v16 = vmul.f32 %v1848_v31, %v1109_v51  ;;  %vm1769_vm0 = vweird.f32 %v5303_v22  ;;  %v1775_v24 = vand.u32 2147483648, %v5303_v22 }
 0x231   : > { %v5420_v36 = vpop.f32.mrf.mxu3  ;;  %v1782_v60 = vmul.f32 %v5357_v61, %v1781_v14  ;;  %v1881_v9 = vmul.f32 %v1849_v15, %v1207_v63  ;;  %vm1770_vm1 = vweird.f32 %v5343_v0  ;;  %v1798_v26 = vadd.f32 %v5332_v43, %v1797_v53 }
 0x232   : > { %vm1800_vm2 = vweird.f32 %v5332_v43  ;;  %v1900_v28 = vpack.c.bf16 %v1882_v44, %v1880_v16  ;;  %v1805_v34 = vand.u32 2147483648, %v5289_v13  ;;  %v1813_v7 = vadd.f32 %v5337_v18, %v1812_v12  ;;  %vm5459_vm9 = vmor %vm1769_vm0, %vm1770_vm1  ;;  %v1066_v42 = vpop.f32.mrf.mxu0  ;;  %v1906_v12 = vld [vmem:[#allocation2 + $0xd8] sm:$0xff] }
 0x233   : > { %vm1815_vm3 = vweird.f32 %v5337_v18  ;;  %v1901_v32 = vpack.c.bf16 %v1883_v19, %v1881_v9  ;;  %v1768_v8 = vadd.f32 %v5343_v0, %v1767_v62  ;;  %vm1799_vm4 = vweird.f32 %v5289_v13  ;;  %v1115_v30 = vpop.f32.mrf.mxu1  ;;  %v1907_v9 = vld [vmem:[#allocation2 + $0x18] sm:$0xff] }
 0x234   : > { %v1803_v46 = vand.u32 2147483647, %v5289_v13  ;;  %v1820_v45 = vand.u32 2147483648, %v5295_v35  ;;  %v1783_v23 = vadd.f32 %v5357_v61, %v1782_v60  ;;  %vm1785_vm5 = vweird.f32 %v5357_v61  ;;  %vm5440_vm6 = vmor %vm1799_vm4, %vm1800_vm2 }
 0x235   : > { %vm1814_vm7 = vweird.f32 %v5295_v35  ;;  %v1818_v20 = vand.u32 2147483647, %v5295_v35  ;;  %v1773_v33 = vand.u32 2147483647, %v5303_v22  ;;  %v1790_v1 = vand.u32 2147483648, %v5307_v55 }
 0x236   : > { %v1802_v13 = vsel %vm5440_vm6, %v5332_v43, %v1798_v26  ;;  %vm5451_vm8 = vmor %vm1814_vm7, %vm1815_vm3  ;;  %vm1784_vm10 = vweird.f32 %v5307_v55  ;;  %v1788_v25 = vand.u32 2147483647, %v5307_v55  ;;  %v1806_v39 = vor.u32 1.1754944e-38, %v1805_v34 }
 0x237   : > { %v1817_v43 = vsel %vm5451_vm8, %v5337_v18, %v1813_v7  ;;  %v1772_v22 = vsel %vm5459_vm9, %v5343_v0, %v1768_v8  ;;  %vm5473_vm11 = vmor %vm1784_vm10, %vm1785_vm5  ;;  %vm1804_vm12 = vcmp.eq.f32.partialorder %v1803_v46, 8.507059e+37  ;;  %v1821_v55 = vor.u32 1.1754944e-38, %v1820_v45  ;;  %v1908_v7 = vld [vmem:[#allocation2 + $0x50] sm:$0xff] }
 0x238   : > { %v1164_v37 = vpop.f32.mrf.mxu2  ;;  %v1776_v52 = vor.u32 1.1754944e-38, %v1775_v24  ;;  %v1787_v18 = vsel %vm5473_vm11, %v5357_v61, %v1783_v23  ;;  %v1807_v4 = vsel %vm1804_vm12, %v1806_v39, %v1802_v13  ;;  %vm1819_vm13 = vcmp.eq.f32.partialorder %v1818_v20, 8.507059e+37  ;;  %v1910_v13 = vld [vmem:[#allocation2 + $0x30] sm:$0xff] }
 0x239   : > { %v1213_v49 = vpop.f32.mrf.mxu3  ;;  %vm1774_vm14 = vcmp.eq.f32.partialorder %v1773_v33, 8.507059e+37  ;;  %v1791_v27 = vor.u32 1.1754944e-38, %v1790_v1  ;;  %v1822_v0 = vsel %vm1819_vm13, %v1821_v55, %v1817_v43  ;;  %v1116_v3 = vadd.f32 %v1115_v30, %v1066_v42  ;;  %v1911_v42 = vld [vmem:[#allocation2 + $0x48] sm:$0xff]  ;;  %v1912_v55 = vld [vmem:[#allocation2 + $0x80] sm:$0xff] }
 0x23a   : > { %v1777_v41 = vsel %vm1774_vm14, %v1776_v52, %v1772_v22  ;;  %vm1789_vm15 = vcmp.eq.f32.partialorder %v1788_v25, 8.507059e+37  ;;  %v1214_v56 = vadd.f32 %v1213_v49, %v1164_v37  ;;  %v1854_v5 = vmul.f32 %v1807_v4, %v5168_v6 }
 0x23b   : > { %2166 = vmatmul.bf16.gmra.mxu0 %v1900_v28  ;;  %2264 = vmatmul.bf16.gmra.mxu2 %v1900_v28  ;;  %v1792_v58 = vsel %vm1789_vm15, %v1791_v27, %v1787_v18  ;;  %v1114_v11 = vadd.f32 %v5414_v29, %v5412_v48  ;;  %v1855_v57 = vmul.f32 %v1822_v0, %v5175_v50  ;;  %v1904_v48 = vld [vmem:[#allocation2 + $0xb0] sm:$0xff]  ;;  %v1913_v27 = vld [vmem:[#allocation2 + $0x88] sm:$0xff] }
 0x23c   : > { %2215 = vmatmul.bf16.gmra.mxu1 %v1901_v32  ;;  %v1212_v61 = vadd.f32 %v5420_v36, %v5418_v17  ;;  %v1852_v38 = vmul.f32 %v1777_v41, %v5758_v54  ;;  %v1886_v59 = vmul.f32 %v1854_v5, %v1116_v3  ;;  %v1853_v51 = vmul.f32 %v1792_v58, %v5761_v40  ;;  %v1905_v54 = vld [vmem:[#allocation2] sm:$0xff] }
 0x23d   : > { %2313 = vmatmul.bf16.gmra.mxu3 %v1901_v32  ;;  %v1887_v47 = vmul.f32 %v1855_v57, %v1214_v56  ;;  %v1914_v56 = vld [vmem:[#allocation2 + $0xe8] sm:$0xff] }
 0x23e   : > { %v1884_v14 = vmul.f32 %v1852_v38, %v1114_v11  ;;  %v1885_v63 = vmul.f32 %v1853_v51, %v1212_v61  ;;  %v1915_v38 = vld [vmem:[#allocation2 + $0xb8] sm:$0xff] }
 0x240   : > { %v1902_v31 = vpack.c.bf16 %v1886_v59, %v1884_v14  ;;  %v1903_v53 = vpack.c.bf16 %v1887_v47, %v1885_v63  ;;  %v1916_v14 = vld [vmem:[#allocation2 + $0x60] sm:$0xff] }
 0x24b   : > { %2171 = vmatmul.bf16.gmra.mxu0 %v1902_v31  ;;  %2269 = vmatmul.bf16.gmra.mxu2 %v1902_v31 }
 0x24c   : > { %2220 = vmatmul.bf16.gmra.mxu1 %v1903_v53 }
 0x24d   : > { %2318 = vmatmul.bf16.gmra.mxu3 %v1903_v53 }
 0x258   : > { %v2137_v6 = vpop.f32.mrf.mxu0 }
 0x259   : > { %v2186_v50 = vpop.f32.mrf.mxu1 }
 0x25a   : > { %v2187_v29 = vadd.f32 %v2186_v50, %v2137_v6  ;;  %v1917_v50 = vld [vmem:[#allocation2 + $0xf0] sm:$0xff] }
 0x25c   : > { %v2324_v44 = vadd.f32 %v2187_v29, %v1904_v48 }
 0x25e   : > { %2356 = vst [vmem:[#allocation2 + $0xb0] sm:$0xff] %v2324_v44  ;;  %v2235_v17 = vpop.f32.mrf.mxu2 }
 0x260   : > { %v2284_v36 = vpop.f32.mrf.mxu3  ;;  %v2139_v15 = vpop.f32.mrf.mxu0 }
 0x261   : > { %v2285_v40 = vadd.f32 %v2284_v36, %v2235_v17  ;;  %v2188_v19 = vpop.f32.mrf.mxu1 }
 0x262   : > { %v2189_v16 = vadd.f32 %v2188_v19, %v2139_v15 }
 0x263   : > { %v2325_v62 = vadd.f32 %v2285_v40, %v1905_v54  ;;  %v1918_v54 = vld [vmem:[#allocation2 + $0x8] sm:$0xff] }
 0x264   : > { %v2326_v24 = vadd.f32 %v2189_v16, %v1906_v12 }
 0x265   : > { %2357 = vst [vmem:[#allocation2] sm:$0xff] %v2325_v62  ;;  %v1919_v62 = vld [vmem:[#allocation2 + $0x78] sm:$0xff] }
 0x266   : > { %2358 = vst [vmem:[#allocation2 + $0xd8] sm:$0xff] %v2326_v24  ;;  %v2237_v60 = vpop.f32.mrf.mxu2 }
 0x268   : > { %v2286_v26 = vpop.f32.mrf.mxu3  ;;  %v2142_v28 = vpop.f32.mrf.mxu0 }
 0x269   : > { %v2287_v34 = vadd.f32 %v2286_v26, %v2237_v60  ;;  %v2191_v32 = vpop.f32.mrf.mxu1 }
 0x26a   : > { %v2192_v46 = vadd.f32 %v2191_v32, %v2142_v28 }
 0x26b   : > { %v2327_v8 = vadd.f32 %v2287_v34, %v1907_v9  ;;  %v1920_v9 = vld [vmem:[#allocation2 + $0x38] sm:$0xff] }
 0x26c   : > { %v2328_v45 = vadd.f32 %v2192_v46, %v1908_v7 }
 0x26d   : > { %2359 = vst [vmem:[#allocation2 + $0x18] sm:$0xff] %v2327_v8  ;;  %v1921_v8 = vld [vmem:[#allocation2 + $0x58] sm:$0xff] }
 0x26e   : > { %2360 = vst [vmem:[#allocation2 + $0x50] sm:$0xff] %v2328_v45  ;;  %v2240_v23 = vpop.f32.mrf.mxu2 }
 0x270   : > { %v2289_v20 = vpop.f32.mrf.mxu3  ;;  %v2144_v33 = vpop.f32.mrf.mxu0 }
 0x271   : > { %v2290_v1 = vadd.f32 %v2289_v20, %v2240_v23  ;;  %v2193_v2 = vpop.f32.mrf.mxu1 }
 0x272   : > { %v2194_v25 = vadd.f32 %v2193_v2, %v2144_v33 }
 0x273   : > { %v2329_v35 = vadd.f32 %v2290_v1, %v1909_v10  ;;  %v1922_v10 = vld [vmem:[#allocation2 + $0x40] sm:$0xff] }
 0x274   : > { %v2330_v39 = vadd.f32 %v2194_v25, %v1910_v13 }
 0x275   : > { %2361 = vst [vmem:[#allocation2 + $0x68] sm:$0xff] %v2329_v35  ;;  %v1923_v35 = vld [vmem:[#allocation2 + $0xc8] sm:$0xff] }
 0x276   : > { %2362 = vst [vmem:[#allocation2 + $0x30] sm:$0xff] %v2330_v39  ;;  %v2242_v43 = vpop.f32.mrf.mxu2 }
 0x278   : > { %v2291_v30 = vpop.f32.mrf.mxu3  ;;  %v2147_v22 = vpop.f32.mrf.mxu0 }
 0x279   : > { %v2292_v21 = vadd.f32 %v2291_v30, %v2242_v43  ;;  %v2196_v37 = vpop.f32.mrf.mxu1 }
 0x27a   : > { %v2197_v52 = vadd.f32 %v2196_v37, %v2147_v22 }
 0x27b   : > { %v2331_v49 = vadd.f32 %v2292_v21, %v1911_v42  ;;  %v1924_v42 = vld [vmem:[#allocation2 + $0xe0] sm:$0xff] }
 0x27c   : > { %v2332_v18 = vadd.f32 %v2197_v52, %v1912_v55 }
 0x27d   : > { %2363 = vst [vmem:[#allocation2 + $0x48] sm:$0xff] %v2331_v49  ;;  %v1925_v49 = vld [vmem:[#allocation2 + $0x90] sm:$0xff] }
 0x27e   : > { %2364 = vst [vmem:[#allocation2 + $0x80] sm:$0xff] %v2332_v18  ;;  %v2245_v4 = vpop.f32.mrf.mxu2 }
 0x280   : > { %v2294_v0 = vpop.f32.mrf.mxu3  ;;  %v2149_v3 = vpop.f32.mrf.mxu0 }
 0x281   : > { %v2295_v41 = vadd.f32 %v2294_v0, %v2245_v4  ;;  %v2198_v58 = vpop.f32.mrf.mxu1 }
 0x282   : > { %v2199_v11 = vadd.f32 %v2198_v58, %v2149_v3 }
 0x283   : > { %v2333_v5 = vadd.f32 %v2295_v41, %v1913_v27  ;;  %v1926_v27 = vld [vmem:[#allocation2 + $0x70] sm:$0xff] }
 0x284   : > { %v2334_v57 = vadd.f32 %v2199_v11, %v1914_v56 }
 0x285   : > { %2365 = vst [vmem:[#allocation2 + $0x88] sm:$0xff] %v2333_v5  ;;  %v1927_v5 = vld [vmem:[#allocation2 + $0xc0] sm:$0xff] }
 0x286   : > { %2366 = vst [vmem:[#allocation2 + $0xe8] sm:$0xff] %v2334_v57  ;;  %v2247_v61 = vpop.f32.mrf.mxu2 }
 0x288   : > { %v2296_v59 = vpop.f32.mrf.mxu3  ;;  %v2152_v51 = vpop.f32.mrf.mxu0 }
 0x289   : > { %v2297_v47 = vadd.f32 %v2296_v59, %v2247_v61  ;;  %v2201_v63 = vpop.f32.mrf.mxu1 }
 0x28a   : > { %v2202_v53 = vadd.f32 %v2201_v63, %v2152_v51 }
 0x28b   : > { %v2335_v31 = vadd.f32 %v2297_v47, %v1915_v38  ;;  %v1928_v38 = vld [vmem:[#allocation2 + $0xa8] sm:$0xff] }
 0x28c   : > { %v2336_v6 = vadd.f32 %v2202_v53, %v1916_v14 }
 0x28d   : > { %2367 = vst [vmem:[#allocation2 + $0xb8] sm:$0xff] %v2335_v31  ;;  %v1929_v31 = vld [vmem:[#allocation2 + $0xd0] sm:$0xff] }
 0x28e   : > { %2368 = vst [vmem:[#allocation2 + $0x60] sm:$0xff] %v2336_v6  ;;  %v2250_v48 = vpop.f32.mrf.mxu2 }
 0x290   : > { %v2299_v29 = vpop.f32.mrf.mxu3  ;;  %v2154_v44 = vpop.f32.mrf.mxu0 }
 0x291   : > { %v2300_v17 = vadd.f32 %v2299_v29, %v2250_v48  ;;  %v2203_v36 = vpop.f32.mrf.mxu1 }
 0x292   : > { %v2204_v40 = vadd.f32 %v2203_v36, %v2154_v44 }
 0x293   : > { %v2337_v15 = vadd.f32 %v2300_v17, %v1917_v50  ;;  %v1930_v50 = vld [vmem:[#allocation2 + $0x10] sm:$0xff] }
 0x294   : > { %v2338_v12 = vadd.f32 %v2204_v40, %v1918_v54 }
 0x295   : > { %2369 = vst [vmem:[#allocation2 + $0xf0] sm:$0xff] %v2337_v15  ;;  %v1931_v15 = vld [vmem:[#allocation2 + $0x28] sm:$0xff] }
 0x296   : > { %2370 = vst [vmem:[#allocation2 + $0x8] sm:$0xff] %v2338_v12  ;;  %v2252_v19 = vpop.f32.mrf.mxu2 }
 0x298   : > { %v2301_v16 = vpop.f32.mrf.mxu3  ;;  %v2157_v24 = vpop.f32.mrf.mxu0 }
 0x299   : > { %v2302_v60 = vadd.f32 %v2301_v16, %v2252_v19  ;;  %v2206_v26 = vpop.f32.mrf.mxu1 }
 0x29a   : > { %v2207_v34 = vadd.f32 %v2206_v26, %v2157_v24 }
 0x29b   : > { %v2339_v28 = vadd.f32 %v2302_v60, %v1919_v62  ;;  %v1932_v62 = vld [vmem:[#allocation2 + $0xa0] sm:$0xff] }
 0x29c   : > { %v2340_v7 = vadd.f32 %v2207_v34, %v1920_v9 }
 0x29d   : > { %2371 = vst [vmem:[#allocation2 + $0x78] sm:$0xff] %v2339_v28  ;;  %v1933_v28 = vld [vmem:[#allocation2 + $0xf8] sm:$0xff] }
 0x29e   : > { %2372 = vst [vmem:[#allocation2 + $0x38] sm:$0xff] %v2340_v7  ;;  %v2255_v32 = vpop.f32.mrf.mxu2 }
 0x2a0   : > { %v2304_v46 = vpop.f32.mrf.mxu3  ;;  %v2159_v45 = vpop.f32.mrf.mxu0 }
 0x2a1   : > { %v2305_v23 = vadd.f32 %v2304_v46, %v2255_v32  ;;  %v2208_v20 = vpop.f32.mrf.mxu1 }
 0x2a2   : > { %v2209_v1 = vadd.f32 %v2208_v20, %v2159_v45 }
 0x2a3   : > { %v2341_v33 = vadd.f32 %v2305_v23, %v1921_v8  ;;  %v1934_v8 = vld [vmem:[#allocation2 + $0x20] sm:$0xff] }
 0x2a4   : > { %v2342_v13 = vadd.f32 %v2209_v1, %v1922_v10 }
 0x2a5   : > { %2373 = vst [vmem:[#allocation2 + $0x58] sm:$0xff] %v2341_v33  ;;  %v1935_v33 = vld [vmem:[#allocation2 + $0x98] sm:$0xff] }
 0x2a6   : > { %2374 = vst [vmem:[#allocation2 + $0x40] sm:$0xff] %v2342_v13  ;;  %v2257_v2 = vpop.f32.mrf.mxu2 }
 0x2a8   : > { %v2306_v25 = vpop.f32.mrf.mxu3  ;;  %v2162_v39 = vpop.f32.mrf.mxu0 }
 0x2a9   : > { %v2307_v43 = vadd.f32 %v2306_v25, %v2257_v2  ;;  %v2211_v30 = vpop.f32.mrf.mxu1 }
 0x2aa   : > { %v2212_v21 = vadd.f32 %v2211_v30, %v2162_v39 }
 0x2ab   : > { %v2343_v22 = vadd.f32 %v2307_v43, %v1923_v35 }
 0x2ac   : > { %v2344_v55 = vadd.f32 %v2212_v21, %v1924_v42 }
 0x2ad   : > { %2375 = vst [vmem:[#allocation2 + $0xc8] sm:$0xff] %v2343_v22 }
 0x2ae   : > { %2376 = vst [vmem:[#allocation2 + $0xe0] sm:$0xff] %v2344_v55  ;;  %v2260_v37 = vpop.f32.mrf.mxu2 }
 0x2b0   : > { %v2309_v52 = vpop.f32.mrf.mxu3  ;;  %v2164_v18 = vpop.f32.mrf.mxu0 }
 0x2b1   : > { %v2310_v4 = vadd.f32 %v2309_v52, %v2260_v37  ;;  %v2213_v0 = vpop.f32.mrf.mxu1 }
 0x2b2   : > { %v2214_v41 = vadd.f32 %v2213_v0, %v2164_v18 }
 0x2b3   : > { %v2345_v3 = vadd.f32 %v2310_v4, %v1925_v49 }
 0x2b4   : > { %v2346_v56 = vadd.f32 %v2214_v41, %v1926_v27 }
 0x2b5   : > { %2377 = vst [vmem:[#allocation2 + $0x90] sm:$0xff] %v2345_v3 }
 0x2b6   : > { %2378 = vst [vmem:[#allocation2 + $0x70] sm:$0xff] %v2346_v56  ;;  %v2262_v58 = vpop.f32.mrf.mxu2 }
 0x2b8   : > { %v2311_v11 = vpop.f32.mrf.mxu3  ;;  %v2167_v57 = vpop.f32.mrf.mxu0 }
 0x2b9   : > { %v2312_v61 = vadd.f32 %v2311_v11, %v2262_v58  ;;  %v2216_v59 = vpop.f32.mrf.mxu1 }
 0x2ba   : > { %v2217_v47 = vadd.f32 %v2216_v59, %v2167_v57 }
 0x2bb   : > { %v2347_v51 = vadd.f32 %v2312_v61, %v1927_v5 }
 0x2bc   : > { %v2348_v14 = vadd.f32 %v2217_v47, %v1928_v38 }
 0x2bd   : > { %2379 = vst [vmem:[#allocation2 + $0xc0] sm:$0xff] %v2347_v51 }
 0x2be   : > { %2380 = vst [vmem:[#allocation2 + $0xa8] sm:$0xff] %v2348_v14  ;;  %v2265_v63 = vpop.f32.mrf.mxu2 }
 0x2c0   : > { %v2314_v53 = vpop.f32.mrf.mxu3  ;;  %v2169_v6 = vpop.f32.mrf.mxu0 }
 0x2c1   : > { %v2315_v48 = vadd.f32 %v2314_v53, %v2265_v63  ;;  %v2218_v29 = vpop.f32.mrf.mxu1 }
 0x2c2   : > { %v2219_v17 = vadd.f32 %v2218_v29, %v2169_v6 }
 0x2c3   : > { %v2349_v44 = vadd.f32 %v2315_v48, %v1929_v31 }
 0x2c4   : > { %v2350_v54 = vadd.f32 %v2219_v17, %v1930_v50 }
 0x2c5   : > { %2381 = vst [vmem:[#allocation2 + $0xd0] sm:$0xff] %v2349_v44 }
 0x2c6   : > { %2382 = vst [vmem:[#allocation2 + $0x10] sm:$0xff] %v2350_v54  ;;  %v2267_v36 = vpop.f32.mrf.mxu2 }
 0x2c8   : > { %v2316_v40 = vpop.f32.mrf.mxu3  ;;  %v2172_v12 = vpop.f32.mrf.mxu0 }
 0x2c9   : > { %v2317_v19 = vadd.f32 %v2316_v40, %v2267_v36  ;;  %v2221_v16 = vpop.f32.mrf.mxu1 }
 0x2ca   : > { %v2222_v60 = vadd.f32 %v2221_v16, %v2172_v12 }
 0x2cb   : > { %v2351_v24 = vadd.f32 %v2317_v19, %v1931_v15 }
 0x2cc   : > { %v2352_v9 = vadd.f32 %v2222_v60, %v1932_v62 }
 0x2cd   : > { %2383 = vst [vmem:[#allocation2 + $0x28] sm:$0xff] %v2351_v24 }
 0x2ce   : > { %2384 = vst [vmem:[#allocation2 + $0xa0] sm:$0xff] %v2352_v9  ;;  %v2270_v26 = vpop.f32.mrf.mxu2 }
 0x2d0   : > { %v2319_v34 = vpop.f32.mrf.mxu3  ;;  %v2174_v32 = vpop.f32.mrf.mxu0 }
 0x2d1   : > { %v2320_v7 = vadd.f32 %v2319_v34, %v2270_v26  ;;  %v2223_v46 = vpop.f32.mrf.mxu1 }
 0x2d2   : > { %v2224_v23 = vadd.f32 %v2223_v46, %v2174_v32 }
 0x2d3   : > { %v2353_v45 = vadd.f32 %v2320_v7, %v1933_v28 }
 0x2d4   : > { %v2354_v10 = vadd.f32 %v2224_v23, %v1934_v8 }
 0x2d5   : > { %2385 = vst [vmem:[#allocation2 + $0xf8] sm:$0xff] %v2353_v45 }
 0x2d6   : > { %2386 = vst [vmem:[#allocation2 + $0x20] sm:$0xff] %v2354_v10  ;;  %v2272_v20 = vpop.f32.mrf.mxu2 }
 0x2d8   : > { %v2321_v1 = vpop.f32.mrf.mxu3 }
 0x2d9   : > { %v2322_v13 = vadd.f32 %v2321_v1, %v2272_v20  ;;  %2391 = sbr.rel (%p3114_p12) target bundleno = 753 (0x2f1), region = 52 }
 0x2db   : > { %v2355_v2 = vadd.f32 %v2322_v13, %v1935_v33 }
 0x2dd   : > { %2387 = vst [vmem:[#allocation2 + $0x98] sm:$0xff] %v2355_v2 }
 0x2de   : > { %v2392_v35 = vld [vmem:[#allocation2 + $0xb0] sm:$0xff]  ;;  %v2393_v25 = vld [vmem:[#allocation2] sm:$0xff]  ;;  %v2394_v39 = vld [vmem:[#allocation2 + $0xd8] sm:$0xff] }
 0x2df   : > { %v2424_v43 = vpack.c.bf16 %v2393_v25, %v2392_v35  ;;  %v2395_v42 = vld [vmem:[#allocation2 + $0x18] sm:$0xff]  ;;  %v2396_v30 = vld [vmem:[#allocation2 + $0x50] sm:$0xff]  ;;  %v2397_v22 = vld [vmem:[#allocation2 + $0x68] sm:$0xff] }
 0x2e0   : > { %v2425_v21 = vpack.c.bf16 %v2395_v42, %v2394_v39  ;;  %v2426_v55 = vpack.c.bf16 %v2397_v22, %v2396_v30  ;;  %v2398_v37 = vld [vmem:[#allocation2 + $0x30] sm:$0xff]  ;;  %v2399_v49 = vld [vmem:[#allocation2 + $0x48] sm:$0xff]  ;;  %v2400_v52 = vld [vmem:[#allocation2 + $0x80] sm:$0xff] }
 0x2e1   : > { %2440 = vst [vmem:[%s3965_s12] sm:$0xff] %v2424_v43  ;;  %v2427_v18 = vpack.c.bf16 %v2399_v49, %v2398_v37  ;;  %v2401_v4 = vld [vmem:[#allocation2 + $0x88] sm:$0xff]  ;;  %v2403_v0 = vld [vmem:[#allocation2 + $0xb8] sm:$0xff]  ;;  %v2404_v56 = vld [vmem:[#allocation2 + $0x60] sm:$0xff] }
 0x2e2   : > { %v2402_v27 = vld [vmem:[#allocation2 + $0xe8] sm:$0xff]  ;;  %2441 = vst [vmem:[%s3965_s12 + $0x8] sm:$0xff] %v2425_v21  ;;  %v2428_v3 = vpack.c.bf16 %v2401_v4, %v2400_v52  ;;  %v2405_v58 = vld [vmem:[#allocation2 + $0xf0] sm:$0xff]  ;;  %v2407_v57 = vld [vmem:[#allocation2 + $0x78] sm:$0xff] }
 0x2e3   : > { %v2429_v41 = vpack.c.bf16 %v2403_v0, %v2402_v27  ;;  %v2406_v5 = vld [vmem:[#allocation2 + $0x8] sm:$0xff]  ;;  %2442 = vst [vmem:[%s3965_s12 + $0x10] sm:$0xff] %v2426_v55  ;;  %v2430_v11 = vpack.c.bf16 %v2405_v58, %v2404_v56  ;;  %v2408_v61 = vld [vmem:[#allocation2 + $0x38] sm:$0xff]  ;;  %v2410_v51 = vld [vmem:[#allocation2 + $0x40] sm:$0xff] }
 0x2e4   : > { %v2409_v38 = vld [vmem:[#allocation2 + $0x58] sm:$0xff]  ;;  %2443 = vst [vmem:[%s3965_s12 + $0x18] sm:$0xff] %v2427_v18  ;;  %v2431_v59 = vpack.c.bf16 %v2407_v57, %v2406_v5  ;;  %v2411_v47 = vld [vmem:[#allocation2 + $0xc8] sm:$0xff]  ;;  %v2412_v14 = vld [vmem:[#allocation2 + $0xe0] sm:$0xff] }
 0x2e5   : > { %2444 = vst [vmem:[%s3965_s12 + $0x20] sm:$0xff] %v2428_v3  ;;  %v2432_v63 = vpack.c.bf16 %v2409_v38, %v2408_v61  ;;  %v2413_v31 = vld [vmem:[#allocation2 + $0x90] sm:$0xff]  ;;  %v2415_v6 = vld [vmem:[#allocation2 + $0xc0] sm:$0xff]  ;;  %v2433_v48 = vpack.c.bf16 %v2411_v47, %v2410_v51  ;;  %v2416_v50 = vld [vmem:[#allocation2 + $0xa8] sm:$0xff] }
 0x2e6   : > { %v2414_v53 = vld [vmem:[#allocation2 + $0x70] sm:$0xff]  ;;  %2445 = vst [vmem:[%s3965_s12 + $0x28] sm:$0xff] %v2429_v41  ;;  %v2434_v44 = vpack.c.bf16 %v2413_v31, %v2412_v14  ;;  %v2419_v54 = vld [vmem:[#allocation2 + $0x28] sm:$0xff]  ;;  %v2420_v15 = vld [vmem:[#allocation2 + $0xa0] sm:$0xff] }
 0x2e7   : > { %v2417_v29 = vld [vmem:[#allocation2 + $0xd0] sm:$0xff]  ;;  %2446 = vst [vmem:[%s3965_s12 + $0x30] sm:$0xff] %v2430_v11  ;;  %v2435_v36 = vpack.c.bf16 %v2415_v6, %v2414_v53  ;;  %v2421_v40 = vld [vmem:[#allocation2 + $0xf8] sm:$0xff]  ;;  %v2422_v19 = vld [vmem:[#allocation2 + $0x20] sm:$0xff] }
 0x2e8   : > { %v2418_v17 = vld [vmem:[#allocation2 + $0x10] sm:$0xff]  ;;  %2447 = vst [vmem:[%s3965_s12 + $0x38] sm:$0xff] %v2431_v59  ;;  %v2436_v12 = vpack.c.bf16 %v2417_v29, %v2416_v50  ;;  %v2423_v62 = vld [vmem:[#allocation2 + $0x98] sm:$0xff]  ;;  %v2438_v24 = vpack.c.bf16 %v2421_v40, %v2420_v15 }
 0x2e9   : > { %2448 = vst [vmem:[%s3965_s12 + $0x40] sm:$0xff] %v2432_v63  ;;  %v2437_v16 = vpack.c.bf16 %v2419_v54, %v2418_v17  ;;  %v2439_v60 = vpack.c.bf16 %v2423_v62, %v2422_v19 }
 0x2ea   : > { %2449 = vst [vmem:[%s3965_s12 + $0x48] sm:$0xff] %v2433_v48 }
 0x2eb   : > { %2450 = vst [vmem:[%s3965_s12 + $0x50] sm:$0xff] %v2434_v44 }
 0x2ec   : > { %2451 = vst [vmem:[%s3965_s12 + $0x58] sm:$0xff] %v2435_v36 }
 0x2ed   : > { %2452 = vst [vmem:[%s3965_s12 + $0x60] sm:$0xff] %v2436_v12 }
 0x2ee   : > { %2453 = vst [vmem:[%s3965_s12 + $0x68] sm:$0xff] %v2437_v16 }
 0x2ef   : > { %2454 = vst [vmem:[%s3965_s12 + $0x70] sm:$0xff] %v2438_v24 }
 0x2f0   : > { %2455 = vst [vmem:[%s3965_s12 + $0x78] sm:$0xff] %v2439_v60 }
 0x2f1 PF: > { %s2457_s18 = scalar_lea.sflag [#allocation5], %s3945_s3  ;;  %2463 = sbr.rel (!%p3872_p4) target bundleno = 795 (0x31b), region = 56 }
 0x2f2   : > { %s5788_s23 = sld [smem:[#allocation16_spill]] (%p3872_p4) }
 0x2f8   : > { %s3116_s4 = sshll.u32 %s5788_s23, 4 }
 0x2f9   : > { %s2465_s9 = ssub.s32 25, %s3116_s4 }
 0x2fa   : > { %p2466_p13 = scmp.lt.s32.totalorder %s2465_s9, 16 }
 0x2fc   : > { %s5815_s9 = smov (!%p2466_p13, %s2465_s9), 16 }
 0x2fd   : > { %s3244_s17 = sshll.u32 %s5815_s9, 3 }
 0x2fe   : > { %s2470_s5 = ssub.s32 128, %s3244_s17 }
 0x2ff   : > { %s2471_s6 = sshll.u32 %s2470_s5, 4 }
 0x300   : > { %2472 = vsyncadd %s2457_s18, %s2471_s6  ;;  %p5514_p5 = scmp.ne.s32.totalorder %s3244_s17, 0  ;;  %s3246_s24 = sshll.u32 %s5788_s23, 7 }
 0x301   : > { %s5790_s0 = sld [smem:[#allocation52_spill]]  ;;  %s2478_s14 = sshll.u32 %s3965_s12, 4  ;;  %s5523_s14 = int_to_ptr.vmem [resolvable:$true] %s2478_s14 }
 0x302   : > { %s3123_s30 = sshll.u32 %s5815_s9, 7  ;;  %s3579_s8 = sshra.s32 %s5523_s14, 4  ;;  %s3580_s8 = int_to_ptr.vmem [resolvable:$true] %s3579_s8 }
 0x303   : > { %s3581_s26 = sshrl.u32 %s3123_s30, 4  ;;  %s3727_s28 = smov [#allocation9]  }
 0x304   : > { %s3586_s27 = scalar_lea.vmem %s3580_s8, %s3581_s26  ;;  %s3590_s15 = scalar_lea.vmem %s3727_s28, 256 }
 0x305   : > { %p3587_p4 = scmp.ne.s32.totalorder %s3580_s8, %s3586_s27  ;;  %p3592_p1 = scmp.lt.s32.totalorder %s3590_s15, %s3586_s27 }
 0x307   : > { %s2476_s21 = scalar_lea.hbm %s5790_s0, %s3246_s24  ;;  %p3588_p8 = pnand %p3587_p4, %p5514_p5 }
 0x308   : > { %s2480_s19 = sshll.u32 %s2476_s21, 4  ;;  %s5525_s19 = int_to_ptr.hbm [resolvable:$true] %s2480_s19 }
 0x309   : > { %p3589_p2 = pneg %p3588_p8 }
 0x30b   : > { %p3594_p6 = pnand %p3592_p1, %p3589_p2 }
 0x30d   : > { %3597 = shalt.err (!%p3594_p6)
}
 0x30e   : > { %s3598_s25 = sshra.s32 %s5525_s19, 4  ;;  %s3609_s4 = scalar_lea.hbm %s5790_s0, 200  ;;  %s3599_s25 = int_to_ptr.hbm [resolvable:$true] %s3598_s25 }
 0x30f   : > { %s3605_s29 = scalar_lea.hbm %s3599_s25, %s3581_s26  ;;  %p3610_p0 = scmp.lt.s32.totalorder %s3599_s25, %s5790_s0 }
 0x310   : > { %p3606_p9 = scmp.ne.s32.totalorder %s3599_s25, %s3605_s29  ;;  %p3611_p7 = scmp.lt.s32.totalorder %s3609_s4, %s3605_s29 }
 0x312   : > { %p3607_p3 = pnand %p3606_p9, %p5514_p5  ;;  %p3612_p12 = por %p3611_p7, %p3610_p0 }
 0x314   : > { %p3608_p11 = pneg %p3607_p3 }
 0x316   : > { %p3613_p13 = pnand %p3612_p12, %p3608_p11 }
 0x318   : > { %3616 = shalt.err (!%p3613_p13)
}
 0x319   : > { %s3728_s6 = smov 128   ;;  %s3729_s24 = smov 8  }
 0x31a   : > { %2486 = dma.vmem_to_hbm [thread:$0]  (%p5514_p5), %s5523_s14, %s3123_s30, %s5525_s19, %s2457_s18, %s3728_s6, %s3728_s6, %s3729_s24  }
 0x31b PF: > { %s5791_s11 = sld [smem:[#allocation14_spill]]  ;;  %p3257_p4 = scmp.ge.s32.totalorder %s3716_s22, 2 }
 0x31d   : > { %p3254_p8 = pnand %p3257_p4, %p3879_p10 }
 0x31f   : > { %p3255_p2 = pneg %p3254_p8 }
 0x321   : > { %s2495_s21 = sand.u32 1, %s5791_s11  }
 0x322   : > { %s2496_s8 = scalar_lea.sflag [#allocation5], %s2495_s21 }
 0x323   : > { %3671 = dma.done.wait (%p3255_p2), %s2496_s8, 2048  }
 0x324   : > { %3673 = vsyncadd (%p3255_p2), %s2496_s8, 4294965248  ;;  %s22_s22 = sadd.s32 1, %s3716_s22   ;;  %s5793_s3 = sld [smem:[#allocation13_spill]] }
 0x325   : > { %p19_p1 = scmp.ge.s32.totalorder %s22_s22, 6   ;;  %s5794_s14 = sld [smem:[#allocation20_spill]] }
 0x326   : > { %s5795_s18 = sld [smem:[#allocation15_spill]]  ;;  %s5800_s12 = smov %s3680_s13 }
 0x327   : > { %s5796_s17 = sld [smem:[#allocation21_spill]]  ;;  %s5802_s15 = smov %s3692_s16 }
 0x328   : > { %s5797_s19 = sld [smem:[#allocation17_spill]] }
 0x329   : > { %s5798_s9 = sld [smem:[#allocation18_spill]] }
 0x32a   : > { %s5799_s21 = sld [smem:[#allocation19_spill]]  ;;  %s5801_s13 = smov %s5793_s3 }
 0x32b   :  { %21 = sbr.rel (!%p19_p1) target bundleno = 14 (0xe), region = 109 }
 0x32c   : > { %s5803_s16 = smov %s5795_s18  ;;  %s5804_s18 = smov %s3708_s20 }
 0x32f   : > { %s5805_s20 = smov %s5798_s9 }
 0x330   :  { %2502 = vsyncpa [#allocation4], 1 }
 0x331   :  { %2504 = vsyncpa [#allocation4 + $0x1], 1 }
 0x332   :  { %2505 = vsyncpa [#allocation7], 1 }
 0x333   :  { %2507 = vsyncpa [#allocation7 + $0x1], 1 }
 0x334   :  { %2508 = vsyncpa [#allocation5], 1 }
 0x335   :  { %2510 = vsyncpa [#allocation5 + $0x1], 1 }

</bundles_post_ra>
